<compile_context>
chip_gen: v5e
topology: v5e:2x2
jax: 0.10.0
libtpu: 0.0.40
codegen_flags: <defaults>
</compile_context>

<pallas_src>
import functools
import math

import jax
import jax.numpy as jnp
from jax.experimental import pallas as pl
from jax.experimental.pallas import tpu as pltpu

DIM = 32
HEAD = 2
LINEAR_UNIT = 64
OUT_DIM = 80
LN_EPS = 1e-12
NEG_INF = float(jnp.finfo(jnp.float32).min)


# --------------------------- shared kernel helpers ---------------------------

def _layer_norm_val(y, g, b):
    mu = jnp.mean(y, axis=-1, keepdims=True)
    var = jnp.mean((y - mu) ** 2, axis=-1, keepdims=True)
    return (y - mu) * jax.lax.rsqrt(var + LN_EPS) * g + b


def _encoder_layer_body(x, attmask, ctx_ref,
                        ln1g_ref, ln1b_ref, wqkv_ref, bqkv_ref, wo_ref, bo_ref,
                        ln2g_ref, ln2b_ref, w1_ref, b1_ref, w2_ref, b2_ref,
                        *, B, T, D, head):
    """Pre-norm transformer encoder layer (MHA + FFN), fully VMEM-resident.

    x:        (B*T, D) value, already positionally encoded.
    attmask:  (B, T) float value, 1.0 = valid key position.
    ctx_ref:  (B*T, D) VMEM scratch used to assemble per-(batch, head) context.
    """
    dk = D // head
    scale = 1.0 / math.sqrt(dk)

    # ---- multi-headed self-attention (pre-norm) ----
    xn = _layer_norm_val(x, ln1g_ref[...], ln1b_ref[...])
    # Fused QKV projection: one (M, D) x (D, 3D) matmul.
    qkv = jnp.dot(xn, wqkv_ref[...], preferred_element_type=jnp.float32) + bqkv_ref[...]

    for b in range(B):                      # B, head are tiny & static -> unrolled
        r0, r1 = b * T, (b + 1) * T
        valid = attmask[b:b + 1, :] > 0.5   # (1, T) key mask, broadcast over queries
        head_ctx = []
        for h in range(head):
            c0 = h * dk
            q = qkv[r0:r1, c0:c0 + dk]                       # (T, dk)
            k = qkv[r0:r1, D + c0:D + c0 + dk]               # (T, dk)
            v = qkv[r0:r1, 2 * D + c0:2 * D + c0 + dk]       # (T, dk)
            scores = jax.lax.dot_general(
                q, k, (((1,), (1,)), ((), ())),
                preferred_element_type=jnp.float32) * scale  # (T, T)
            scores = jnp.where(valid, scores, NEG_INF)
            attn = jax.nn.softmax(scores, axis=-1)
            attn = jnp.where(valid, attn, 0.0)               # ESPnet masked_fill(0.0)
            head_ctx.append(jnp.dot(attn, v, preferred_element_type=jnp.float32))
        ctx_ref[r0:r1, :] = jnp.concatenate(head_ctx, axis=-1)

    attn_out = jnp.dot(ctx_ref[...], wo_ref[...],
                       preferred_element_type=jnp.float32) + bo_ref[...]
    x = x + attn_out                                         # residual

    # ---- position-wise feed-forward (pre-norm), hidden stays in VMEM ----
    xn2 = _layer_norm_val(x, ln2g_ref[...], ln2b_ref[...])
    h1 = jnp.maximum(
        jnp.dot(xn2, w1_ref[...], preferred_element_type=jnp.float32) + b1_ref[...],
        0.0)
    ff = jnp.dot(h1, w2_ref[...], preferred_element_type=jnp.float32) + b2_ref[...]
    return x + ff                                            # residual


# ------------------------------ fused kernels -------------------------------

def _content_upsample_kernel(
        x_ref, maskcol_ref, pe_ref, attmask_ref,
        ln1g, ln1b, wqkv, bqkv, wo, bo, ln2g, ln2b, w1, b1, w2, b2,
        uw0, uw1, uw2, uw3, ub, prev_ref, next_ref,
        o_ref, ctx_ref, *, B, T, D, head, pos_scale):
    # prologue: input masking + absolute positional encoding (x*sqrt(D) + pe)
    x = x_ref[...] * maskcol_ref[...]
    x = x * pos_scale + pe_ref[...]

    y = _encoder_layer_body(x, attmask_ref[...], ctx_ref,
                            ln1g, ln1b, wqkv, bqkv, wo, bo,
                            ln2g, ln2b, w1, b1, w2, b2,
                            B=B, T=T, D=D, head=head)

    # ConvTranspose1d(k=4, s=2, p=1), phase-decomposed:
    #   out[2t]   = W1 @ y[t] + W3 @ y[t-1] + b
    #   out[2t+1] = W0 @ y[t+1] + W2 @ y[t] + b
    # Time shifts are realized as matmuls with small constant shift matrices
    # (batch-boundary aware), so no shifted copies of y are DMA'd from HBM.
    a_even = jnp.dot(y, uw1[...], preferred_element_type=jnp.float32)
    c_prev = jnp.dot(prev_ref[...],
                     jnp.dot(y, uw3[...], preferred_element_type=jnp.float32),
                     preferred_element_type=jnp.float32)
    e_next = jnp.dot(next_ref[...],
                     jnp.dot(y, uw0[...], preferred_element_type=jnp.float32),
                     preferred_element_type=jnp.float32)
    e_cur = jnp.dot(y, uw2[...], preferred_element_type=jnp.float32)
    ye = a_even + c_prev + ub[...]
    yo = e_next + e_cur + ub[...]
    # Store the even/odd phases side-by-side in the lane dim (64 lanes); the
    # wrapper's reshape to (B, 2T, D) is a pure bitcast.
    o_ref[...] = jnp.concatenate([ye, yo], axis=-1)


def _share_output_kernel(
        x_ref, spk_ref, pe_ref, attmask_ref,
        ln1g, ln1b, wqkv, bqkv, wo, bo, ln2g, ln2b, w1, b1, w2, b2,
        outw, outb, o_ref, ctx_ref, *, B, T, D, head, pos_scale):
    # prologue: speaker add + absolute positional encoding
    x = x_ref[...] + spk_ref[...]
    x = x * pos_scale + pe_ref[...]

    y = _encoder_layer_body(x, attmask_ref[...], ctx_ref,
                            ln1g, ln1b, wqkv, bqkv, wo, bo,
                            ln2g, ln2b, w1, b1, w2, b2,
                            B=B, T=T, D=D, head=head)

    # epilogue: final Linear(dim, out_dim) projection fused in.
    o_ref[...] = jnp.dot(y, outw[...], preferred_element_type=jnp.float32) + outb[...]


# ------------------------------ JAX wrappers --------------------------------

def _fs(shape):
    nd = len(shape)
    return pl.BlockSpec(shape, lambda i, nd=nd: (0,) * nd)


def positional_encoding_table(T, d):
    # ESPnet PositionalEncoding table; built without scatter ops (interleave via
    # stack+reshape) and constant-folded by XLA for static T.
    pos = jnp.arange(T, dtype=jnp.float32)[:, None]
    div = jnp.exp(jnp.arange(0, d, 2, dtype=jnp.float32) * (-math.log(10000.0) / d))
    sin = jnp.sin(pos * div)
    cos = jnp.cos(pos * div)
    return jnp.stack([sin, cos], axis=-1).reshape(T, d)


def _layer_param_inputs(p, D):
    return [
        p["ln1_g"].reshape(1, D), p["ln1_b"].reshape(1, D),
        p["wqkv"], p["bqkv"].reshape(1, 3 * D),
        p["wo"], p["bo"].reshape(1, D),
        p["ln2_g"].reshape(1, D), p["ln2_b"].reshape(1, D),
        p["ff_w1"], p["ff_b1"].reshape(1, LINEAR_UNIT),
        p["ff_w2"], p["ff_b2"].reshape(1, D),
    ]


def content_and_upsample(x, enc_mask, p, up_w, up_b):
    # TODO(synk): CNNUpsampler internals unknown in the source repo; assumed to be
    # ConvTranspose1d(dim, dim, kernel=4, stride=2, padding=1) => x2 time upsample.
    B, T, D = x.shape
    M = B * T
    pe_full = jnp.tile(positional_encoding_table(T, D), (B, 1))          # (M, D) const
    maskcol = jnp.transpose(enc_mask, (0, 2, 1)).astype(jnp.float32).reshape(M, 1)
    attmask = enc_mask[:, 0, :].astype(jnp.float32)                      # (B, T)

    # Constant batch-aware shift matrices (constant-folded by XLA).
    r = jnp.arange(M, dtype=jnp.int32)
    t_in = r % T
    prev_mat = ((r[None, :] == r[:, None] - 1)
                & (t_in[:, None] != 0)).astype(jnp.float32)              # (M, M)
    next_mat = ((r[None, :] == r[:, None] + 1)
                & (t_in[:, None] != T - 1)).astype(jnp.float32)          # (M, M)

    inputs = [x.reshape(M, D), maskcol, pe_full, attmask] + _layer_param_inputs(p, D) + [
        up_w[:, :, 0], up_w[:, :, 1], up_w[:, :, 2], up_w[:, :, 3],
        up_b.reshape(1, D), prev_mat, next_mat,
    ]
    out = pl.pallas_call(
        functools.partial(_content_upsample_kernel, B=B, T=T, D=D, head=HEAD,
                          pos_scale=math.sqrt(D)),
        out_shape=jax.ShapeDtypeStruct((M, 2 * D), jnp.float32),
        grid=(1,),
        in_specs=[_fs(a.shape) for a in inputs],
        out_specs=_fs((M, 2 * D)),
        scratch_shapes=[pltpu.VMEM((M, D), jnp.float32)],
    )(*inputs)
    # (M, 2D) -> (B, 2T, D): even/odd phase interleave is a pure reshape.
    return out.reshape(B, 2 * T, D)


def share_and_output(x, spk2d, attmask, p, out_w, out_b):
    B, T, D = x.shape
    M = B * T
    pe_full = jnp.tile(positional_encoding_table(T, D), (B, 1))          # (M, D) const
    inputs = [x.reshape(M, D), spk2d, pe_full, attmask] + _layer_param_inputs(p, D) + [
        out_w, out_b.reshape(1, OUT_DIM),
    ]
    out = pl.pallas_call(
        functools.partial(_share_output_kernel, B=B, T=T, D=D, head=HEAD,
                          pos_scale=math.sqrt(D)),
        out_shape=jax.ShapeDtypeStruct((M, OUT_DIM), jnp.float32),
        grid=(1,),
        in_specs=[_fs(a.shape) for a in inputs],
        out_specs=_fs((M, OUT_DIM)),
        scratch_shapes=[pltpu.VMEM((M, D), jnp.float32)],
    )(*inputs)
    return out.reshape(B, T, OUT_DIM)


def audio_decoder_forward(params, enc_len, input_x_content, enc_mask_content,
                          input_x_speaker, enc_mask_speaker, upsampled_x=None):
    if upsampled_x is None:
        upsampled_x = content_and_upsample(
            input_x_content, enc_mask_content,
            params["content"], params["up_w"], params["up_b"])
        dec_len = enc_len * 2
    else:
        dec_len = enc_len

    B, T2, D = upsampled_x.shape
    if input_x_speaker is not None:
        spk2d = input_x_speaker[:, :T2].reshape(B * T2, D)
    else:
        spk2d = jnp.zeros((B * T2, D), jnp.float32)

    dec_mask = jnp.arange(T2)[None, :] < dec_len[:, None]                # (B, T2) bool
    dec_x = share_and_output(upsampled_x, spk2d, dec_mask.astype(jnp.float32),
                             params["share"], params["out_w"], params["out_b"])
    return dec_len, dec_x, dec_mask


# --------------------------------- params -----------------------------------

def init_params(key):
    keys = iter(jax.random.split(key, 16))

    def lin_w(fan_in, fan_out):
        return jax.random.normal(next(keys), (fan_in, fan_out),
                                 jnp.float32) / math.sqrt(fan_in)

    def enc_layer_params():
        wq, wk, wv = lin_w(DIM, DIM), lin_w(DIM, DIM), lin_w(DIM, DIM)
        return {
            "ln1_g": jnp.ones((DIM,), jnp.float32), "ln1_b": jnp.zeros((DIM,), jnp.float32),
            "ln2_g": jnp.ones((DIM,), jnp.float32), "ln2_b": jnp.zeros((DIM,), jnp.float32),
            # Fused QKV projection weight/bias (columns = [Q | K | V]).
            "wqkv": jnp.concatenate([wq, wk, wv], axis=1),
            "bqkv": jnp.zeros((3 * DIM,), jnp.float32),
            "wo": lin_w(DIM, DIM), "bo": jnp.zeros((DIM,), jnp.float32),
            "ff_w1": lin_w(DIM, LINEAR_UNIT), "ff_b1": jnp.zeros((LINEAR_UNIT,), jnp.float32),
            "ff_w2": lin_w(LINEAR_UNIT, DIM), "ff_b2": jnp.zeros((DIM,), jnp.float32),
        }

    return {
        "content": enc_layer_params(),
        "share": enc_layer_params(),
        # torch ConvTranspose1d weight layout: (in_channels, out_channels, kernel)
        "up_w": jax.random.normal(next(keys), (DIM, DIM, 4), jnp.float32) / math.sqrt(4 * DIM),
        "up_b": jnp.zeros((DIM,), jnp.float32),
        "out_w": lin_w(DIM, OUT_DIM), "out_b": jnp.zeros((OUT_DIM,), jnp.float32),
    }


if __name__ == "__main__":
    key = jax.random.PRNGKey(0)
    kp, k1, k2 = jax.random.split(key, 3)
    params = init_params(kp)

    B, T = 2, 8            # content sequence length
    T_SP = 2 * T           # speaker/upsampled sequence length
    enc_len = jnp.array([8, 6], dtype=jnp.int32)
    input_x_content = jax.random.normal(k1, (B, T, DIM), jnp.float32)
    enc_mask_content = (jnp.arange(T)[None, :] < enc_len[:, None])[:, None, :]
    input_x_speaker = jax.random.normal(k2, (B, T_SP, DIM), jnp.float32)
    enc_mask_speaker = (jnp.arange(T_SP)[None, :] < (enc_len * 2)[:, None])[:, None, :]

    fwd = jax.jit(functools.partial(audio_decoder_forward, params))
    dec_len, dec_x, dec_mask = fwd(enc_len, input_x_content, enc_mask_content,
                                   input_x_speaker, enc_mask_speaker)
    jax.block_until_ready((dec_len, dec_x, dec_mask))

    assert dec_len.shape == (B,)
    assert dec_x.shape == (B, T_SP, OUT_DIM)
    assert dec_mask.shape == (B, T_SP)
    assert dec_x.shape[1] == dec_mask.shape[1]
    print("KERNEL_OK")
</pallas_src>

<mosaic_0001>
module attributes {stable_mosaic.version = 11 : i64} {
  func.func @_content_upsample_kernel(%arg0: i32, %arg1: memref<16x32xf32, #tpu.memory_space<vmem>>, %arg2: memref<16x1xf32, #tpu.memory_space<vmem>>, %arg3: memref<16x32xf32, #tpu.memory_space<vmem>>, %arg4: memref<2x8xf32, #tpu.memory_space<vmem>>, %arg5: memref<1x32xf32, #tpu.memory_space<vmem>>, %arg6: memref<1x32xf32, #tpu.memory_space<vmem>>, %arg7: memref<32x96xf32, #tpu.memory_space<vmem>>, %arg8: memref<1x96xf32, #tpu.memory_space<vmem>>, %arg9: memref<32x32xf32, #tpu.memory_space<vmem>>, %arg10: memref<1x32xf32, #tpu.memory_space<vmem>>, %arg11: memref<1x32xf32, #tpu.memory_space<vmem>>, %arg12: memref<1x32xf32, #tpu.memory_space<vmem>>, %arg13: memref<32x64xf32, #tpu.memory_space<vmem>>, %arg14: memref<1x64xf32, #tpu.memory_space<vmem>>, %arg15: memref<64x32xf32, #tpu.memory_space<vmem>>, %arg16: memref<1x32xf32, #tpu.memory_space<vmem>>, %arg17: memref<32x32xf32, #tpu.memory_space<vmem>>, %arg18: memref<32x32xf32, #tpu.memory_space<vmem>>, %arg19: memref<32x32xf32, #tpu.memory_space<vmem>>, %arg20: memref<32x32xf32, #tpu.memory_space<vmem>>, %arg21: memref<1x32xf32, #tpu.memory_space<vmem>>, %arg22: memref<16x16xf32, #tpu.memory_space<vmem>>, %arg23: memref<16x16xf32, #tpu.memory_space<vmem>>, %arg24: memref<16x64xf32, #tpu.memory_space<vmem>>, %arg25: memref<16x32xf32, #tpu.memory_space<vmem>>) attributes {dimension_semantics = [#tpu.dimension_semantics<arbitrary>], iteration_bounds = array<i64: 1>, scalar_prefetch = 0 : i64, scratch_operands = 1 : i64, tpu.core_type = #tpu.core_type<tc>, window_params = [{pipeline_mode = #tpu.pipeline_mode<synchronous>, transform_indices = @transform_0, window_bounds = array<i64: 16, 32>}, {pipeline_mode = #tpu.pipeline_mode<synchronous>, transform_indices = @transform_1, window_bounds = array<i64: 16, 1>}, {pipeline_mode = #tpu.pipeline_mode<synchronous>, transform_indices = @transform_2, window_bounds = array<i64: 16, 32>}, {pipeline_mode = #tpu.pipeline_mode<synchronous>, transform_indices = @transform_3, window_bounds = array<i64: 2, 8>}, {pipeline_mode = #tpu.pipeline_mode<synchronous>, transform_indices = @transform_4, window_bounds = array<i64: 1, 32>}, {pipeline_mode = #tpu.pipeline_mode<synchronous>, transform_indices = @transform_5, window_bounds = array<i64: 1, 32>}, {pipeline_mode = #tpu.pipeline_mode<synchronous>, transform_indices = @transform_6, window_bounds = array<i64: 32, 96>}, {pipeline_mode = #tpu.pipeline_mode<synchronous>, transform_indices = @transform_7, window_bounds = array<i64: 1, 96>}, {pipeline_mode = #tpu.pipeline_mode<synchronous>, transform_indices = @transform_8, window_bounds = array<i64: 32, 32>}, {pipeline_mode = #tpu.pipeline_mode<synchronous>, transform_indices = @transform_9, window_bounds = array<i64: 1, 32>}, {pipeline_mode = #tpu.pipeline_mode<synchronous>, transform_indices = @transform_10, window_bounds = array<i64: 1, 32>}, {pipeline_mode = #tpu.pipeline_mode<synchronous>, transform_indices = @transform_11, window_bounds = array<i64: 1, 32>}, {pipeline_mode = #tpu.pipeline_mode<synchronous>, transform_indices = @transform_12, window_bounds = array<i64: 32, 64>}, {pipeline_mode = #tpu.pipeline_mode<synchronous>, transform_indices = @transform_13, window_bounds = array<i64: 1, 64>}, {pipeline_mode = #tpu.pipeline_mode<synchronous>, transform_indices = @transform_14, window_bounds = array<i64: 64, 32>}, {pipeline_mode = #tpu.pipeline_mode<synchronous>, transform_indices = @transform_15, window_bounds = array<i64: 1, 32>}, {pipeline_mode = #tpu.pipeline_mode<synchronous>, transform_indices = @transform_16, window_bounds = array<i64: 32, 32>}, {pipeline_mode = #tpu.pipeline_mode<synchronous>, transform_indices = @transform_17, window_bounds = array<i64: 32, 32>}, {pipeline_mode = #tpu.pipeline_mode<synchronous>, transform_indices = @transform_18, window_bounds = array<i64: 32, 32>}, {pipeline_mode = #tpu.pipeline_mode<synchronous>, transform_indices = @transform_19, window_bounds = array<i64: 32, 32>}, {pipeline_mode = #tpu.pipeline_mode<synchronous>, transform_indices = @transform_20, window_bounds = array<i64: 1, 32>}, {pipeline_mode = #tpu.pipeline_mode<synchronous>, transform_indices = @transform_21, window_bounds = array<i64: 16, 16>}, {pipeline_mode = #tpu.pipeline_mode<synchronous>, transform_indices = @transform_22, window_bounds = array<i64: 16, 16>}, {pipeline_mode = #tpu.pipeline_mode<synchronous>, transform_indices = @transform_23, window_bounds = array<i64: 16, 64>}]} {
    %c0 = arith.constant 0 : index
    %c0_0 = arith.constant 0 : index
    %0 = vector.load %arg1[%c0, %c0_0] : memref<16x32xf32, #tpu.memory_space<vmem>>, vector<16x32xf32>
    %c0_1 = arith.constant 0 : index
    %c0_2 = arith.constant 0 : index
    %1 = vector.load %arg2[%c0_1, %c0_2] : memref<16x1xf32, #tpu.memory_space<vmem>>, vector<16x1xf32>
    %2 = vector.broadcast %1 : vector<16x1xf32> to vector<16x32xf32>
    %3 = arith.mulf %0, %2 : vector<16x32xf32>
    %cst = arith.constant 5.65685415 : f32
    %4 = vector.broadcast %cst : f32 to vector<16x32xf32>
    %5 = arith.mulf %3, %4 : vector<16x32xf32>
    %c0_3 = arith.constant 0 : index
    %c0_4 = arith.constant 0 : index
    %6 = vector.load %arg3[%c0_3, %c0_4] : memref<16x32xf32, #tpu.memory_space<vmem>>, vector<16x32xf32>
    %7 = arith.addf %5, %6 : vector<16x32xf32>
    %c0_5 = arith.constant 0 : index
    %c0_6 = arith.constant 0 : index
    %8 = vector.load %arg4[%c0_5, %c0_6] : memref<2x8xf32, #tpu.memory_space<vmem>>, vector<2x8xf32>
    %c0_7 = arith.constant 0 : index
    %c0_8 = arith.constant 0 : index
    %9 = vector.load %arg5[%c0_7, %c0_8] : memref<1x32xf32, #tpu.memory_space<vmem>>, vector<1x32xf32>
    %c0_9 = arith.constant 0 : index
    %c0_10 = arith.constant 0 : index
    %10 = vector.load %arg6[%c0_9, %c0_10] : memref<1x32xf32, #tpu.memory_space<vmem>>, vector<1x32xf32>
    %cst_11 = arith.constant dense<0.000000e+00> : vector<16xf32>
    %11 = vector.multi_reduction <add>, %7, %cst_11 [1] : vector<16x32xf32> to vector<16xf32>
    %12 = vector.shape_cast %11 : vector<16xf32> to vector<16x1xf32>
    %cst_12 = arith.constant 3.200000e+01 : f32
    %13 = vector.broadcast %cst_12 : f32 to vector<16x1xf32>
    %14 = arith.divf %12, %13 : vector<16x1xf32>
    %15 = vector.broadcast %14 : vector<16x1xf32> to vector<16x32xf32>
    %16 = arith.subf %7, %15 : vector<16x32xf32>
    %17 = arith.mulf %16, %16 : vector<16x32xf32>
    %cst_13 = arith.constant dense<0.000000e+00> : vector<16xf32>
    %18 = vector.multi_reduction <add>, %17, %cst_13 [1] : vector<16x32xf32> to vector<16xf32>
    %19 = vector.shape_cast %18 : vector<16xf32> to vector<16x1xf32>
    %cst_14 = arith.constant 3.200000e+01 : f32
    %20 = vector.broadcast %cst_14 : f32 to vector<16x1xf32>
    %21 = arith.divf %19, %20 : vector<16x1xf32>
    %22 = vector.broadcast %14 : vector<16x1xf32> to vector<16x32xf32>
    %23 = arith.subf %7, %22 : vector<16x32xf32>
    %cst_15 = arith.constant 9.99999996E-13 : f32
    %24 = vector.broadcast %cst_15 : f32 to vector<16x1xf32>
    %25 = arith.addf %21, %24 : vector<16x1xf32>
    %26 = math.rsqrt %25 : vector<16x1xf32>
    %27 = vector.broadcast %26 : vector<16x1xf32> to vector<16x32xf32>
    %28 = arith.mulf %23, %27 : vector<16x32xf32>
    %29 = vector.broadcast %9 : vector<1x32xf32> to vector<16x32xf32>
    %30 = arith.mulf %28, %29 : vector<16x32xf32>
    %31 = vector.broadcast %10 : vector<1x32xf32> to vector<16x32xf32>
    %32 = arith.addf %30, %31 : vector<16x32xf32>
    %c0_16 = arith.constant 0 : index
    %c0_17 = arith.constant 0 : index
    %33 = vector.load %arg7[%c0_16, %c0_17] : memref<32x96xf32, #tpu.memory_space<vmem>>, vector<32x96xf32>
    %cst_18 = arith.constant dense<0.000000e+00> : vector<16x96xf32>
    %34 = tpu.matmul %32, %33, %cst_18 {dimension_numbers = #tpu.dot_dimension_numbers<[1], [0], [0], [1], [0, 0, 1, 1], [], []>} : vector<16x32xf32>, vector<32x96xf32>, vector<16x96xf32> -> vector<16x96xf32>
    %c0_19 = arith.constant 0 : index
    %c0_20 = arith.constant 0 : index
    %35 = vector.load %arg8[%c0_19, %c0_20] : memref<1x96xf32, #tpu.memory_space<vmem>>, vector<1x96xf32>
    %36 = vector.broadcast %35 : vector<1x96xf32> to vector<16x96xf32>
    %37 = arith.addf %34, %36 : vector<16x96xf32>
    %38 = vector.extract_strided_slice %8 {offsets = [0, 0], sizes = [1, 8], strides = [1, 1]} : vector<2x8xf32> to vector<1x8xf32>
    %cst_21 = arith.constant 5.000000e-01 : f32
    %39 = vector.broadcast %cst_21 : f32 to vector<1x8xf32>
    %40 = arith.cmpf ogt, %38, %39 : vector<1x8xf32>
    %41 = vector.extract_strided_slice %37 {offsets = [0, 0], sizes = [8, 16], strides = [1, 1]} : vector<16x96xf32> to vector<8x16xf32>
    %42 = vector.extract_strided_slice %37 {offsets = [0, 32], sizes = [8, 16], strides = [1, 1]} : vector<16x96xf32> to vector<8x16xf32>
    %43 = vector.extract_strided_slice %37 {offsets = [0, 64], sizes = [8, 16], strides = [1, 1]} : vector<16x96xf32> to vector<8x16xf32>
    %cst_22 = arith.constant dense<0.000000e+00> : vector<8x8xf32>
    %44 = tpu.matmul %41, %42, %cst_22 {dimension_numbers = #tpu.dot_dimension_numbers<[1], [1], [0], [0], [0, 0, 1, 0], [], []>} : vector<8x16xf32>, vector<8x16xf32>, vector<8x8xf32> -> vector<8x8xf32>
    %cst_23 = arith.constant 2.500000e-01 : f32
    %45 = vector.broadcast %cst_23 : f32 to vector<8x8xf32>
    %46 = arith.mulf %44, %45 : vector<8x8xf32>
    %cst_24 = arith.constant -3.40282347E+38 : f32
    %47 = vector.shape_cast %40 : vector<1x8xi1> to vector<1x8xi1>
    %48 = vector.broadcast %47 : vector<1x8xi1> to vector<8x8xi1>
    %49 = vector.broadcast %cst_24 : f32 to vector<8x8xf32>
    %50 = arith.select %48, %46, %49 : vector<8x8xi1>, vector<8x8xf32>
    %cst_25 = arith.constant dense<0xFF800000> : vector<8xf32>
    %51 = vector.multi_reduction <maximumf>, %50, %cst_25 [1] : vector<8x8xf32> to vector<8xf32>
    %cst_26 = arith.constant 0xFF800000 : f32
    %52 = vector.broadcast %cst_26 : f32 to vector<8xf32>
    %53 = arith.maximumf %52, %51 : vector<8xf32>
    %54 = vector.shape_cast %53 : vector<8xf32> to vector<8x1xf32>
    %55 = vector.broadcast %54 : vector<8x1xf32> to vector<8x8xf32>
    %56 = arith.subf %50, %55 : vector<8x8xf32>
    %57 = math.exp %56 : vector<8x8xf32>
    %cst_27 = arith.constant dense<0.000000e+00> : vector<8xf32>
    %58 = vector.multi_reduction <add>, %57, %cst_27 [1] : vector<8x8xf32> to vector<8xf32>
    %59 = vector.shape_cast %58 : vector<8xf32> to vector<8x1xf32>
    %60 = vector.broadcast %59 : vector<8x1xf32> to vector<8x8xf32>
    %61 = arith.divf %57, %60 : vector<8x8xf32>
    %cst_28 = arith.constant 0.000000e+00 : f32
    %62 = vector.shape_cast %40 : vector<1x8xi1> to vector<1x8xi1>
    %63 = vector.broadcast %62 : vector<1x8xi1> to vector<8x8xi1>
    %64 = vector.broadcast %cst_28 : f32 to vector<8x8xf32>
    %65 = arith.select %63, %61, %64 : vector<8x8xi1>, vector<8x8xf32>
    %cst_29 = arith.constant dense<0.000000e+00> : vector<8x16xf32>
    %66 = tpu.matmul %65, %43, %cst_29 {dimension_numbers = #tpu.dot_dimension_numbers<[1], [0], [0], [1], [0, 0, 1, 1], [], []>} : vector<8x8xf32>, vector<8x16xf32>, vector<8x16xf32> -> vector<8x16xf32>
    %67 = vector.extract_strided_slice %37 {offsets = [0, 16], sizes = [8, 16], strides = [1, 1]} : vector<16x96xf32> to vector<8x16xf32>
    %68 = vector.extract_strided_slice %37 {offsets = [0, 48], sizes = [8, 16], strides = [1, 1]} : vector<16x96xf32> to vector<8x16xf32>
    %69 = vector.extract_strided_slice %37 {offsets = [0, 80], sizes = [8, 16], strides = [1, 1]} : vector<16x96xf32> to vector<8x16xf32>
    %cst_30 = arith.constant dense<0.000000e+00> : vector<8x8xf32>
    %70 = tpu.matmul %67, %68, %cst_30 {dimension_numbers = #tpu.dot_dimension_numbers<[1], [1], [0], [0], [0, 0, 1, 0], [], []>} : vector<8x16xf32>, vector<8x16xf32>, vector<8x8xf32> -> vector<8x8xf32>
    %cst_31 = arith.constant 2.500000e-01 : f32
    %71 = vector.broadcast %cst_31 : f32 to vector<8x8xf32>
    %72 = arith.mulf %70, %71 : vector<8x8xf32>
    %cst_32 = arith.constant -3.40282347E+38 : f32
    %73 = vector.shape_cast %40 : vector<1x8xi1> to vector<1x8xi1>
    %74 = vector.broadcast %73 : vector<1x8xi1> to vector<8x8xi1>
    %75 = vector.broadcast %cst_32 : f32 to vector<8x8xf32>
    %76 = arith.select %74, %72, %75 : vector<8x8xi1>, vector<8x8xf32>
    %cst_33 = arith.constant dense<0xFF800000> : vector<8xf32>
    %77 = vector.multi_reduction <maximumf>, %76, %cst_33 [1] : vector<8x8xf32> to vector<8xf32>
    %cst_34 = arith.constant 0xFF800000 : f32
    %78 = vector.broadcast %cst_34 : f32 to vector<8xf32>
    %79 = arith.maximumf %78, %77 : vector<8xf32>
    %80 = vector.shape_cast %79 : vector<8xf32> to vector<8x1xf32>
    %81 = vector.broadcast %80 : vector<8x1xf32> to vector<8x8xf32>
    %82 = arith.subf %76, %81 : vector<8x8xf32>
    %83 = math.exp %82 : vector<8x8xf32>
    %cst_35 = arith.constant dense<0.000000e+00> : vector<8xf32>
    %84 = vector.multi_reduction <add>, %83, %cst_35 [1] : vector<8x8xf32> to vector<8xf32>
    %85 = vector.shape_cast %84 : vector<8xf32> to vector<8x1xf32>
    %86 = vector.broadcast %85 : vector<8x1xf32> to vector<8x8xf32>
    %87 = arith.divf %83, %86 : vector<8x8xf32>
    %cst_36 = arith.constant 0.000000e+00 : f32
    %88 = vector.shape_cast %40 : vector<1x8xi1> to vector<1x8xi1>
    %89 = vector.broadcast %88 : vector<1x8xi1> to vector<8x8xi1>
    %90 = vector.broadcast %cst_36 : f32 to vector<8x8xf32>
    %91 = arith.select %89, %87, %90 : vector<8x8xi1>, vector<8x8xf32>
    %cst_37 = arith.constant dense<0.000000e+00> : vector<8x16xf32>
    %92 = tpu.matmul %91, %69, %cst_37 {dimension_numbers = #tpu.dot_dimension_numbers<[1], [0], [0], [1], [0, 0, 1, 1], [], []>} : vector<8x8xf32>, vector<8x16xf32>, vector<8x16xf32> -> vector<8x16xf32>
    %93 = tpu.concatenate %66, %92 in 1 : vector<8x16xf32>, vector<8x16xf32> -> vector<8x32xf32>
    %c0_38 = arith.constant 0 : index
    %c0_39 = arith.constant 0 : index
    %94 = vector.load %arg25[%c0_38, %c0_39] : memref<16x32xf32, #tpu.memory_space<vmem>>, vector<8x32xf32>
    tpu.vector_store %arg25[%c0_38, %c0_39], %93 {strides = array<i32>} : memref<16x32xf32, #tpu.memory_space<vmem>>, vector<8x32xf32>,
    %95 = vector.extract_strided_slice %8 {offsets = [1, 0], sizes = [1, 8], strides = [1, 1]} : vector<2x8xf32> to vector<1x8xf32>
    %cst_40 = arith.constant 5.000000e-01 : f32
    %96 = vector.broadcast %cst_40 : f32 to vector<1x8xf32>
    %97 = arith.cmpf ogt, %95, %96 : vector<1x8xf32>
    %98 = vector.extract_strided_slice %37 {offsets = [8, 0], sizes = [8, 16], strides = [1, 1]} : vector<16x96xf32> to vector<8x16xf32>
    %99 = vector.extract_strided_slice %37 {offsets = [8, 32], sizes = [8, 16], strides = [1, 1]} : vector<16x96xf32> to vector<8x16xf32>
    %100 = vector.extract_strided_slice %37 {offsets = [8, 64], sizes = [8, 16], strides = [1, 1]} : vector<16x96xf32> to vector<8x16xf32>
    %cst_41 = arith.constant dense<0.000000e+00> : vector<8x8xf32>
    %101 = tpu.matmul %98, %99, %cst_41 {dimension_numbers = #tpu.dot_dimension_numbers<[1], [1], [0], [0], [0, 0, 1, 0], [], []>} : vector<8x16xf32>, vector<8x16xf32>, vector<8x8xf32> -> vector<8x8xf32>
    %cst_42 = arith.constant 2.500000e-01 : f32
    %102 = vector.broadcast %cst_42 : f32 to vector<8x8xf32>
    %103 = arith.mulf %101, %102 : vector<8x8xf32>
    %cst_43 = arith.constant -3.40282347E+38 : f32
    %104 = vector.shape_cast %97 : vector<1x8xi1> to vector<1x8xi1>
    %105 = vector.broadcast %104 : vector<1x8xi1> to vector<8x8xi1>
    %106 = vector.broadcast %cst_43 : f32 to vector<8x8xf32>
    %107 = arith.select %105, %103, %106 : vector<8x8xi1>, vector<8x8xf32>
    %cst_44 = arith.constant dense<0xFF800000> : vector<8xf32>
    %108 = vector.multi_reduction <maximumf>, %107, %cst_44 [1] : vector<8x8xf32> to vector<8xf32>
    %cst_45 = arith.constant 0xFF800000 : f32
    %109 = vector.broadcast %cst_45 : f32 to vector<8xf32>
    %110 = arith.maximumf %109, %108 : vector<8xf32>
    %111 = vector.shape_cast %110 : vector<8xf32> to vector<8x1xf32>
    %112 = vector.broadcast %111 : vector<8x1xf32> to vector<8x8xf32>
    %113 = arith.subf %107, %112 : vector<8x8xf32>
    %114 = math.exp %113 : vector<8x8xf32>
    %cst_46 = arith.constant dense<0.000000e+00> : vector<8xf32>
    %115 = vector.multi_reduction <add>, %114, %cst_46 [1] : vector<8x8xf32> to vector<8xf32>
    %116 = vector.shape_cast %115 : vector<8xf32> to vector<8x1xf32>
    %117 = vector.broadcast %116 : vector<8x1xf32> to vector<8x8xf32>
    %118 = arith.divf %114, %117 : vector<8x8xf32>
    %cst_47 = arith.constant 0.000000e+00 : f32
    %119 = vector.shape_cast %97 : vector<1x8xi1> to vector<1x8xi1>
    %120 = vector.broadcast %119 : vector<1x8xi1> to vector<8x8xi1>
    %121 = vector.broadcast %cst_47 : f32 to vector<8x8xf32>
    %122 = arith.select %120, %118, %121 : vector<8x8xi1>, vector<8x8xf32>
    %cst_48 = arith.constant dense<0.000000e+00> : vector<8x16xf32>
    %123 = tpu.matmul %122, %100, %cst_48 {dimension_numbers = #tpu.dot_dimension_numbers<[1], [0], [0], [1], [0, 0, 1, 1], [], []>} : vector<8x8xf32>, vector<8x16xf32>, vector<8x16xf32> -> vector<8x16xf32>
    %124 = vector.extract_strided_slice %37 {offsets = [8, 16], sizes = [8, 16], strides = [1, 1]} : vector<16x96xf32> to vector<8x16xf32>
    %125 = vector.extract_strided_slice %37 {offsets = [8, 48], sizes = [8, 16], strides = [1, 1]} : vector<16x96xf32> to vector<8x16xf32>
    %126 = vector.extract_strided_slice %37 {offsets = [8, 80], sizes = [8, 16], strides = [1, 1]} : vector<16x96xf32> to vector<8x16xf32>
    %cst_49 = arith.constant dense<0.000000e+00> : vector<8x8xf32>
    %127 = tpu.matmul %124, %125, %cst_49 {dimension_numbers = #tpu.dot_dimension_numbers<[1], [1], [0], [0], [0, 0, 1, 0], [], []>} : vector<8x16xf32>, vector<8x16xf32>, vector<8x8xf32> -> vector<8x8xf32>
    %cst_50 = arith.constant 2.500000e-01 : f32
    %128 = vector.broadcast %cst_50 : f32 to vector<8x8xf32>
    %129 = arith.mulf %127, %128 : vector<8x8xf32>
    %cst_51 = arith.constant -3.40282347E+38 : f32
    %130 = vector.shape_cast %97 : vector<1x8xi1> to vector<1x8xi1>
    %131 = vector.broadcast %130 : vector<1x8xi1> to vector<8x8xi1>
    %132 = vector.broadcast %cst_51 : f32 to vector<8x8xf32>
    %133 = arith.select %131, %129, %132 : vector<8x8xi1>, vector<8x8xf32>
    %cst_52 = arith.constant dense<0xFF800000> : vector<8xf32>
    %134 = vector.multi_reduction <maximumf>, %133, %cst_52 [1] : vector<8x8xf32> to vector<8xf32>
    %cst_53 = arith.constant 0xFF800000 : f32
    %135 = vector.broadcast %cst_53 : f32 to vector<8xf32>
    %136 = arith.maximumf %135, %134 : vector<8xf32>
    %137 = vector.shape_cast %136 : vector<8xf32> to vector<8x1xf32>
    %138 = vector.broadcast %137 : vector<8x1xf32> to vector<8x8xf32>
    %139 = arith.subf %133, %138 : vector<8x8xf32>
    %140 = math.exp %139 : vector<8x8xf32>
    %cst_54 = arith.constant dense<0.000000e+00> : vector<8xf32>
    %141 = vector.multi_reduction <add>, %140, %cst_54 [1] : vector<8x8xf32> to vector<8xf32>
    %142 = vector.shape_cast %141 : vector<8xf32> to vector<8x1xf32>
    %143 = vector.broadcast %142 : vector<8x1xf32> to vector<8x8xf32>
    %144 = arith.divf %140, %143 : vector<8x8xf32>
    %cst_55 = arith.constant 0.000000e+00 : f32
    %145 = vector.shape_cast %97 : vector<1x8xi1> to vector<1x8xi1>
    %146 = vector.broadcast %145 : vector<1x8xi1> to vector<8x8xi1>
    %147 = vector.broadcast %cst_55 : f32 to vector<8x8xf32>
    %148 = arith.select %146, %144, %147 : vector<8x8xi1>, vector<8x8xf32>
    %cst_56 = arith.constant dense<0.000000e+00> : vector<8x16xf32>
    %149 = tpu.matmul %148, %126, %cst_56 {dimension_numbers = #tpu.dot_dimension_numbers<[1], [0], [0], [1], [0, 0, 1, 1], [], []>} : vector<8x8xf32>, vector<8x16xf32>, vector<8x16xf32> -> vector<8x16xf32>
    %150 = tpu.concatenate %123, %149 in 1 : vector<8x16xf32>, vector<8x16xf32> -> vector<8x32xf32>
    %c8 = arith.constant 8 : index
    %c0_57 = arith.constant 0 : index
    %151 = vector.load %arg25[%c8, %c0_57] : memref<16x32xf32, #tpu.memory_space<vmem>>, vector<8x32xf32>
    tpu.vector_store %arg25[%c8, %c0_57], %150 {strides = array<i32>} : memref<16x32xf32, #tpu.memory_space<vmem>>, vector<8x32xf32>,
    %c0_58 = arith.constant 0 : index
    %c0_59 = arith.constant 0 : index
    %152 = vector.load %arg25[%c0_58, %c0_59] : memref<16x32xf32, #tpu.memory_space<vmem>>, vector<16x32xf32>
    %c0_60 = arith.constant 0 : index
    %c0_61 = arith.constant 0 : index
    %153 = vector.load %arg9[%c0_60, %c0_61] : memref<32x32xf32, #tpu.memory_space<vmem>>, vector<32x32xf32>
    %cst_62 = arith.constant dense<0.000000e+00> : vector<16x32xf32>
    %154 = tpu.matmul %152, %153, %cst_62 {dimension_numbers = #tpu.dot_dimension_numbers<[1], [0], [0], [1], [0, 0, 1, 1], [], []>} : vector<16x32xf32>, vector<32x32xf32>, vector<16x32xf32> -> vector<16x32xf32>
    %c0_63 = arith.constant 0 : index
    %c0_64 = arith.constant 0 : index
    %155 = vector.load %arg10[%c0_63, %c0_64] : memref<1x32xf32, #tpu.memory_space<vmem>>, vector<1x32xf32>
    %156 = vector.broadcast %155 : vector<1x32xf32> to vector<16x32xf32>
    %157 = arith.addf %154, %156 : vector<16x32xf32>
    %158 = arith.addf %7, %157 : vector<16x32xf32>
    %c0_65 = arith.constant 0 : index
    %c0_66 = arith.constant 0 : index
    %159 = vector.load %arg11[%c0_65, %c0_66] : memref<1x32xf32, #tpu.memory_space<vmem>>, vector<1x32xf32>
    %c0_67 = arith.constant 0 : index
    %c0_68 = arith.constant 0 : index
    %160 = vector.load %arg12[%c0_67, %c0_68] : memref<1x32xf32, #tpu.memory_space<vmem>>, vector<1x32xf32>
    %cst_69 = arith.constant dense<0.000000e+00> : vector<16xf32>
    %161 = vector.multi_reduction <add>, %158, %cst_69 [1] : vector<16x32xf32> to vector<16xf32>
    %162 = vector.shape_cast %161 : vector<16xf32> to vector<16x1xf32>
    %cst_70 = arith.constant 3.200000e+01 : f32
    %163 = vector.broadcast %cst_70 : f32 to vector<16x1xf32>
    %164 = arith.divf %162, %163 : vector<16x1xf32>
    %165 = vector.broadcast %164 : vector<16x1xf32> to vector<16x32xf32>
    %166 = arith.subf %158, %165 : vector<16x32xf32>
    %167 = arith.mulf %166, %166 : vector<16x32xf32>
    %cst_71 = arith.constant dense<0.000000e+00> : vector<16xf32>
    %168 = vector.multi_reduction <add>, %167, %cst_71 [1] : vector<16x32xf32> to vector<16xf32>
    %169 = vector.shape_cast %168 : vector<16xf32> to vector<16x1xf32>
    %cst_72 = arith.constant 3.200000e+01 : f32
    %170 = vector.broadcast %cst_72 : f32 to vector<16x1xf32>
    %171 = arith.divf %169, %170 : vector<16x1xf32>
    %172 = vector.broadcast %164 : vector<16x1xf32> to vector<16x32xf32>
    %173 = arith.subf %158, %172 : vector<16x32xf32>
    %cst_73 = arith.constant 9.99999996E-13 : f32
    %174 = vector.broadcast %cst_73 : f32 to vector<16x1xf32>
    %175 = arith.addf %171, %174 : vector<16x1xf32>
    %176 = math.rsqrt %175 : vector<16x1xf32>
    %177 = vector.broadcast %176 : vector<16x1xf32> to vector<16x32xf32>
    %178 = arith.mulf %173, %177 : vector<16x32xf32>
    %179 = vector.broadcast %159 : vector<1x32xf32> to vector<16x32xf32>
    %180 = arith.mulf %178, %179 : vector<16x32xf32>
    %181 = vector.broadcast %160 : vector<1x32xf32> to vector<16x32xf32>
    %182 = arith.addf %180, %181 : vector<16x32xf32>
    %c0_74 = arith.constant 0 : index
    %c0_75 = arith.constant 0 : index
    %183 = vector.load %arg13[%c0_74, %c0_75] : memref<32x64xf32, #tpu.memory_space<vmem>>, vector<32x64xf32>
    %cst_76 = arith.constant dense<0.000000e+00> : vector<16x64xf32>
    %184 = tpu.matmul %182, %183, %cst_76 {dimension_numbers = #tpu.dot_dimension_numbers<[1], [0], [0], [1], [0, 0, 1, 1], [], []>} : vector<16x32xf32>, vector<32x64xf32>, vector<16x64xf32> -> vector<16x64xf32>
    %c0_77 = arith.constant 0 : index
    %c0_78 = arith.constant 0 : index
    %185 = vector.load %arg14[%c0_77, %c0_78] : memref<1x64xf32, #tpu.memory_space<vmem>>, vector<1x64xf32>
    %186 = vector.broadcast %185 : vector<1x64xf32> to vector<16x64xf32>
    %187 = arith.addf %184, %186 : vector<16x64xf32>
    %cst_79 = arith.constant 0.000000e+00 : f32
    %188 = vector.broadcast %cst_79 : f32 to vector<16x64xf32>
    %189 = arith.maximumf %187, %188 : vector<16x64xf32>
    %c0_80 = arith.constant 0 : index
    %c0_81 = arith.constant 0 : index
    %190 = vector.load %arg15[%c0_80, %c0_81] : memref<64x32xf32, #tpu.memory_space<vmem>>, vector<64x32xf32>
    %cst_82 = arith.constant dense<0.000000e+00> : vector<16x32xf32>
    %191 = tpu.matmul %189, %190, %cst_82 {dimension_numbers = #tpu.dot_dimension_numbers<[1], [0], [0], [1], [0, 0, 1, 1], [], []>} : vector<16x64xf32>, vector<64x32xf32>, vector<16x32xf32> -> vector<16x32xf32>
    %c0_83 = arith.constant 0 : index
    %c0_84 = arith.constant 0 : index
    %192 = vector.load %arg16[%c0_83, %c0_84] : memref<1x32xf32, #tpu.memory_space<vmem>>, vector<1x32xf32>
    %193 = vector.broadcast %192 : vector<1x32xf32> to vector<16x32xf32>
    %194 = arith.addf %191, %193 : vector<16x32xf32>
    %195 = arith.addf %158, %194 : vector<16x32xf32>
    %c0_85 = arith.constant 0 : index
    %c0_86 = arith.constant 0 : index
    %196 = vector.load %arg18[%c0_85, %c0_86] : memref<32x32xf32, #tpu.memory_space<vmem>>, vector<32x32xf32>
    %cst_87 = arith.constant dense<0.000000e+00> : vector<16x32xf32>
    %197 = tpu.matmul %195, %196, %cst_87 {dimension_numbers = #tpu.dot_dimension_numbers<[1], [0], [0], [1], [0, 0, 1, 1], [], []>} : vector<16x32xf32>, vector<32x32xf32>, vector<16x32xf32> -> vector<16x32xf32>
    %c0_88 = arith.constant 0 : index
    %c0_89 = arith.constant 0 : index
    %198 = vector.load %arg22[%c0_88, %c0_89] : memref<16x16xf32, #tpu.memory_space<vmem>>, vector<16x16xf32>
    %c0_90 = arith.constant 0 : index
    %c0_91 = arith.constant 0 : index
    %199 = vector.load %arg20[%c0_90, %c0_91] : memref<32x32xf32, #tpu.memory_space<vmem>>, vector<32x32xf32>
    %cst_92 = arith.constant dense<0.000000e+00> : vector<16x32xf32>
    %200 = tpu.matmul %195, %199, %cst_92 {dimension_numbers = #tpu.dot_dimension_numbers<[1], [0], [0], [1], [0, 0, 1, 1], [], []>} : vector<16x32xf32>, vector<32x32xf32>, vector<16x32xf32> -> vector<16x32xf32>
    %cst_93 = arith.constant dense<0.000000e+00> : vector<16x32xf32>
    %201 = tpu.matmul %198, %200, %cst_93 {dimension_numbers = #tpu.dot_dimension_numbers<[1], [0], [0], [1], [0, 0, 1, 1], [], []>} : vector<16x16xf32>, vector<16x32xf32>, vector<16x32xf32> -> vector<16x32xf32>
    %c0_94 = arith.constant 0 : index
    %c0_95 = arith.constant 0 : index
    %202 = vector.load %arg23[%c0_94, %c0_95] : memref<16x16xf32, #tpu.memory_space<vmem>>, vector<16x16xf32>
    %c0_96 = arith.constant 0 : index
    %c0_97 = arith.constant 0 : index
    %203 = vector.load %arg17[%c0_96, %c0_97] : memref<32x32xf32, #tpu.memory_space<vmem>>, vector<32x32xf32>
    %cst_98 = arith.constant dense<0.000000e+00> : vector<16x32xf32>
    %204 = tpu.matmul %195, %203, %cst_98 {dimension_numbers = #tpu.dot_dimension_numbers<[1], [0], [0], [1], [0, 0, 1, 1], [], []>} : vector<16x32xf32>, vector<32x32xf32>, vector<16x32xf32> -> vector<16x32xf32>
    %cst_99 = arith.constant dense<0.000000e+00> : vector<16x32xf32>
    %205 = tpu.matmul %202, %204, %cst_99 {dimension_numbers = #tpu.dot_dimension_numbers<[1], [0], [0], [1], [0, 0, 1, 1], [], []>} : vector<16x16xf32>, vector<16x32xf32>, vector<16x32xf32> -> vector<16x32xf32>
    %c0_100 = arith.constant 0 : index
    %c0_101 = arith.constant 0 : index
    %206 = vector.load %arg19[%c0_100, %c0_101] : memref<32x32xf32, #tpu.memory_space<vmem>>, vector<32x32xf32>
    %cst_102 = arith.constant dense<0.000000e+00> : vector<16x32xf32>
    %207 = tpu.matmul %195, %206, %cst_102 {dimension_numbers = #tpu.dot_dimension_numbers<[1], [0], [0], [1], [0, 0, 1, 1], [], []>} : vector<16x32xf32>, vector<32x32xf32>, vector<16x32xf32> -> vector<16x32xf32>
    %208 = arith.addf %197, %201 : vector<16x32xf32>
    %c0_103 = arith.constant 0 : index
    %c0_104 = arith.constant 0 : index
    %209 = vector.load %arg21[%c0_103, %c0_104] : memref<1x32xf32, #tpu.memory_space<vmem>>, vector<1x32xf32>
    %210 = vector.broadcast %209 : vector<1x32xf32> to vector<16x32xf32>
    %211 = arith.addf %208, %210 : vector<16x32xf32>
    %212 = arith.addf %205, %207 : vector<16x32xf32>
    %c0_105 = arith.constant 0 : index
    %c0_106 = arith.constant 0 : index
    %213 = vector.load %arg21[%c0_105, %c0_106] : memref<1x32xf32, #tpu.memory_space<vmem>>, vector<1x32xf32>
    %214 = vector.broadcast %213 : vector<1x32xf32> to vector<16x32xf32>
    %215 = arith.addf %212, %214 : vector<16x32xf32>
    %216 = tpu.concatenate %211, %215 in 1 : vector<16x32xf32>, vector<16x32xf32> -> vector<16x64xf32>
    %c0_107 = arith.constant 0 : index
    %c0_108 = arith.constant 0 : index
    %217 = vector.load %arg24[%c0_107, %c0_108] : memref<16x64xf32, #tpu.memory_space<vmem>>, vector<16x64xf32>
    tpu.vector_store %arg24[%c0_107, %c0_108], %216 {strides = array<i32>} : memref<16x64xf32, #tpu.memory_space<vmem>>, vector<16x64xf32>,
    return
  }
  func.func @transform_0(%arg0: i32) -> (i32, i32) {
    %c0_i32 = arith.constant 0 : i32
    %c0_i32_0 = arith.constant 0 : i32
    %c0_i32_1 = arith.constant 0 : i32
    return %c0_i32, %c0_i32_0 : i32, i32
  }
  func.func @transform_1(%arg0: i32) -> (i32, i32) {
    %c0_i32 = arith.constant 0 : i32
    %c0_i32_0 = arith.constant 0 : i32
    %c0_i32_1 = arith.constant 0 : i32
    return %c0_i32, %c0_i32_0 : i32, i32
  }
  func.func @transform_2(%arg0: i32) -> (i32, i32) {
    %c0_i32 = arith.constant 0 : i32
    %c0_i32_0 = arith.constant 0 : i32
    %c0_i32_1 = arith.constant 0 : i32
    return %c0_i32, %c0_i32_0 : i32, i32
  }
  func.func @transform_3(%arg0: i32) -> (i32, i32) {
    %c0_i32 = arith.constant 0 : i32
    %c0_i32_0 = arith.constant 0 : i32
    %c0_i32_1 = arith.constant 0 : i32
    return %c0_i32, %c0_i32_0 : i32, i32
  }
  func.func @transform_4(%arg0: i32) -> (i32, i32) {
    %c0_i32 = arith.constant 0 : i32
    %c0_i32_0 = arith.constant 0 : i32
    %c0_i32_1 = arith.constant 0 : i32
    return %c0_i32, %c0_i32_0 : i32, i32
  }
  func.func @transform_5(%arg0: i32) -> (i32, i32) {
    %c0_i32 = arith.constant 0 : i32
    %c0_i32_0 = arith.constant 0 : i32
    %c0_i32_1 = arith.constant 0 : i32
    return %c0_i32, %c0_i32_0 : i32, i32
  }
  func.func @transform_6(%arg0: i32) -> (i32, i32) {
    %c0_i32 = arith.constant 0 : i32
    %c0_i32_0 = arith.constant 0 : i32
    %c0_i32_1 = arith.constant 0 : i32
    return %c0_i32, %c0_i32_0 : i32, i32
  }
  func.func @transform_7(%arg0: i32) -> (i32, i32) {
    %c0_i32 = arith.constant 0 : i32
    %c0_i32_0 = arith.constant 0 : i32
    %c0_i32_1 = arith.constant 0 : i32
    return %c0_i32, %c0_i32_0 : i32, i32
  }
  func.func @transform_8(%arg0: i32) -> (i32, i32) {
    %c0_i32 = arith.constant 0 : i32
    %c0_i32_0 = arith.constant 0 : i32
    %c0_i32_1 = arith.constant 0 : i32
    return %c0_i32, %c0_i32_0 : i32, i32
  }
  func.func @transform_9(%arg0: i32) -> (i32, i32) {
    %c0_i32 = arith.constant 0 : i32
    %c0_i32_0 = arith.constant 0 : i32
    %c0_i32_1 = arith.constant 0 : i32
    return %c0_i32, %c0_i32_0 : i32, i32
  }
  func.func @transform_10(%arg0: i32) -> (i32, i32) {
    %c0_i32 = arith.constant 0 : i32
    %c0_i32_0 = arith.constant 0 : i32
    %c0_i32_1 = arith.constant 0 : i32
    return %c0_i32, %c0_i32_0 : i32, i32
  }
  func.func @transform_11(%arg0: i32) -> (i32, i32) {
    %c0_i32 = arith.constant 0 : i32
    %c0_i32_0 = arith.constant 0 : i32
    %c0_i32_1 = arith.constant 0 : i32
    return %c0_i32, %c0_i32_0 : i32, i32
  }
  func.func @transform_12(%arg0: i32) -> (i32, i32) {
    %c0_i32 = arith.constant 0 : i32
    %c0_i32_0 = arith.constant 0 : i32
    %c0_i32_1 = arith.constant 0 : i32
    return %c0_i32, %c0_i32_0 : i32, i32
  }
  func.func @transform_13(%arg0: i32) -> (i32, i32) {
    %c0_i32 = arith.constant 0 : i32
    %c0_i32_0 = arith.constant 0 : i32
    %c0_i32_1 = arith.constant 0 : i32
    return %c0_i32, %c0_i32_0 : i32, i32
  }
  func.func @transform_14(%arg0: i32) -> (i32, i32) {
    %c0_i32 = arith.constant 0 : i32
    %c0_i32_0 = arith.constant 0 : i32
    %c0_i32_1 = arith.constant 0 : i32
    return %c0_i32, %c0_i32_0 : i32, i32
  }
  func.func @transform_15(%arg0: i32) -> (i32, i32) {
    %c0_i32 = arith.constant 0 : i32
    %c0_i32_0 = arith.constant 0 : i32
    %c0_i32_1 = arith.constant 0 : i32
    return %c0_i32, %c0_i32_0 : i32, i32
  }
  func.func @transform_16(%arg0: i32) -> (i32, i32) {
    %c0_i32 = arith.constant 0 : i32
    %c0_i32_0 = arith.constant 0 : i32
    %c0_i32_1 = arith.constant 0 : i32
    return %c0_i32, %c0_i32_0 : i32, i32
  }
  func.func @transform_17(%arg0: i32) -> (i32, i32) {
    %c0_i32 = arith.constant 0 : i32
    %c0_i32_0 = arith.constant 0 : i32
    %c0_i32_1 = arith.constant 0 : i32
    return %c0_i32, %c0_i32_0 : i32, i32
  }
  func.func @transform_18(%arg0: i32) -> (i32, i32) {
    %c0_i32 = arith.constant 0 : i32
    %c0_i32_0 = arith.constant 0 : i32
    %c0_i32_1 = arith.constant 0 : i32
    return %c0_i32, %c0_i32_0 : i32, i32
  }
  func.func @transform_19(%arg0: i32) -> (i32, i32) {
    %c0_i32 = arith.constant 0 : i32
    %c0_i32_0 = arith.constant 0 : i32
    %c0_i32_1 = arith.constant 0 : i32
    return %c0_i32, %c0_i32_0 : i32, i32
  }
  func.func @transform_20(%arg0: i32) -> (i32, i32) {
    %c0_i32 = arith.constant 0 : i32
    %c0_i32_0 = arith.constant 0 : i32
    %c0_i32_1 = arith.constant 0 : i32
    return %c0_i32, %c0_i32_0 : i32, i32
  }
  func.func @transform_21(%arg0: i32) -> (i32, i32) {
    %c0_i32 = arith.constant 0 : i32
    %c0_i32_0 = arith.constant 0 : i32
    %c0_i32_1 = arith.constant 0 : i32
    return %c0_i32, %c0_i32_0 : i32, i32
  }
  func.func @transform_22(%arg0: i32) -> (i32, i32) {
    %c0_i32 = arith.constant 0 : i32
    %c0_i32_0 = arith.constant 0 : i32
    %c0_i32_1 = arith.constant 0 : i32
    return %c0_i32, %c0_i32_0 : i32, i32
  }
  func.func @transform_23(%arg0: i32) -> (i32, i32) {
    %c0_i32 = arith.constant 0 : i32
    %c0_i32_0 = arith.constant 0 : i32
    %c0_i32_1 = arith.constant 0 : i32
    return %c0_i32, %c0_i32_0 : i32, i32
  }
}

module attributes {stable_mosaic.version = 11 : i64} {
  func.func @_share_output_kernel(%arg0: i32, %arg1: memref<32x32xf32, #tpu.memory_space<vmem>>, %arg2: memref<32x32xf32, #tpu.memory_space<vmem>>, %arg3: memref<32x32xf32, #tpu.memory_space<vmem>>, %arg4: memref<2x16xf32, #tpu.memory_space<vmem>>, %arg5: memref<1x32xf32, #tpu.memory_space<vmem>>, %arg6: memref<1x32xf32, #tpu.memory_space<vmem>>, %arg7: memref<32x96xf32, #tpu.memory_space<vmem>>, %arg8: memref<1x96xf32, #tpu.memory_space<vmem>>, %arg9: memref<32x32xf32, #tpu.memory_space<vmem>>, %arg10: memref<1x32xf32, #tpu.memory_space<vmem>>, %arg11: memref<1x32xf32, #tpu.memory_space<vmem>>, %arg12: memref<1x32xf32, #tpu.memory_space<vmem>>, %arg13: memref<32x64xf32, #tpu.memory_space<vmem>>, %arg14: memref<1x64xf32, #tpu.memory_space<vmem>>, %arg15: memref<64x32xf32, #tpu.memory_space<vmem>>, %arg16: memref<1x32xf32, #tpu.memory_space<vmem>>, %arg17: memref<32x80xf32, #tpu.memory_space<vmem>>, %arg18: memref<1x80xf32, #tpu.memory_space<vmem>>, %arg19: memref<32x80xf32, #tpu.memory_space<vmem>>, %arg20: memref<32x32xf32, #tpu.memory_space<vmem>>) attributes {dimension_semantics = [#tpu.dimension_semantics<arbitrary>], iteration_bounds = array<i64: 1>, scalar_prefetch = 0 : i64, scratch_operands = 1 : i64, tpu.core_type = #tpu.core_type<tc>, window_params = [{pipeline_mode = #tpu.pipeline_mode<synchronous>, transform_indices = @transform_0, window_bounds = array<i64: 32, 32>}, {pipeline_mode = #tpu.pipeline_mode<synchronous>, transform_indices = @transform_1, window_bounds = array<i64: 32, 32>}, {pipeline_mode = #tpu.pipeline_mode<synchronous>, transform_indices = @transform_2, window_bounds = array<i64: 32, 32>}, {pipeline_mode = #tpu.pipeline_mode<synchronous>, transform_indices = @transform_3, window_bounds = array<i64: 2, 16>}, {pipeline_mode = #tpu.pipeline_mode<synchronous>, transform_indices = @transform_4, window_bounds = array<i64: 1, 32>}, {pipeline_mode = #tpu.pipeline_mode<synchronous>, transform_indices = @transform_5, window_bounds = array<i64: 1, 32>}, {pipeline_mode = #tpu.pipeline_mode<synchronous>, transform_indices = @transform_6, window_bounds = array<i64: 32, 96>}, {pipeline_mode = #tpu.pipeline_mode<synchronous>, transform_indices = @transform_7, window_bounds = array<i64: 1, 96>}, {pipeline_mode = #tpu.pipeline_mode<synchronous>, transform_indices = @transform_8, window_bounds = array<i64: 32, 32>}, {pipeline_mode = #tpu.pipeline_mode<synchronous>, transform_indices = @transform_9, window_bounds = array<i64: 1, 32>}, {pipeline_mode = #tpu.pipeline_mode<synchronous>, transform_indices = @transform_10, window_bounds = array<i64: 1, 32>}, {pipeline_mode = #tpu.pipeline_mode<synchronous>, transform_indices = @transform_11, window_bounds = array<i64: 1, 32>}, {pipeline_mode = #tpu.pipeline_mode<synchronous>, transform_indices = @transform_12, window_bounds = array<i64: 32, 64>}, {pipeline_mode = #tpu.pipeline_mode<synchronous>, transform_indices = @transform_13, window_bounds = array<i64: 1, 64>}, {pipeline_mode = #tpu.pipeline_mode<synchronous>, transform_indices = @transform_14, window_bounds = array<i64: 64, 32>}, {pipeline_mode = #tpu.pipeline_mode<synchronous>, transform_indices = @transform_15, window_bounds = array<i64: 1, 32>}, {pipeline_mode = #tpu.pipeline_mode<synchronous>, transform_indices = @transform_16, window_bounds = array<i64: 32, 80>}, {pipeline_mode = #tpu.pipeline_mode<synchronous>, transform_indices = @transform_17, window_bounds = array<i64: 1, 80>}, {pipeline_mode = #tpu.pipeline_mode<synchronous>, transform_indices = @transform_18, window_bounds = array<i64: 32, 80>}]} {
    %c0 = arith.constant 0 : index
    %c0_0 = arith.constant 0 : index
    %0 = vector.load %arg1[%c0, %c0_0] : memref<32x32xf32, #tpu.memory_space<vmem>>, vector<32x32xf32>
    %c0_1 = arith.constant 0 : index
    %c0_2 = arith.constant 0 : index
    %1 = vector.load %arg2[%c0_1, %c0_2] : memref<32x32xf32, #tpu.memory_space<vmem>>, vector<32x32xf32>
    %2 = arith.addf %0, %1 : vector<32x32xf32>
    %cst = arith.constant 5.65685415 : f32
    %3 = vector.broadcast %cst : f32 to vector<32x32xf32>
    %4 = arith.mulf %2, %3 : vector<32x32xf32>
    %c0_3 = arith.constant 0 : index
    %c0_4 = arith.constant 0 : index
    %5 = vector.load %arg3[%c0_3, %c0_4] : memref<32x32xf32, #tpu.memory_space<vmem>>, vector<32x32xf32>
    %6 = arith.addf %4, %5 : vector<32x32xf32>
    %c0_5 = arith.constant 0 : index
    %c0_6 = arith.constant 0 : index
    %7 = vector.load %arg4[%c0_5, %c0_6] : memref<2x16xf32, #tpu.memory_space<vmem>>, vector<2x16xf32>
    %c0_7 = arith.constant 0 : index
    %c0_8 = arith.constant 0 : index
    %8 = vector.load %arg5[%c0_7, %c0_8] : memref<1x32xf32, #tpu.memory_space<vmem>>, vector<1x32xf32>
    %c0_9 = arith.constant 0 : index
    %c0_10 = arith.constant 0 : index
    %9 = vector.load %arg6[%c0_9, %c0_10] : memref<1x32xf32, #tpu.memory_space<vmem>>, vector<1x32xf32>
    %cst_11 = arith.constant dense<0.000000e+00> : vector<32xf32>
    %10 = vector.multi_reduction <add>, %6, %cst_11 [1] : vector<32x32xf32> to vector<32xf32>
    %11 = vector.shape_cast %10 : vector<32xf32> to vector<32x1xf32>
    %cst_12 = arith.constant 3.200000e+01 : f32
    %12 = vector.broadcast %cst_12 : f32 to vector<32x1xf32>
    %13 = arith.divf %11, %12 : vector<32x1xf32>
    %14 = vector.broadcast %13 : vector<32x1xf32> to vector<32x32xf32>
    %15 = arith.subf %6, %14 : vector<32x32xf32>
    %16 = arith.mulf %15, %15 : vector<32x32xf32>
    %cst_13 = arith.constant dense<0.000000e+00> : vector<32xf32>
    %17 = vector.multi_reduction <add>, %16, %cst_13 [1] : vector<32x32xf32> to vector<32xf32>
    %18 = vector.shape_cast %17 : vector<32xf32> to vector<32x1xf32>
    %cst_14 = arith.constant 3.200000e+01 : f32
    %19 = vector.broadcast %cst_14 : f32 to vector<32x1xf32>
    %20 = arith.divf %18, %19 : vector<32x1xf32>
    %21 = vector.broadcast %13 : vector<32x1xf32> to vector<32x32xf32>
    %22 = arith.subf %6, %21 : vector<32x32xf32>
    %cst_15 = arith.constant 9.99999996E-13 : f32
    %23 = vector.broadcast %cst_15 : f32 to vector<32x1xf32>
    %24 = arith.addf %20, %23 : vector<32x1xf32>
    %25 = math.rsqrt %24 : vector<32x1xf32>
    %26 = vector.broadcast %25 : vector<32x1xf32> to vector<32x32xf32>
    %27 = arith.mulf %22, %26 : vector<32x32xf32>
    %28 = vector.broadcast %8 : vector<1x32xf32> to vector<32x32xf32>
    %29 = arith.mulf %27, %28 : vector<32x32xf32>
    %30 = vector.broadcast %9 : vector<1x32xf32> to vector<32x32xf32>
    %31 = arith.addf %29, %30 : vector<32x32xf32>
    %c0_16 = arith.constant 0 : index
    %c0_17 = arith.constant 0 : index
    %32 = vector.load %arg7[%c0_16, %c0_17] : memref<32x96xf32, #tpu.memory_space<vmem>>, vector<32x96xf32>
    %cst_18 = arith.constant dense<0.000000e+00> : vector<32x96xf32>
    %33 = tpu.matmul %31, %32, %cst_18 {dimension_numbers = #tpu.dot_dimension_numbers<[1], [0], [0], [1], [0, 0, 1, 1], [], []>} : vector<32x32xf32>, vector<32x96xf32>, vector<32x96xf32> -> vector<32x96xf32>
    %c0_19 = arith.constant 0 : index
    %c0_20 = arith.constant 0 : index
    %34 = vector.load %arg8[%c0_19, %c0_20] : memref<1x96xf32, #tpu.memory_space<vmem>>, vector<1x96xf32>
    %35 = vector.broadcast %34 : vector<1x96xf32> to vector<32x96xf32>
    %36 = arith.addf %33, %35 : vector<32x96xf32>
    %37 = vector.extract_strided_slice %7 {offsets = [0, 0], sizes = [1, 16], strides = [1, 1]} : vector<2x16xf32> to vector<1x16xf32>
    %cst_21 = arith.constant 5.000000e-01 : f32
    %38 = vector.broadcast %cst_21 : f32 to vector<1x16xf32>
    %39 = arith.cmpf ogt, %37, %38 : vector<1x16xf32>
    %40 = vector.extract_strided_slice %36 {offsets = [0, 0], sizes = [16, 16], strides = [1, 1]} : vector<32x96xf32> to vector<16x16xf32>
    %41 = vector.extract_strided_slice %36 {offsets = [0, 32], sizes = [16, 16], strides = [1, 1]} : vector<32x96xf32> to vector<16x16xf32>
    %42 = vector.extract_strided_slice %36 {offsets = [0, 64], sizes = [16, 16], strides = [1, 1]} : vector<32x96xf32> to vector<16x16xf32>
    %cst_22 = arith.constant dense<0.000000e+00> : vector<16x16xf32>
    %43 = tpu.matmul %40, %41, %cst_22 {dimension_numbers = #tpu.dot_dimension_numbers<[1], [1], [0], [0], [0, 0, 1, 0], [], []>} : vector<16x16xf32>, vector<16x16xf32>, vector<16x16xf32> -> vector<16x16xf32>
    %cst_23 = arith.constant 2.500000e-01 : f32
    %44 = vector.broadcast %cst_23 : f32 to vector<16x16xf32>
    %45 = arith.mulf %43, %44 : vector<16x16xf32>
    %cst_24 = arith.constant -3.40282347E+38 : f32
    %46 = vector.shape_cast %39 : vector<1x16xi1> to vector<1x16xi1>
    %47 = vector.broadcast %46 : vector<1x16xi1> to vector<16x16xi1>
    %48 = vector.broadcast %cst_24 : f32 to vector<16x16xf32>
    %49 = arith.select %47, %45, %48 : vector<16x16xi1>, vector<16x16xf32>
    %cst_25 = arith.constant dense<0xFF800000> : vector<16xf32>
    %50 = vector.multi_reduction <maximumf>, %49, %cst_25 [1] : vector<16x16xf32> to vector<16xf32>
    %cst_26 = arith.constant 0xFF800000 : f32
    %51 = vector.broadcast %cst_26 : f32 to vector<16xf32>
    %52 = arith.maximumf %51, %50 : vector<16xf32>
    %53 = vector.shape_cast %52 : vector<16xf32> to vector<16x1xf32>
    %54 = vector.broadcast %53 : vector<16x1xf32> to vector<16x16xf32>
    %55 = arith.subf %49, %54 : vector<16x16xf32>
    %56 = math.exp %55 : vector<16x16xf32>
    %cst_27 = arith.constant dense<0.000000e+00> : vector<16xf32>
    %57 = vector.multi_reduction <add>, %56, %cst_27 [1] : vector<16x16xf32> to vector<16xf32>
    %58 = vector.shape_cast %57 : vector<16xf32> to vector<16x1xf32>
    %59 = vector.broadcast %58 : vector<16x1xf32> to vector<16x16xf32>
    %60 = arith.divf %56, %59 : vector<16x16xf32>
    %cst_28 = arith.constant 0.000000e+00 : f32
    %61 = vector.shape_cast %39 : vector<1x16xi1> to vector<1x16xi1>
    %62 = vector.broadcast %61 : vector<1x16xi1> to vector<16x16xi1>
    %63 = vector.broadcast %cst_28 : f32 to vector<16x16xf32>
    %64 = arith.select %62, %60, %63 : vector<16x16xi1>, vector<16x16xf32>
    %cst_29 = arith.constant dense<0.000000e+00> : vector<16x16xf32>
    %65 = tpu.matmul %64, %42, %cst_29 {dimension_numbers = #tpu.dot_dimension_numbers<[1], [0], [0], [1], [0, 0, 1, 1], [], []>} : vector<16x16xf32>, vector<16x16xf32>, vector<16x16xf32> -> vector<16x16xf32>
    %66 = vector.extract_strided_slice %36 {offsets = [0, 16], sizes = [16, 16], strides = [1, 1]} : vector<32x96xf32> to vector<16x16xf32>
    %67 = vector.extract_strided_slice %36 {offsets = [0, 48], sizes = [16, 16], strides = [1, 1]} : vector<32x96xf32> to vector<16x16xf32>
    %68 = vector.extract_strided_slice %36 {offsets = [0, 80], sizes = [16, 16], strides = [1, 1]} : vector<32x96xf32> to vector<16x16xf32>
    %cst_30 = arith.constant dense<0.000000e+00> : vector<16x16xf32>
    %69 = tpu.matmul %66, %67, %cst_30 {dimension_numbers = #tpu.dot_dimension_numbers<[1], [1], [0], [0], [0, 0, 1, 0], [], []>} : vector<16x16xf32>, vector<16x16xf32>, vector<16x16xf32> -> vector<16x16xf32>
    %cst_31 = arith.constant 2.500000e-01 : f32
    %70 = vector.broadcast %cst_31 : f32 to vector<16x16xf32>
    %71 = arith.mulf %69, %70 : vector<16x16xf32>
    %cst_32 = arith.constant -3.40282347E+38 : f32
    %72 = vector.shape_cast %39 : vector<1x16xi1> to vector<1x16xi1>
    %73 = vector.broadcast %72 : vector<1x16xi1> to vector<16x16xi1>
    %74 = vector.broadcast %cst_32 : f32 to vector<16x16xf32>
    %75 = arith.select %73, %71, %74 : vector<16x16xi1>, vector<16x16xf32>
    %cst_33 = arith.constant dense<0xFF800000> : vector<16xf32>
    %76 = vector.multi_reduction <maximumf>, %75, %cst_33 [1] : vector<16x16xf32> to vector<16xf32>
    %cst_34 = arith.constant 0xFF800000 : f32
    %77 = vector.broadcast %cst_34 : f32 to vector<16xf32>
    %78 = arith.maximumf %77, %76 : vector<16xf32>
    %79 = vector.shape_cast %78 : vector<16xf32> to vector<16x1xf32>
    %80 = vector.broadcast %79 : vector<16x1xf32> to vector<16x16xf32>
    %81 = arith.subf %75, %80 : vector<16x16xf32>
    %82 = math.exp %81 : vector<16x16xf32>
    %cst_35 = arith.constant dense<0.000000e+00> : vector<16xf32>
    %83 = vector.multi_reduction <add>, %82, %cst_35 [1] : vector<16x16xf32> to vector<16xf32>
    %84 = vector.shape_cast %83 : vector<16xf32> to vector<16x1xf32>
    %85 = vector.broadcast %84 : vector<16x1xf32> to vector<16x16xf32>
    %86 = arith.divf %82, %85 : vector<16x16xf32>
    %cst_36 = arith.constant 0.000000e+00 : f32
    %87 = vector.shape_cast %39 : vector<1x16xi1> to vector<1x16xi1>
    %88 = vector.broadcast %87 : vector<1x16xi1> to vector<16x16xi1>
    %89 = vector.broadcast %cst_36 : f32 to vector<16x16xf32>
    %90 = arith.select %88, %86, %89 : vector<16x16xi1>, vector<16x16xf32>
    %cst_37 = arith.constant dense<0.000000e+00> : vector<16x16xf32>
    %91 = tpu.matmul %90, %68, %cst_37 {dimension_numbers = #tpu.dot_dimension_numbers<[1], [0], [0], [1], [0, 0, 1, 1], [], []>} : vector<16x16xf32>, vector<16x16xf32>, vector<16x16xf32> -> vector<16x16xf32>
    %92 = tpu.concatenate %65, %91 in 1 : vector<16x16xf32>, vector<16x16xf32> -> vector<16x32xf32>
    %c0_38 = arith.constant 0 : index
    %c0_39 = arith.constant 0 : index
    %93 = vector.load %arg20[%c0_38, %c0_39] : memref<32x32xf32, #tpu.memory_space<vmem>>, vector<16x32xf32>
    tpu.vector_store %arg20[%c0_38, %c0_39], %92 {strides = array<i32>} : memref<32x32xf32, #tpu.memory_space<vmem>>, vector<16x32xf32>,
    %94 = vector.extract_strided_slice %7 {offsets = [1, 0], sizes = [1, 16], strides = [1, 1]} : vector<2x16xf32> to vector<1x16xf32>
    %cst_40 = arith.constant 5.000000e-01 : f32
    %95 = vector.broadcast %cst_40 : f32 to vector<1x16xf32>
    %96 = arith.cmpf ogt, %94, %95 : vector<1x16xf32>
    %97 = vector.extract_strided_slice %36 {offsets = [16, 0], sizes = [16, 16], strides = [1, 1]} : vector<32x96xf32> to vector<16x16xf32>
    %98 = vector.extract_strided_slice %36 {offsets = [16, 32], sizes = [16, 16], strides = [1, 1]} : vector<32x96xf32> to vector<16x16xf32>
    %99 = vector.extract_strided_slice %36 {offsets = [16, 64], sizes = [16, 16], strides = [1, 1]} : vector<32x96xf32> to vector<16x16xf32>
    %cst_41 = arith.constant dense<0.000000e+00> : vector<16x16xf32>
    %100 = tpu.matmul %97, %98, %cst_41 {dimension_numbers = #tpu.dot_dimension_numbers<[1], [1], [0], [0], [0, 0, 1, 0], [], []>} : vector<16x16xf32>, vector<16x16xf32>, vector<16x16xf32> -> vector<16x16xf32>
    %cst_42 = arith.constant 2.500000e-01 : f32
    %101 = vector.broadcast %cst_42 : f32 to vector<16x16xf32>
    %102 = arith.mulf %100, %101 : vector<16x16xf32>
    %cst_43 = arith.constant -3.40282347E+38 : f32
    %103 = vector.shape_cast %96 : vector<1x16xi1> to vector<1x16xi1>
    %104 = vector.broadcast %103 : vector<1x16xi1> to vector<16x16xi1>
    %105 = vector.broadcast %cst_43 : f32 to vector<16x16xf32>
    %106 = arith.select %104, %102, %105 : vector<16x16xi1>, vector<16x16xf32>
    %cst_44 = arith.constant dense<0xFF800000> : vector<16xf32>
    %107 = vector.multi_reduction <maximumf>, %106, %cst_44 [1] : vector<16x16xf32> to vector<16xf32>
    %cst_45 = arith.constant 0xFF800000 : f32
    %108 = vector.broadcast %cst_45 : f32 to vector<16xf32>
    %109 = arith.maximumf %108, %107 : vector<16xf32>
    %110 = vector.shape_cast %109 : vector<16xf32> to vector<16x1xf32>
    %111 = vector.broadcast %110 : vector<16x1xf32> to vector<16x16xf32>
    %112 = arith.subf %106, %111 : vector<16x16xf32>
    %113 = math.exp %112 : vector<16x16xf32>
    %cst_46 = arith.constant dense<0.000000e+00> : vector<16xf32>
    %114 = vector.multi_reduction <add>, %113, %cst_46 [1] : vector<16x16xf32> to vector<16xf32>
    %115 = vector.shape_cast %114 : vector<16xf32> to vector<16x1xf32>
    %116 = vector.broadcast %115 : vector<16x1xf32> to vector<16x16xf32>
    %117 = arith.divf %113, %116 : vector<16x16xf32>
    %cst_47 = arith.constant 0.000000e+00 : f32
    %118 = vector.shape_cast %96 : vector<1x16xi1> to vector<1x16xi1>
    %119 = vector.broadcast %118 : vector<1x16xi1> to vector<16x16xi1>
    %120 = vector.broadcast %cst_47 : f32 to vector<16x16xf32>
    %121 = arith.select %119, %117, %120 : vector<16x16xi1>, vector<16x16xf32>
    %cst_48 = arith.constant dense<0.000000e+00> : vector<16x16xf32>
    %122 = tpu.matmul %121, %99, %cst_48 {dimension_numbers = #tpu.dot_dimension_numbers<[1], [0], [0], [1], [0, 0, 1, 1], [], []>} : vector<16x16xf32>, vector<16x16xf32>, vector<16x16xf32> -> vector<16x16xf32>
    %123 = vector.extract_strided_slice %36 {offsets = [16, 16], sizes = [16, 16], strides = [1, 1]} : vector<32x96xf32> to vector<16x16xf32>
    %124 = vector.extract_strided_slice %36 {offsets = [16, 48], sizes = [16, 16], strides = [1, 1]} : vector<32x96xf32> to vector<16x16xf32>
    %125 = vector.extract_strided_slice %36 {offsets = [16, 80], sizes = [16, 16], strides = [1, 1]} : vector<32x96xf32> to vector<16x16xf32>
    %cst_49 = arith.constant dense<0.000000e+00> : vector<16x16xf32>
    %126 = tpu.matmul %123, %124, %cst_49 {dimension_numbers = #tpu.dot_dimension_numbers<[1], [1], [0], [0], [0, 0, 1, 0], [], []>} : vector<16x16xf32>, vector<16x16xf32>, vector<16x16xf32> -> vector<16x16xf32>
    %cst_50 = arith.constant 2.500000e-01 : f32
    %127 = vector.broadcast %cst_50 : f32 to vector<16x16xf32>
    %128 = arith.mulf %126, %127 : vector<16x16xf32>
    %cst_51 = arith.constant -3.40282347E+38 : f32
    %129 = vector.shape_cast %96 : vector<1x16xi1> to vector<1x16xi1>
    %130 = vector.broadcast %129 : vector<1x16xi1> to vector<16x16xi1>
    %131 = vector.broadcast %cst_51 : f32 to vector<16x16xf32>
    %132 = arith.select %130, %128, %131 : vector<16x16xi1>, vector<16x16xf32>
    %cst_52 = arith.constant dense<0xFF800000> : vector<16xf32>
    %133 = vector.multi_reduction <maximumf>, %132, %cst_52 [1] : vector<16x16xf32> to vector<16xf32>
    %cst_53 = arith.constant 0xFF800000 : f32
    %134 = vector.broadcast %cst_53 : f32 to vector<16xf32>
    %135 = arith.maximumf %134, %133 : vector<16xf32>
    %136 = vector.shape_cast %135 : vector<16xf32> to vector<16x1xf32>
    %137 = vector.broadcast %136 : vector<16x1xf32> to vector<16x16xf32>
    %138 = arith.subf %132, %137 : vector<16x16xf32>
    %139 = math.exp %138 : vector<16x16xf32>
    %cst_54 = arith.constant dense<0.000000e+00> : vector<16xf32>
    %140 = vector.multi_reduction <add>, %139, %cst_54 [1] : vector<16x16xf32> to vector<16xf32>
    %141 = vector.shape_cast %140 : vector<16xf32> to vector<16x1xf32>
    %142 = vector.broadcast %141 : vector<16x1xf32> to vector<16x16xf32>
    %143 = arith.divf %139, %142 : vector<16x16xf32>
    %cst_55 = arith.constant 0.000000e+00 : f32
    %144 = vector.shape_cast %96 : vector<1x16xi1> to vector<1x16xi1>
    %145 = vector.broadcast %144 : vector<1x16xi1> to vector<16x16xi1>
    %146 = vector.broadcast %cst_55 : f32 to vector<16x16xf32>
    %147 = arith.select %145, %143, %146 : vector<16x16xi1>, vector<16x16xf32>
    %cst_56 = arith.constant dense<0.000000e+00> : vector<16x16xf32>
    %148 = tpu.matmul %147, %125, %cst_56 {dimension_numbers = #tpu.dot_dimension_numbers<[1], [0], [0], [1], [0, 0, 1, 1], [], []>} : vector<16x16xf32>, vector<16x16xf32>, vector<16x16xf32> -> vector<16x16xf32>
    %149 = tpu.concatenate %122, %148 in 1 : vector<16x16xf32>, vector<16x16xf32> -> vector<16x32xf32>
    %c16 = arith.constant 16 : index
    %c0_57 = arith.constant 0 : index
    %150 = vector.load %arg20[%c16, %c0_57] : memref<32x32xf32, #tpu.memory_space<vmem>>, vector<16x32xf32>
    tpu.vector_store %arg20[%c16, %c0_57], %149 {strides = array<i32>} : memref<32x32xf32, #tpu.memory_space<vmem>>, vector<16x32xf32>,
    %c0_58 = arith.constant 0 : index
    %c0_59 = arith.constant 0 : index
    %151 = vector.load %arg20[%c0_58, %c0_59] : memref<32x32xf32, #tpu.memory_space<vmem>>, vector<32x32xf32>
    %c0_60 = arith.constant 0 : index
    %c0_61 = arith.constant 0 : index
    %152 = vector.load %arg9[%c0_60, %c0_61] : memref<32x32xf32, #tpu.memory_space<vmem>>, vector<32x32xf32>
    %cst_62 = arith.constant dense<0.000000e+00> : vector<32x32xf32>
    %153 = tpu.matmul %151, %152, %cst_62 {dimension_numbers = #tpu.dot_dimension_numbers<[1], [0], [0], [1], [0, 0, 1, 1], [], []>} : vector<32x32xf32>, vector<32x32xf32>, vector<32x32xf32> -> vector<32x32xf32>
    %c0_63 = arith.constant 0 : index
    %c0_64 = arith.constant 0 : index
    %154 = vector.load %arg10[%c0_63, %c0_64] : memref<1x32xf32, #tpu.memory_space<vmem>>, vector<1x32xf32>
    %155 = vector.broadcast %154 : vector<1x32xf32> to vector<32x32xf32>
    %156 = arith.addf %153, %155 : vector<32x32xf32>
    %157 = arith.addf %6, %156 : vector<32x32xf32>
    %c0_65 = arith.constant 0 : index
    %c0_66 = arith.constant 0 : index
    %158 = vector.load %arg11[%c0_65, %c0_66] : memref<1x32xf32, #tpu.memory_space<vmem>>, vector<1x32xf32>
    %c0_67 = arith.constant 0 : index
    %c0_68 = arith.constant 0 : index
    %159 = vector.load %arg12[%c0_67, %c0_68] : memref<1x32xf32, #tpu.memory_space<vmem>>, vector<1x32xf32>
    %cst_69 = arith.constant dense<0.000000e+00> : vector<32xf32>
    %160 = vector.multi_reduction <add>, %157, %cst_69 [1] : vector<32x32xf32> to vector<32xf32>
    %161 = vector.shape_cast %160 : vector<32xf32> to vector<32x1xf32>
    %cst_70 = arith.constant 3.200000e+01 : f32
    %162 = vector.broadcast %cst_70 : f32 to vector<32x1xf32>
    %163 = arith.divf %161, %162 : vector<32x1xf32>
    %164 = vector.broadcast %163 : vector<32x1xf32> to vector<32x32xf32>
    %165 = arith.subf %157, %164 : vector<32x32xf32>
    %166 = arith.mulf %165, %165 : vector<32x32xf32>
    %cst_71 = arith.constant dense<0.000000e+00> : vector<32xf32>
    %167 = vector.multi_reduction <add>, %166, %cst_71 [1] : vector<32x32xf32> to vector<32xf32>
    %168 = vector.shape_cast %167 : vector<32xf32> to vector<32x1xf32>
    %cst_72 = arith.constant 3.200000e+01 : f32
    %169 = vector.broadcast %cst_72 : f32 to vector<32x1xf32>
    %170 = arith.divf %168, %169 : vector<32x1xf32>
    %171 = vector.broadcast %163 : vector<32x1xf32> to vector<32x32xf32>
    %172 = arith.subf %157, %171 : vector<32x32xf32>
    %cst_73 = arith.constant 9.99999996E-13 : f32
    %173 = vector.broadcast %cst_73 : f32 to vector<32x1xf32>
    %174 = arith.addf %170, %173 : vector<32x1xf32>
    %175 = math.rsqrt %174 : vector<32x1xf32>
    %176 = vector.broadcast %175 : vector<32x1xf32> to vector<32x32xf32>
    %177 = arith.mulf %172, %176 : vector<32x32xf32>
    %178 = vector.broadcast %158 : vector<1x32xf32> to vector<32x32xf32>
    %179 = arith.mulf %177, %178 : vector<32x32xf32>
    %180 = vector.broadcast %159 : vector<1x32xf32> to vector<32x32xf32>
    %181 = arith.addf %179, %180 : vector<32x32xf32>
    %c0_74 = arith.constant 0 : index
    %c0_75 = arith.constant 0 : index
    %182 = vector.load %arg13[%c0_74, %c0_75] : memref<32x64xf32, #tpu.memory_space<vmem>>, vector<32x64xf32>
    %cst_76 = arith.constant dense<0.000000e+00> : vector<32x64xf32>
    %183 = tpu.matmul %181, %182, %cst_76 {dimension_numbers = #tpu.dot_dimension_numbers<[1], [0], [0], [1], [0, 0, 1, 1], [], []>} : vector<32x32xf32>, vector<32x64xf32>, vector<32x64xf32> -> vector<32x64xf32>
    %c0_77 = arith.constant 0 : index
    %c0_78 = arith.constant 0 : index
    %184 = vector.load %arg14[%c0_77, %c0_78] : memref<1x64xf32, #tpu.memory_space<vmem>>, vector<1x64xf32>
    %185 = vector.broadcast %184 : vector<1x64xf32> to vector<32x64xf32>
    %186 = arith.addf %183, %185 : vector<32x64xf32>
    %cst_79 = arith.constant 0.000000e+00 : f32
    %187 = vector.broadcast %cst_79 : f32 to vector<32x64xf32>
    %188 = arith.maximumf %186, %187 : vector<32x64xf32>
    %c0_80 = arith.constant 0 : index
    %c0_81 = arith.constant 0 : index
    %189 = vector.load %arg15[%c0_80, %c0_81] : memref<64x32xf32, #tpu.memory_space<vmem>>, vector<64x32xf32>
    %cst_82 = arith.constant dense<0.000000e+00> : vector<32x32xf32>
    %190 = tpu.matmul %188, %189, %cst_82 {dimension_numbers = #tpu.dot_dimension_numbers<[1], [0], [0], [1], [0, 0, 1, 1], [], []>} : vector<32x64xf32>, vector<64x32xf32>, vector<32x32xf32> -> vector<32x32xf32>
    %c0_83 = arith.constant 0 : index
    %c0_84 = arith.constant 0 : index
    %191 = vector.load %arg16[%c0_83, %c0_84] : memref<1x32xf32, #tpu.memory_space<vmem>>, vector<1x32xf32>
    %192 = vector.broadcast %191 : vector<1x32xf32> to vector<32x32xf32>
    %193 = arith.addf %190, %192 : vector<32x32xf32>
    %194 = arith.addf %157, %193 : vector<32x32xf32>
    %c0_85 = arith.constant 0 : index
    %c0_86 = arith.constant 0 : index
    %195 = vector.load %arg17[%c0_85, %c0_86] : memref<32x80xf32, #tpu.memory_space<vmem>>, vector<32x80xf32>
    %cst_87 = arith.constant dense<0.000000e+00> : vector<32x80xf32>
    %196 = tpu.matmul %194, %195, %cst_87 {dimension_numbers = #tpu.dot_dimension_numbers<[1], [0], [0], [1], [0, 0, 1, 1], [], []>} : vector<32x32xf32>, vector<32x80xf32>, vector<32x80xf32> -> vector<32x80xf32>
    %c0_88 = arith.constant 0 : index
    %c0_89 = arith.constant 0 : index
    %197 = vector.load %arg18[%c0_88, %c0_89] : memref<1x80xf32, #tpu.memory_space<vmem>>, vector<1x80xf32>
    %198 = vector.broadcast %197 : vector<1x80xf32> to vector<32x80xf32>
    %199 = arith.addf %196, %198 : vector<32x80xf32>
    %c0_90 = arith.constant 0 : index
    %c0_91 = arith.constant 0 : index
    %200 = vector.load %arg19[%c0_90, %c0_91] : memref<32x80xf32, #tpu.memory_space<vmem>>, vector<32x80xf32>
    tpu.vector_store %arg19[%c0_90, %c0_91], %199 {strides = array<i32>} : memref<32x80xf32, #tpu.memory_space<vmem>>, vector<32x80xf32>,
    return
  }
  func.func @transform_0(%arg0: i32) -> (i32, i32) {
    %c0_i32 = arith.constant 0 : i32
    %c0_i32_0 = arith.constant 0 : i32
    %c0_i32_1 = arith.constant 0 : i32
    return %c0_i32, %c0_i32_0 : i32, i32
  }
  func.func @transform_1(%arg0: i32) -> (i32, i32) {
    %c0_i32 = arith.constant 0 : i32
    %c0_i32_0 = arith.constant 0 : i32
    %c0_i32_1 = arith.constant 0 : i32
    return %c0_i32, %c0_i32_0 : i32, i32
  }
  func.func @transform_2(%arg0: i32) -> (i32, i32) {
    %c0_i32 = arith.constant 0 : i32
    %c0_i32_0 = arith.constant 0 : i32
    %c0_i32_1 = arith.constant 0 : i32
    return %c0_i32, %c0_i32_0 : i32, i32
  }
  func.func @transform_3(%arg0: i32) -> (i32, i32) {
    %c0_i32 = arith.constant 0 : i32
    %c0_i32_0 = arith.constant 0 : i32
    %c0_i32_1 = arith.constant 0 : i32
    return %c0_i32, %c0_i32_0 : i32, i32
  }
  func.func @transform_4(%arg0: i32) -> (i32, i32) {
    %c0_i32 = arith.constant 0 : i32
    %c0_i32_0 = arith.constant 0 : i32
    %c0_i32_1 = arith.constant 0 : i32
    return %c0_i32, %c0_i32_0 : i32, i32
  }
  func.func @transform_5(%arg0: i32) -> (i32, i32) {
    %c0_i32 = arith.constant 0 : i32
    %c0_i32_0 = arith.constant 0 : i32
    %c0_i32_1 = arith.constant 0 : i32
    return %c0_i32, %c0_i32_0 : i32, i32
  }
  func.func @transform_6(%arg0: i32) -> (i32, i32) {
    %c0_i32 = arith.constant 0 : i32
    %c0_i32_0 = arith.constant 0 : i32
    %c0_i32_1 = arith.constant 0 : i32
    return %c0_i32, %c0_i32_0 : i32, i32
  }
  func.func @transform_7(%arg0: i32) -> (i32, i32) {
    %c0_i32 = arith.constant 0 : i32
    %c0_i32_0 = arith.constant 0 : i32
    %c0_i32_1 = arith.constant 0 : i32
    return %c0_i32, %c0_i32_0 : i32, i32
  }
  func.func @transform_8(%arg0: i32) -> (i32, i32) {
    %c0_i32 = arith.constant 0 : i32
    %c0_i32_0 = arith.constant 0 : i32
    %c0_i32_1 = arith.constant 0 : i32
    return %c0_i32, %c0_i32_0 : i32, i32
  }
  func.func @transform_9(%arg0: i32) -> (i32, i32) {
    %c0_i32 = arith.constant 0 : i32
    %c0_i32_0 = arith.constant 0 : i32
    %c0_i32_1 = arith.constant 0 : i32
    return %c0_i32, %c0_i32_0 : i32, i32
  }
  func.func @transform_10(%arg0: i32) -> (i32, i32) {
    %c0_i32 = arith.constant 0 : i32
    %c0_i32_0 = arith.constant 0 : i32
    %c0_i32_1 = arith.constant 0 : i32
    return %c0_i32, %c0_i32_0 : i32, i32
  }
  func.func @transform_11(%arg0: i32) -> (i32, i32) {
    %c0_i32 = arith.constant 0 : i32
    %c0_i32_0 = arith.constant 0 : i32
    %c0_i32_1 = arith.constant 0 : i32
    return %c0_i32, %c0_i32_0 : i32, i32
  }
  func.func @transform_12(%arg0: i32) -> (i32, i32) {
    %c0_i32 = arith.constant 0 : i32
    %c0_i32_0 = arith.constant 0 : i32
    %c0_i32_1 = arith.constant 0 : i32
    return %c0_i32, %c0_i32_0 : i32, i32
  }
  func.func @transform_13(%arg0: i32) -> (i32, i32) {
    %c0_i32 = arith.constant 0 : i32
    %c0_i32_0 = arith.constant 0 : i32
    %c0_i32_1 = arith.constant 0 : i32
    return %c0_i32, %c0_i32_0 : i32, i32
  }
  func.func @transform_14(%arg0: i32) -> (i32, i32) {
    %c0_i32 = arith.constant 0 : i32
    %c0_i32_0 = arith.constant 0 : i32
    %c0_i32_1 = arith.constant 0 : i32
    return %c0_i32, %c0_i32_0 : i32, i32
  }
  func.func @transform_15(%arg0: i32) -> (i32, i32) {
    %c0_i32 = arith.constant 0 : i32
    %c0_i32_0 = arith.constant 0 : i32
    %c0_i32_1 = arith.constant 0 : i32
    return %c0_i32, %c0_i32_0 : i32, i32
  }
  func.func @transform_16(%arg0: i32) -> (i32, i32) {
    %c0_i32 = arith.constant 0 : i32
    %c0_i32_0 = arith.constant 0 : i32
    %c0_i32_1 = arith.constant 0 : i32
    return %c0_i32, %c0_i32_0 : i32, i32
  }
  func.func @transform_17(%arg0: i32) -> (i32, i32) {
    %c0_i32 = arith.constant 0 : i32
    %c0_i32_0 = arith.constant 0 : i32
    %c0_i32_1 = arith.constant 0 : i32
    return %c0_i32, %c0_i32_0 : i32, i32
  }
  func.func @transform_18(%arg0: i32) -> (i32, i32) {
    %c0_i32 = arith.constant 0 : i32
    %c0_i32_0 = arith.constant 0 : i32
    %c0_i32_1 = arith.constant 0 : i32
    return %c0_i32, %c0_i32_0 : i32, i32
  }
}

</mosaic_0001>

<bundles_post_ra>
// kernel: audio_decoder_forward.3
= control target key start
LH: loop header
LB: loop body
LE: loop exit
PB: predicated region body
PF: predicated region fallthrough
CT: control target
= control target key end

     0   :  { %s1867_s0 = inlined_call_operand.vmem [shape: f32[32,32], index: 0, kind: input, shape index: {}]   ;;  %s1868_s1 = inlined_call_operand.vmem [shape: f32[32,32], index: 1, kind: input, shape index: {}]   ;;  %s1869_s2 = inlined_call_operand.vmem [shape: f32[32,32], index: 2, kind: input, shape index: {}]   ;;  %s1870_s3 = inlined_call_operand.vmem [shape: f32[2,16], index: 3, kind: input, shape index: {}]   ;;  %s1871_s4 = inlined_call_operand.vmem [shape: f32[1,32], index: 4, kind: input, shape index: {}, may-alias: {4,10}]   ;;  %s1872_s5 = inlined_call_operand.vmem [shape: f32[1,32], index: 5, kind: input, shape index: {}, may-alias: {5,9,11,15}]   ;;  %s1873_s6 = inlined_call_operand.vmem [shape: f32[32,96], index: 6, kind: input, shape index: {}]   ;;  %s1874_s7 = inlined_call_operand.vmem [shape: f32[1,96], index: 7, kind: input, shape index: {}]   ;;  %s1875_s8 = inlined_call_operand.vmem [shape: f32[32,32], index: 8, kind: input, shape index: {}]   ;;  %s1876_s9 = inlined_call_operand.vmem [shape: f32[1,32], index: 9, kind: input, shape index: {}, may-alias: {5,9,11,15}]   ;;  %s1877_s10 = inlined_call_operand.vmem [shape: f32[1,32], index: 10, kind: input, shape index: {}, may-alias: {4,10}]   ;;  %s1878_s11 = inlined_call_operand.vmem [shape: f32[1,32], index: 11, kind: input, shape index: {}, may-alias: {5,9,11,15}]   ;;  %s1879_s12 = inlined_call_operand.vmem [shape: f32[32,64], index: 12, kind: input, shape index: {}]   ;;  %s1880_s13 = inlined_call_operand.vmem [shape: f32[1,64], index: 13, kind: input, shape index: {}]   ;;  %s1881_s14 = inlined_call_operand.vmem [shape: f32[64,32], index: 14, kind: input, shape index: {}]   ;;  %s1882_s15 = inlined_call_operand.vmem [shape: f32[1,32], index: 15, kind: input, shape index: {}, may-alias: {5,9,11,15}]   ;;  %s1883_s16 = inlined_call_operand.vmem [shape: f32[32,80], index: 16, kind: input, shape index: {}]   ;;  %s1884_s17 = inlined_call_operand.vmem [shape: f32[1,80], index: 17, kind: input, shape index: {}]   ;;  %s1885_s18 = inlined_call_operand.hbm [shape: f32[32,80], index: 18, kind: output, shape index: {}]  }
   0x1   :  { %1889 = sst [smem:[#allocation6_spill]] %s1867_s0 }
   0x2   :  { %1890 = sst [smem:[#allocation7_spill]] %s1868_s1 }
   0x3   :  { %1891 = sst [smem:[#allocation8_spill]] %s1869_s2 }
   0x4   :  { %1892 = sst [smem:[#allocation9_spill]] %s1880_s13 }
   0x5   :  { %s1893_s29 = sld [smem:[#allocation6_spill]]  ;;  %vm87_vm0 = vcmask 261120  }
   0x6   :  { %s1894_s13 = sld [smem:[#allocation7_spill]] }
   0x7   :  { %s1895_s20 = sld [smem:[#allocation8_spill]] }
   0xb   :  { %v60_v0 = vld [vmem:[%s1893_s29] sm:$0xff]  ;;  %v61_v4 = vld [vmem:[%s1893_s29 + $0x8] sm:$0xff]  ;;  %v63_v7 = vld [vmem:[%s1893_s29 + $0x18] sm:$0xff] }
   0xc   :  { %v64_v1 = vld [vmem:[%s1894_s13] sm:$0xff]  ;;  %v65_v5 = vld [vmem:[%s1894_s13 + $0x8] sm:$0xff]  ;;  %v67_v8 = vld [vmem:[%s1894_s13 + $0x18] sm:$0xff] }
   0xd   :  { %v68_v2 = vadd.f32 %v64_v1, %v60_v0  ;;  %v76_v3 = vld [vmem:[%s1895_s20] sm:$0xff]  ;;  %v69_v6 = vadd.f32 %v65_v5, %v61_v4  ;;  %v79_v9 = vld [vmem:[%s1895_s20 + $0x18] sm:$0xff]  ;;  %v71_v11 = vadd.f32 %v67_v8, %v63_v7  ;;  %v77_v13 = vld [vmem:[%s1895_s20 + $0x8] sm:$0xff] }
   0xf   :  { %v72_v10 = vmul.f32 5.656854, %v68_v2  ;;  %v73_v12 = vmul.f32 5.656854, %v69_v6  ;;  %v75_v15 = vmul.f32 5.656854, %v71_v11 }
  0x11   :  { %v1428_v14 = vadd.f32 %v76_v3, %v72_v10  ;;  %v1432_v17 = vadd.f32 %v79_v9, %v75_v15 }
  0x13   :  { %v88_v16 = vsel %vm87_vm0, %v1428_v14, 0.0 }
  0x14   :  { %23 = vsyncpa [#allocation4], 0  ;;  %89 = vadd.xlane.f32.xlu0 %v88_v16  ;;  %v1434_v18 = vadd.f32 %v77_v13, %v73_v12  ;;  %v97_v19 = vsel %vm87_vm0, %v1432_v17, 0.0  ;;  %v1295_v21 = vmov 32.0   ;;  %v200_v43 = vld [vmem:[%s1873_s6 + $0x18] sm:$0xff]  ;;  %v199_v44 = vld [vmem:[%s1873_s6 + $0x10] sm:$0xff] }
  0x15   :  { %98 = vadd.xlane.f32.xlu2 %v97_v19  ;;  %1219 = vrcp.f32 %v1295_v21  ;;  %229 = vmatpush.msra.mxu0 %v200_v43  ;;  %v198_v45 = vld [vmem:[%s1873_s6 + $0x8] sm:$0xff]  ;;  %v197_v46 = vld [vmem:[%s1873_s6] sm:$0xff]  ;;  %s1296_s0 = smov 96   ;;  %s1297_s19 = smov 80   ;;  %vm253_vm11 = vcmask 130048  }
  0x16   :  { %v91_v20 = vsel %vm87_vm0, %v1434_v18, 0.0  ;;  %1173 = vmatpush.msra.mxu1 %v200_v43  ;;  %v1477_v3 = vld [vmem:[%s1871_s4] ss:$0 sm:$0xff]  ;;  %s1298_s1 = smov 112   ;;  %s1900_s22 = sld [smem:[#allocation9_spill]] }
  0x17   :  { %230 = vmatpush.msra.mxu0 %v199_v44  ;;  %v1482_v8 = vld [vmem:[%s1872_s5] ss:$0 sm:$0xff]  ;;  %s1117_s6 = sshll.u32 %s1885_s18, 4  ;;  %s1304_s27 = smov 128   ;;  %s1118_s6 = int_to_ptr.hbm [resolvable:$true] %s1117_s6 }
  0x18   :  { %1174 = vmatpush.msra.mxu1 %v199_v44  ;;  %v1299_v44 = vmov 0   ;;  %s1305_s28 = smov 8  }
  0x19   :  { %231 = vmatpush.msra.mxu0 %v198_v45 }
  0x1a   :  { %1175 = vmatpush.msra.mxu1 %v198_v45 }
  0x1b   :  { %v1220_v22 = vpop.eup %1219  ;;  %232 = vmatpush.msra.mxu0 %v197_v46 }
  0x1c   :  { %92 = vadd.xlane.f32.xlu0 %v91_v20  ;;  %v101_v23 = vmul.f32 32.0, %v1220_v22  ;;  %vm105_vm1 = vweird.f32 %v1220_v22  ;;  %1176 = vmatpush.msra.mxu1 %v197_v46 }
  0x1e   :  { %v102_v24 = vsub.f32 1.0, %v101_v23 }
  0x20   :  { %v103_v25 = vmul.f32 %v1220_v22, %v102_v24 }
  0x22   :  { %v104_v26 = vadd.f32 %v1220_v22, %v103_v25 }
  0x24   :  { %v1440_v27 = vsel %vm105_vm1, %v1220_v22, %v104_v26 }
  0x87   :  { %v90_v28 = vpop.xlane.xlu0 %89 }
  0x88   :  { %v107_v29 = vmul.f32 %v1440_v27, %v90_v28  ;;  %v99_v30 = vpop.xlane.xlu2 %98  ;;  %v1498_v28 = vld [vmem:[%s1874_s7] ss:$0 sm:$0xff] }
  0x89   :  { %v110_v32 = vmul.f32 %v1440_v27, %v99_v30 }
  0x8a   :  { %v111_v31 = vsub.f32 %v1428_v14, %v107_v29 }
  0x8b   :  { %v1446_v34 = vsub.f32 %v1432_v17, %v110_v32 }
  0x8c   :  { %v115_v33 = vmul.f32 %v111_v31, %v111_v31 }
  0x8d   :  { %v118_v36 = vmul.f32 %v1446_v34, %v1446_v34 }
  0x8e   :  { %v119_v35 = vsel %vm87_vm0, %v115_v33, 0.0 }
  0x8f   :  { %120 = vadd.xlane.f32.xlu1 %v119_v35  ;;  %v93_v37 = vpop.xlane.xlu0 %92  ;;  %v128_v39 = vsel %vm87_vm0, %v118_v36, 0.0  ;;  %v62_v35 = vld [vmem:[%s1893_s29 + $0x10] sm:$0xff]  ;;  %s1302_s29 = smov 16  }
  0x90   :  { %v108_v38 = vmul.f32 %v1440_v27, %v93_v37  ;;  %129 = vadd.xlane.f32.xlu2 %v128_v39  ;;  %v66_v36 = vld [vmem:[%s1894_s13 + $0x10] sm:$0xff]  ;;  %s1301_s13 = smov 64  }
  0x91   :  { %v70_v37 = vadd.f32 %v66_v36, %v62_v35 }
  0x92   :  { %v1454_v40 = vsub.f32 %v1434_v18, %v108_v38  ;;  %v78_v38 = vld [vmem:[%s1895_s20 + $0x10] sm:$0xff] }
  0x93   :  { %v74_v39 = vmul.f32 5.656854, %v70_v37 }
  0x94   :  { %v116_v41 = vmul.f32 %v1454_v40, %v1454_v40 }
  0x96   :  { %v122_v42 = vsel %vm87_vm0, %v116_v41, 0.0  ;;  %v84_v41 = vld [vmem:[%s1870_s3] sm:$0x3]  ;;  %s1300_s3 = smov 48  }
  0x97   :  { %123 = vadd.xlane.f32.xlu1 %v122_v42  ;;  %vm246_vm12 = vcmp.gt.f32.partialorder %v84_v41, 0.5 }
  0x98   :  { %v1528_v45 = vsel %vm246_vm12, 1, %v1299_v44 }
  0x99   :  { %v288_v46 = vperm.slane %v1528_v45, 0 }
  0x9b   :  { %vm1531_vm13 = vcmp.eq.s32.totalorder %v288_v46, 1 }
 0x102   :  { %v121_v47 = vpop.xlane.xlu1 %120 }
 0x103   :  { %v131_v48 = vmul.f32 %v121_v47, %v1440_v27  ;;  %v130_v50 = vpop.xlane.xlu2 %129 }
 0x104   :  { %v134_v51 = vmul.f32 %v130_v50, %v1440_v27 }
 0x105   :  { %v135_v49 = vadd.f32 1e-12, %v131_v48  ;;  %v556_v48 = vperm.slane %v1528_v45, 1 }
 0x106   :  { %v138_v53 = vadd.f32 1e-12, %v134_v51 }
 0x107   :  { %1221 = vrsqrt.f32 %v135_v49  ;;  %vm145_vm3 = vweird.f32 %v135_v49 }
 0x108   :  { %1223 = vrsqrt.f32 %v138_v53  ;;  %vm175_vm5 = vweird.f32 %v138_v53 }
 0x10a   :  { %v124_v52 = vpop.xlane.xlu1 %123 }
 0x10b   :  { %v132_v54 = vmul.f32 %v124_v52, %v1440_v27 }
 0x10d   :  { %v1222_v55 = vpop.eup %1221  ;;  %v136_v56 = vadd.f32 1e-12, %v132_v54 }
 0x10e   :  { %v140_v57 = vmul.f32 %v1222_v55, %v135_v49  ;;  %v1224_v59 = vpop.eup %1223  ;;  %vm146_vm2 = vweird.f32 %v1222_v55 }
 0x10f   :  { %1225 = vrsqrt.f32 %v136_v56  ;;  %v170_v61 = vmul.f32 %v1224_v59, %v138_v53  ;;  %vm147_vm4 = vmor %vm145_vm3, %vm146_vm2  ;;  %vm176_vm6 = vweird.f32 %v1224_v59  ;;  %vm155_vm9 = vweird.f32 %v136_v56 }
 0x110   :  { %v141_v58 = vmul.f32 %v1222_v55, %v140_v57  ;;  %vm177_vm7 = vmor %vm175_vm5, %vm176_vm6 }
 0x111   :  { %v171_v0 = vmul.f32 %v1224_v59, %v170_v61 }
 0x112   :  { %v142_v60 = vmul.f32 0.5, %v141_v58 }
 0x113   :  { %v172_v4 = vmul.f32 0.5, %v171_v0 }
 0x114   :  { %v143_v62 = vsub.f32 1.5, %v142_v60 }
 0x115   :  { %v1226_v63 = vpop.eup %1225  ;;  %v173_v9 = vsub.f32 1.5, %v172_v4 }
 0x116   :  { %v144_v1 = vmul.f32 %v1222_v55, %v143_v62  ;;  %v150_v2 = vmul.f32 %v1226_v63, %v136_v56  ;;  %vm156_vm8 = vweird.f32 %v1226_v63 }
 0x117   :  { %v174_v12 = vmul.f32 %v1224_v59, %v173_v9  ;;  %vm157_vm10 = vmor %vm155_vm9, %vm156_vm8 }
 0x118   :  { %v148_v5 = vsel %vm147_vm4, %v1222_v55, %v144_v1  ;;  %v151_v6 = vmul.f32 %v1226_v63, %v150_v2 }
 0x119   :  { %v179_v7 = vmul.f32 %v148_v5, %v111_v31  ;;  %v178_v16 = vsel %vm177_vm7, %v1224_v59, %v174_v12 }
 0x11a   :  { %v152_v10 = vmul.f32 0.5, %v151_v6  ;;  %v182_v20 = vmul.f32 %v178_v16, %v1446_v34 }
 0x11b   :  { %v186_v11 = vmul.f32 %v1477_v3, %v179_v7 }
 0x11c   :  { %v153_v13 = vsub.f32 1.5, %v152_v10  ;;  %v189_v22 = vmul.f32 %v1477_v3, %v182_v20 }
 0x11d   :  { %v193_v15 = vadd.f32 %v1482_v8, %v186_v11 }
 0x11e   :  { %v154_v19 = vmul.f32 %v1226_v63, %v153_v13  ;;  %v196_v24 = vadd.f32 %v1482_v8, %v189_v22 }
 0x11f   :  { %1129 = vmatmul.msk.f32.vlgmr.msra.gmra.mxu0 %vm87_vm0, %v193_v15 }
 0x120   :  { %v158_v21 = vsel %vm157_vm10, %v1226_v63, %v154_v19  ;;  %1132 = vmatmul.msk.f32.vlgmr.msra.gmra.mxu1 %vm87_vm0, %v196_v24 }
 0x121   :  { %v180_v23 = vmul.f32 %v158_v21, %v1454_v40  ;;  %v1521_v40 = vadd.f32 %v78_v38, %v74_v39 }
 0x123   :  { %v187_v25 = vmul.f32 %v1477_v3, %v180_v23  ;;  %v94_v42 = vsel %vm87_vm0, %v1521_v40, 0.0 }
 0x125   :  { %v194_v26 = vadd.f32 %v1482_v8, %v187_v25 }
 0x127   :  { %1130 = vmatmul.msk.f32.gmra.mxu0 %vm87_vm0, %v194_v26 }
 0x19c   :  { %v234_v29 = vpop.f32.mrf.mxu0 }
 0x19d   :  { %v235_v30 = vadd.f32 %v1498_v28, %v234_v29  ;;  %v243_v43 = vpop.f32.mrf.mxu1 }
 0x19e   :  { %v1552_v6 = vadd.f32 %v1498_v28, %v243_v43 }
 0x19f   :  { %249 = vrot.lane.b32.xlu1 %v235_v30, %s1296_s0 }
 0x1a4   :  { %v237_v31 = vpop.f32.mrf.mxu0 }
 0x1a5   :  { %v238_v32 = vadd.f32 %v1498_v28, %v237_v31 }
 0x1a7   :  { %381 = vrot.lane.b32.xlu1 %v235_v30, %s1297_s19  ;;  %251 = vrot.lane.b32.xlu0 %v238_v32, %s1296_s0  ;;  %v1195_v5 = vpack.i.bf16 %v235_v30, %v238_v32 }
 0x1af   :  { %379 = vrot.lane.b32.xlu1 %v238_v32, %s1298_s1  ;;  %383 = vrot.lane.b32.xlu0 %v238_v32, %s1297_s19 }
 0x1b7   :  { %377 = vrot.lane.b32.xlu0 %v235_v30, %s1298_s1 }
 0x1e1   :  { %95 = vadd.xlane.f32.xlu0 %v94_v42 }
 0x211   :  { %v250_v34 = vpop.permute.xlu1 %249 }
 0x219   :  { %v252_v33 = vpop.permute.xlu0 %251  ;;  %v1541_v56 = vpop.permute.xlu1 %381 }
 0x21a   :  { %1133 = vmatpush.xpose.msk.msrb.mxu1 %vm253_vm11, %v252_v33 }
 0x21e   :  { %1134 = vmatpush.xpose.msk.msrb.mxu1 %vm253_vm11, %v250_v34 }
 0x221   :  { %1135 = vmatmul.msk.f32.vlgmr.msrb.gmra.mxu1 %vm253_vm11, %v235_v30  ;;  %v1543_v57 = vpop.permute.xlu1 %379  ;;  %v384_v7 = vpop.permute.xlu0 %383 }
 0x229   :  { %1136 = vmatmul.msk.f32.gmra.mxu1 %vm253_vm11, %v238_v32  ;;  %v378_v9 = vpop.permute.xlu0 %377 }
 0x254   :  { %v96_v10 = vpop.xlane.xlu0 %95 }
 0x255   :  { %v109_v11 = vmul.f32 %v1440_v27, %v96_v10 }
 0x257   :  { %v1559_v12 = vsub.f32 %v1521_v40, %v109_v11 }
 0x259   :  { %v117_v13 = vmul.f32 %v1559_v12, %v1559_v12 }
 0x25b   :  { %v125_v15 = vsel %vm87_vm0, %v117_v13, 0.0 }
 0x29e   :  { %v279_v47 = vpop.f32.mrf.mxu1 }
 0x29f   :  { %v285_v49 = vmul.f32 0.25, %v279_v47 }
 0x2a1   :  { %v290_v50 = vsel %vm1531_vm13, %v285_v49, -3.4028235e+38 }
 0x2a2   :  { %v292_v51 = vsel %vm253_vm11, %v290_v50, -inf }
 0x2a3   :  { %293 = vmax.xlane.f32.xlu1 %v292_v51 }
 0x2a6   :  { %v282_v52 = vpop.f32.mrf.mxu1 }
 0x2a7   :  { %v286_v53 = vmul.f32 0.25, %v282_v52 }
 0x2a9   :  { %v291_v54 = vsel %vm1531_vm13, %v286_v53, -3.4028235e+38 }
 0x2aa   :  { %v295_v55 = vsel %vm253_vm11, %v291_v54, -inf }
 0x2ab   :  { %296 = vmax.xlane.f32.xlu2 %v295_v55 }
 0x316   :  { %v294_v58 = vpop.xlane.xlu1 %293 }
 0x317   :  { %v298_v59 = vsub.f32 %v290_v50, %v294_v58 }
 0x319   :  { %v300_v60 = vmul.f32 1.442695, %v298_v59 }
 0x31b   :  { %1227 = vpow2.f32 %v300_v60 }
 0x31e   :  { %v297_v61 = vpop.xlane.xlu2 %296 }
 0x31f   :  { %v299_v62 = vsub.f32 %v291_v54, %v297_v61 }
 0x321   :  { %v1228_v63 = vpop.eup %1227  ;;  %v302_v0 = vmul.f32 1.442695, %v299_v62 }
 0x322   :  { %v304_v1 = vsel %vm253_vm11, %v1228_v63, 0.0 }
 0x323   :  { %1229 = vpow2.f32 %v302_v0  ;;  %305 = vadd.xlane.f32.xlu1 %v304_v1 }
 0x329   :  { %v1546_v2 = vpop.eup %1229 }
 0x32a   :  { %v307_v4 = vsel %vm253_vm11, %v1546_v2, 0.0 }
 0x32b   :  { %308 = vadd.xlane.f32.xlu2 %v307_v4 }
 0x33c   :  { %1196 = vrot.lane.b32.xlu1 %v1195_v5, %s1300_s3 }
 0x343   :  { %1191 = vrot.lane.b32.xlu2 %v1195_v5, %s1301_s13 }
 0x344   :  { %647 = vrot.lane.b32.xlu1 %v1552_v6, %s1298_s1 }
 0x36c   :  { %126 = vadd.xlane.f32.xlu2 %v125_v15 }
 0x396   :  { %v306_v16 = vpop.xlane.xlu1 %305 }
 0x397   :  { %1231 = vrcp.f32 %v306_v16  ;;  %v321_v23 = vand.u32 2147483648, %v306_v16  ;;  %v319_v25 = vand.u32 2147483647, %v306_v16  ;;  %vm315_vm15 = vweird.f32 %v306_v16 }
 0x399   :  { %v322_v30 = vor.u32 1.1754944e-38, %v321_v23  ;;  %vm320_vm2 = vcmp.eq.f32.partialorder %v319_v25, 8.507059e+37 }
 0x39d   :  { %v1232_v19 = vpop.eup %1231 }
 0x39e   :  { %v311_v20 = vmul.f32 %v1232_v19, %v306_v16  ;;  %v309_v21 = vpop.xlane.xlu2 %308  ;;  %vm316_vm14 = vweird.f32 %v1232_v19 }
 0x39f   :  { %1233 = vrcp.f32 %v309_v21  ;;  %vm317_vm1 = vmor %vm315_vm15, %vm316_vm14  ;;  %v336_v38 = vand.u32 2147483648, %v309_v21  ;;  %v334_v43 = vand.u32 2147483647, %v309_v21  ;;  %vm330_vm4 = vweird.f32 %v309_v21 }
 0x3a0   :  { %v312_v22 = vsub.f32 1.0, %v311_v20 }
 0x3a1   :  { %v337_v46 = vor.u32 1.1754944e-38, %v336_v38  ;;  %vm335_vm6 = vcmp.eq.f32.partialorder %v334_v43, 8.507059e+37 }
 0x3a2   :  { %v313_v24 = vmul.f32 %v1232_v19, %v312_v22 }
 0x3a4   :  { %v314_v26 = vadd.f32 %v1232_v19, %v313_v24 }
 0x3a5   :  { %v1234_v29 = vpop.eup %1233 }
 0x3a6   :  { %v326_v31 = vmul.f32 %v1234_v29, %v309_v21  ;;  %v1192_v32 = vpop.permute.xlu2 %1191  ;;  %v318_v33 = vsel %vm317_vm1, %v1232_v19, %v314_v26  ;;  %vm331_vm3 = vweird.f32 %v1234_v29 }
 0x3a7   :  { %v1193_v34 = vunpack.i.l.bf16 %v1192_v32  ;;  %v323_v35 = vsel %vm320_vm2, %v322_v30, %v318_v33  ;;  %v1194_v39 = vunpack.i.h.bf16 %v1192_v32  ;;  %vm332_vm5 = vmor %vm330_vm4, %vm331_vm3 }
 0x3a8   :  { %v327_v36 = vsub.f32 1.0, %v326_v31  ;;  %v324_v37 = vmul.f32 %v1228_v63, %v323_v35 }
 0x3a9   :  { %368 = vmatpush.msra.mxu2 %v1193_v34  ;;  %1177 = vmatpush.msra.mxu3 %v1193_v34 }
 0x3aa   :  { %v328_v41 = vmul.f32 %v1234_v29, %v327_v36  ;;  %v340_v42 = vsel %vm1531_vm13, %v324_v37, 0.0 }
 0x3ab   :  { %369 = vmatpush.msra.mxu2 %v1194_v39  ;;  %1178 = vmatpush.msra.mxu3 %v1194_v39 }
 0x3ac   :  { %1137 = vmatmul.msk.f32.vlgmr.msra.gmra.mxu2 %vm253_vm11, %v340_v42  ;;  %v329_v44 = vadd.f32 %v1234_v29, %v328_v41 }
 0x3ad   :  { %1139 = vmatpush.xpose.msk.msrb.mxu3 %vm253_vm11, %v384_v7 }
 0x3ae   :  { %v1197_v47 = vpop.permute.xlu1 %1196  ;;  %v333_v49 = vsel %vm332_vm5, %v1234_v29, %v329_v44 }
 0x3af   :  { %v1198_v50 = vunpack.i.l.bf16 %v1197_v47  ;;  %v338_v51 = vsel %vm335_vm6, %v337_v46, %v333_v49  ;;  %v1199_v53 = vunpack.i.h.bf16 %v1197_v47 }
 0x3b0   :  { %v339_v52 = vmul.f32 %v1546_v2, %v338_v51 }
 0x3b1   :  { %1140 = vmatpush.xpose.msk.msrb.mxu3 %vm253_vm11, %v1541_v56  ;;  %496 = vmatpush.msrb.mxu2 %v1198_v50 }
 0x3b2   :  { %v341_v54 = vsel %vm1531_vm13, %v339_v52, 0.0 }
 0x3b3   :  { %1138 = vmatmul.msk.f32.vlgmr.msra.gmra.mxu3 %vm253_vm11, %v341_v54  ;;  %497 = vmatpush.msrb.mxu2 %v1199_v53 }
 0x3bb   :  { %1141 = vmatmul.msk.f32.vlgmr.msrb.gmra.mxu3 %vm253_vm11, %v378_v9 }
 0x3c3   :  { %1142 = vmatmul.msk.f32.gmra.mxu3 %vm253_vm11, %v1543_v57 }
 0x3df   :  { %v127_v55 = vpop.xlane.xlu2 %126 }
 0x3e0   :  { %v133_v58 = vmul.f32 %v127_v55, %v1440_v27 }
 0x3e2   :  { %v137_v59 = vadd.f32 1e-12, %v133_v58 }
 0x3e4   :  { %1235 = vrsqrt.f32 %v137_v59  ;;  %vm165_vm7 = vweird.f32 %v137_v59 }
 0x3ea   :  { %v1236_v56 = vpop.eup %1235 }
 0x3eb   :  { %v160_v60 = vmul.f32 %v1236_v56, %v137_v59  ;;  %vm166_vm8 = vweird.f32 %v1236_v56 }
 0x3ec   :  { %vm167_vm9 = vmor %vm165_vm7, %vm166_vm8 }
 0x3ed   :  { %v161_v61 = vmul.f32 %v1236_v56, %v160_v60 }
 0x3ef   :  { %v162_v62 = vmul.f32 0.5, %v161_v61 }
 0x3f1   :  { %v163_v63 = vsub.f32 1.5, %v162_v62 }
 0x3f3   :  { %v164_v0 = vmul.f32 %v1236_v56, %v163_v63 }
 0x3f5   :  { %v168_v1 = vsel %vm167_vm9, %v1236_v56, %v164_v0 }
 0x3f6   :  { %v181_v2 = vmul.f32 %v168_v1, %v1559_v12  ;;  %v648_v1 = vpop.permute.xlu1 %647 }
 0x3f8   :  { %v188_v4 = vmul.f32 %v1477_v3, %v181_v2 }
 0x3fa   :  { %v195_v57 = vadd.f32 %v1482_v8, %v188_v4 }
 0x3fc   :  { %1131 = vmatmul.msk.f32.gmra.mxu0 %vm87_vm0, %v195_v57 }
 0x42f   :  { %v1621_v2 = vpop.f32.mrf.mxu2 }
 0x436   :  { %v1582_v5 = vpop.f32.mrf.mxu3 }
 0x43e   :  { %v410_v7 = vpop.f32.mrf.mxu3 }
 0x43f   :  { %v416_v9 = vmul.f32 0.25, %v410_v7 }
 0x441   :  { %v418_v10 = vsel %vm1531_vm13, %v416_v9, -3.4028235e+38 }
 0x442   :  { %v420_v11 = vsel %vm253_vm11, %v418_v10, -inf }
 0x443   :  { %421 = vmax.xlane.f32.xlu0 %v420_v11 }
 0x446   :  { %v413_v13 = vpop.f32.mrf.mxu3 }
 0x447   :  { %v417_v15 = vmul.f32 0.25, %v413_v13 }
 0x449   :  { %v419_v12 = vsel %vm1531_vm13, %v417_v15, -3.4028235e+38 }
 0x44a   :  { %v423_v3 = vsel %vm253_vm11, %v419_v12, -inf }
 0x44b   :  { %424 = vmax.xlane.f32.xlu2 %v423_v3 }
 0x457   :  { %651 = vrot.lane.b32.xlu0 %v1552_v6, %s1297_s19 }
 0x479   :  { %v240_v30 = vpop.f32.mrf.mxu0 }
 0x47a   :  { %v1596_v31 = vadd.f32 %v1498_v28, %v240_v30 }
 0x4b6   :  { %v422_v8 = vpop.xlane.xlu0 %421 }
 0x4b7   :  { %v426_v16 = vsub.f32 %v418_v10, %v422_v8 }
 0x4b9   :  { %v428_v19 = vmul.f32 1.442695, %v426_v16 }
 0x4bb   :  { %1237 = vpow2.f32 %v428_v19 }
 0x4be   :  { %v425_v20 = vpop.xlane.xlu2 %424 }
 0x4bf   :  { %v427_v21 = vsub.f32 %v419_v12, %v425_v20 }
 0x4c1   :  { %v1238_v22 = vpop.eup %1237  ;;  %v430_v23 = vmul.f32 1.442695, %v427_v21 }
 0x4c2   :  { %v432_v24 = vsel %vm253_vm11, %v1238_v22, 0.0 }
 0x4c3   :  { %1239 = vpow2.f32 %v430_v23  ;;  %433 = vadd.xlane.f32.xlu0 %v432_v24 }
 0x4c9   :  { %v1240_v25 = vpop.eup %1239  ;;  %v652_v26 = vpop.permute.xlu0 %651 }
 0x4ca   :  { %1151 = vmatpush.xpose.msk.msra.mxu2 %vm253_vm11, %v652_v26  ;;  %v435_v29 = vsel %vm253_vm11, %v1240_v25, 0.0 }
 0x4cb   :  { %436 = vadd.xlane.f32.xlu2 %v435_v29 }
 0x4d7   :  { %645 = vrot.lane.b32.xlu0 %v1596_v31, %s1298_s1 }
 0x4df   :  { %519 = vrot.lane.b32.xlu0 %v1596_v31, %s1296_s0 }
 0x4e3   :  { %649 = vrot.lane.b32.xlu2 %v1596_v31, %s1297_s19 }
 0x4eb   :  { %521 = vrot.lane.b32.xlu2 %v1552_v6, %s1296_s0 }
 0x536   :  { %v434_v32 = vpop.xlane.xlu0 %433 }
 0x537   :  { %1241 = vrcp.f32 %v434_v32  ;;  %v449_v36 = vand.u32 2147483648, %v434_v32  ;;  %v447_v38 = vand.u32 2147483647, %v434_v32  ;;  %vm443_vm12 = vweird.f32 %v434_v32 }
 0x539   :  { %v450_v42 = vor.u32 1.1754944e-38, %v449_v36  ;;  %vm448_vm15 = vcmp.eq.f32.partialorder %v447_v38, 8.507059e+37 }
 0x53d   :  { %v1242_v33 = vpop.eup %1241 }
 0x53e   :  { %v439_v34 = vmul.f32 %v1242_v33, %v434_v32  ;;  %v437_v35 = vpop.xlane.xlu2 %436  ;;  %vm444_vm10 = vweird.f32 %v1242_v33 }
 0x53f   :  { %1243 = vrcp.f32 %v437_v35  ;;  %vm445_vm14 = vmor %vm443_vm12, %vm444_vm10  ;;  %v464_v51 = vand.u32 2147483648, %v437_v35  ;;  %v462_v55 = vand.u32 2147483647, %v437_v35  ;;  %vm458_vm2 = vweird.f32 %v437_v35 }
 0x540   :  { %v440_v28 = vsub.f32 1.0, %v439_v34 }
 0x541   :  { %v465_v59 = vor.u32 1.1754944e-38, %v464_v51  ;;  %vm463_vm4 = vcmp.eq.f32.partialorder %v462_v55, 8.507059e+37  ;;  %v792_v55 = vld [vmem:[%s1875_s8 + $0x18] sm:$0xff] }
 0x542   :  { %v441_v37 = vmul.f32 %v1242_v33, %v440_v28 }
 0x544   :  { %v442_v39 = vadd.f32 %v1242_v33, %v441_v37 }
 0x545   :  { %v1244_v41 = vpop.eup %1243 }
 0x546   :  { %v454_v43 = vmul.f32 %v1244_v41, %v437_v35  ;;  %v650_v44 = vpop.permute.xlu2 %649  ;;  %v446_v46 = vsel %vm445_vm14, %v1242_v33, %v442_v39  ;;  %vm459_vm1 = vweird.f32 %v1244_v41 }
 0x547   :  { %1152 = vmatpush.xpose.msk.msra.mxu2 %vm253_vm11, %v650_v44  ;;  %v451_v47 = vsel %vm448_vm15, %v450_v42, %v446_v46  ;;  %vm460_vm3 = vmor %vm458_vm2, %vm459_vm1 }
 0x548   :  { %v455_v49 = vsub.f32 1.0, %v454_v43  ;;  %v452_v50 = vmul.f32 %v1238_v22, %v451_v47 }
 0x549   :  { %v646_v52 = vpop.permute.xlu0 %645 }
 0x54a   :  { %v456_v53 = vmul.f32 %v1244_v41, %v455_v49  ;;  %v468_v54 = vsel %vm1531_vm13, %v452_v50, 0.0 }
 0x54b   :  { %1143 = vmatmul.msk.f32.vlgmr.msrb.gmra.mxu2 %vm253_vm11, %v468_v54 }
 0x54c   :  { %v457_v58 = vadd.f32 %v1244_v41, %v456_v53 }
 0x54e   :  { %v522_v56 = vpop.permute.xlu2 %521  ;;  %v461_v60 = vsel %vm460_vm3, %v1244_v41, %v457_v58  ;;  %v791_v58 = vld [vmem:[%s1875_s8 + $0x10] sm:$0xff] }
 0x54f   :  { %1145 = vmatpush.xpose.msk.msra.mxu1 %vm253_vm11, %v522_v56  ;;  %v466_v61 = vsel %vm463_vm4, %v465_v59, %v461_v60  ;;  %v790_v60 = vld [vmem:[%s1875_s8 + $0x8] sm:$0xff] }
 0x550   :  { %v467_v62 = vmul.f32 %v1240_v25, %v466_v61  ;;  %v1200_v25 = vpack.i.bf16 %v1596_v31, %v1552_v6 }
 0x551   :  { %v520_v63 = vpop.permute.xlu0 %519 }
 0x552   :  { %v469_v0 = vsel %vm1531_vm13, %v467_v62, 0.0  ;;  %vm1626_vm13 = vcmp.eq.s32.totalorder %v556_v48, 1 }
 0x553   :  { %1144 = vmatmul.msk.f32.gmra.mxu2 %vm253_vm11, %v469_v0  ;;  %1146 = vmatpush.xpose.msk.msra.mxu1 %vm253_vm11, %v520_v63  ;;  %v789_v63 = vld [vmem:[%s1875_s8] sm:$0xff] }
 0x556   :  { %1147 = vmatmul.msk.f32.vlgmr.msra.gmra.mxu1 %vm253_vm11, %v1596_v31 }
 0x557   :  { %821 = vmatpush.msrb.mxu1 %v792_v55 }
 0x559   :  { %822 = vmatpush.msrb.mxu1 %v791_v58 }
 0x55b   :  { %1153 = vmatmul.msk.f32.vlgmr.msra.gmra.mxu2 %vm253_vm11, %v646_v52  ;;  %823 = vmatpush.msrb.mxu1 %v790_v60 }
 0x55d   :  { %824 = vmatpush.msrb.mxu1 %v789_v63 }
 0x55e   :  { %1148 = vmatmul.msk.f32.gmra.mxu1 %vm253_vm11, %v1552_v6 }
 0x563   :  { %1154 = vmatmul.msk.f32.gmra.mxu2 %vm253_vm11, %v648_v1 }
 0x5ce   :  { %v1623_v4 = vpop.f32.mrf.mxu2 }
 0x5d3   :  { %v548_v57 = vpop.f32.mrf.mxu1 }
 0x5d4   :  { %v554_v9 = vmul.f32 0.25, %v548_v57 }
 0x5d6   :  { %v502_v10 = vpop.f32.mrf.mxu2  ;;  %v558_v11 = vsel %vm1626_vm13, %v554_v9, -3.4028235e+38 }
 0x5d7   :  { %v560_v13 = vsel %vm253_vm11, %v558_v11, -inf }
 0x5d8   :  { %561 = vmax.xlane.f32.xlu0 %v560_v13 }
 0x5db   :  { %v551_v3 = vpop.f32.mrf.mxu1 }
 0x5dc   :  { %v555_v16 = vmul.f32 0.25, %v551_v3 }
 0x5de   :  { %v678_v15 = vpop.f32.mrf.mxu2  ;;  %v559_v21 = vsel %vm1626_vm13, %v555_v16, -3.4028235e+38 }
 0x5df   :  { %v684_v12 = vmul.f32 0.25, %v678_v15  ;;  %v563_v23 = vsel %vm253_vm11, %v559_v21, -inf }
 0x5e1   :  { %v686_v8 = vsel %vm1626_vm13, %v684_v12, -3.4028235e+38 }
 0x5e2   :  { %v688_v45 = vsel %vm253_vm11, %v686_v8, -inf }
 0x5e3   :  { %689 = vmax.xlane.f32.xlu1 %v688_v45 }
 0x5e6   :  { %v681_v19 = vpop.f32.mrf.mxu2 }
 0x5e7   :  { %v685_v20 = vmul.f32 0.25, %v681_v19 }
 0x5e9   :  { %v687_v22 = vsel %vm1626_vm13, %v685_v20, -3.4028235e+38 }
 0x5ea   :  { %v691_v24 = vsel %vm253_vm11, %v687_v22, -inf }
 0x5eb   :  { %564 = vmax.xlane.f32.xlu1 %v563_v23  ;;  %692 = vmax.xlane.f32.xlu2 %v691_v24 }
 0x604   :  { %1201 = vrot.lane.b32.xlu1 %v1200_v25, %s1300_s3 }
 0x60c   :  { %509 = vrot.lane.b32.xlu1 %v502_v10, %s1302_s29 }
 0x64b   :  { %v562_v26 = vpop.xlane.xlu0 %561 }
 0x64c   :  { %v566_v32 = vsub.f32 %v558_v11, %v562_v26 }
 0x64e   :  { %v568_v34 = vmul.f32 1.442695, %v566_v32 }
 0x656   :  { %v690_v29 = vpop.xlane.xlu1 %689 }
 0x657   :  { %v694_v30 = vsub.f32 %v686_v8, %v690_v29 }
 0x659   :  { %v696_v33 = vmul.f32 1.442695, %v694_v30 }
 0x65b   :  { %1245 = vpow2.f32 %v696_v33 }
 0x65c   :  { %1247 = vpow2.f32 %v568_v34 }
 0x65e   :  { %v693_v35 = vpop.xlane.xlu2 %692  ;;  %v565_v28 = vpop.xlane.xlu1 %564 }
 0x65f   :  { %v695_v36 = vsub.f32 %v687_v22, %v693_v35  ;;  %v567_v6 = vsub.f32 %v559_v21, %v565_v28 }
 0x661   :  { %v1646_v37 = vpop.eup %1245  ;;  %v698_v38 = vmul.f32 1.442695, %v695_v36  ;;  %v570_v39 = vmul.f32 1.442695, %v567_v6 }
 0x662   :  { %v700_v31 = vsel %vm253_vm11, %v1646_v37, 0.0  ;;  %v1650_v41 = vpop.eup %1247 }
 0x663   :  { %701 = vadd.xlane.f32.xlu2 %v700_v31  ;;  %1249 = vpow2.f32 %v698_v38  ;;  %v572_v43 = vsel %vm253_vm11, %v1650_v41, 0.0 }
 0x664   :  { %1251 = vpow2.f32 %v570_v39 }
 0x669   :  { %v1652_v42 = vpop.eup %1249 }
 0x66a   :  { %v703_v44 = vsel %vm253_vm11, %v1652_v42, 0.0  ;;  %v1658_v46 = vpop.eup %1251 }
 0x66b   :  { %573 = vadd.xlane.f32.xlu2 %v572_v43  ;;  %704 = vadd.xlane.f32.xlu0 %v703_v44  ;;  %v575_v47 = vsel %vm253_vm11, %v1658_v46, 0.0 }
 0x673   :  { %576 = vadd.xlane.f32.xlu0 %v575_v47 }
 0x676   :  { %v1202_v49 = vpop.permute.xlu1 %1201 }
 0x677   :  { %v1203_v50 = vunpack.i.l.bf16 %v1202_v49  ;;  %v1204_v51 = vunpack.i.h.bf16 %v1202_v49 }
 0x679   :  { %764 = vmatpush.msrb.mxu0 %v1203_v50 }
 0x67b   :  { %765 = vmatpush.msrb.mxu0 %v1204_v51 }
 0x67e   :  { %v510_v52 = vpop.permute.xlu1 %509 }
 0x67f   :  { %v514_v53 = vsel %vm253_vm11, %v1582_v5, %v510_v52 }
 0x680   :  { %516 = vst.msk [vmem:[#allocation2 + $0x8] sm:$0xff] %vm87_vm0, %v514_v53 }
 0x683   :  { %1206 = vrot.lane.b32.xlu2 %v1200_v25, %s1301_s13 }
 0x687   :  { %507 = vrot.lane.b32.xlu0 %v1623_v4, %s1302_s29  ;;  %v786_v60 = vld [vmem:[#allocation2 + $0x8] sm:$0xff] }
 0x6d6   :  { %v702_v54 = vpop.xlane.xlu2 %701 }
 0x6d7   :  { %1253 = vrcp.f32 %v702_v54  ;;  %v717_v0 = vand.u32 2147483648, %v702_v54  ;;  %v715_v4 = vand.u32 2147483647, %v702_v54  ;;  %vm711_vm6 = vweird.f32 %v702_v54 }
 0x6d9   :  { %v718_v9 = vor.u32 1.1754944e-38, %v717_v0  ;;  %vm716_vm8 = vcmp.eq.f32.partialorder %v715_v4, 8.507059e+37 }
 0x6dd   :  { %v1254_v59 = vpop.eup %1253 }
 0x6de   :  { %v707_v5 = vmul.f32 %v1254_v59, %v702_v54  ;;  %v574_v56 = vpop.xlane.xlu2 %573  ;;  %v705_v61 = vpop.xlane.xlu0 %704  ;;  %vm712_vm5 = vweird.f32 %v1254_v59 }
 0x6df   :  { %1255 = vrcp.f32 %v574_v56  ;;  %vm713_vm7 = vmor %vm711_vm6, %vm712_vm5  ;;  %v589_v20 = vand.u32 2147483648, %v574_v56  ;;  %v732_v23 = vand.u32 2147483648, %v705_v61  ;;  %v587_v25 = vand.u32 2147483647, %v574_v56 }
 0x6e0   :  { %v708_v62 = vsub.f32 1.0, %v707_v5  ;;  %1257 = vrcp.f32 %v705_v61  ;;  %v730_v30 = vand.u32 2147483647, %v705_v61  ;;  %vm583_vm12 = vweird.f32 %v574_v56 }
 0x6e1   :  { %vm726_vm14 = vweird.f32 %v705_v61  ;;  %v590_v33 = vor.u32 1.1754944e-38, %v589_v20  ;;  %v733_v28 = vor.u32 1.1754944e-38, %v732_v23  ;;  %vm588_vm1 = vcmp.eq.f32.partialorder %v587_v25, 8.507059e+37 }
 0x6e2   :  { %v709_v1 = vmul.f32 %v1254_v59, %v708_v62  ;;  %vm731_vm3 = vcmp.eq.f32.partialorder %v730_v30, 8.507059e+37 }
 0x6e4   :  { %v710_v48 = vadd.f32 %v1254_v59, %v709_v1 }
 0x6e5   :  { %v1256_v57 = vpop.eup %1255 }
 0x6e6   :  { %v1258_v10 = vpop.eup %1257  ;;  %v579_v11 = vmul.f32 %v1256_v57, %v574_v56  ;;  %v1207_v13 = vpop.permute.xlu2 %1206  ;;  %v714_v15 = vsel %vm713_vm7, %v1254_v59, %v710_v48  ;;  %vm584_vm9 = vweird.f32 %v1256_v57 }
 0x6e7   :  { %v722_v12 = vmul.f32 %v1258_v10, %v705_v61  ;;  %v577_v3 = vpop.xlane.xlu0 %576  ;;  %v1208_v8 = vunpack.i.l.bf16 %v1207_v13  ;;  %v719_v45 = vsel %vm716_vm8, %v718_v9, %v714_v15  ;;  %v1209_v21 = vunpack.i.h.bf16 %v1207_v13  ;;  %vm585_vm15 = vmor %vm583_vm12, %vm584_vm9 }
 0x6e8   :  { %v580_v16 = vsub.f32 1.0, %v579_v11  ;;  %1259 = vrcp.f32 %v577_v3  ;;  %v720_v22 = vmul.f32 %v1646_v37, %v719_v45  ;;  %vm727_vm10 = vweird.f32 %v1258_v10 }
 0x6e9   :  { %v723_v19 = vsub.f32 1.0, %v722_v12  ;;  %636 = vmatpush.msra.mxu3 %v1208_v8  ;;  %vm728_vm2 = vmor %vm726_vm14, %vm727_vm10  ;;  %v604_v47 = vand.u32 2147483648, %v577_v3  ;;  %v602_v52 = vand.u32 2147483647, %v577_v3  ;;  %vm598_vm5 = vweird.f32 %v577_v3 }
 0x6ea   :  { %v581_v24 = vmul.f32 %v1256_v57, %v580_v16  ;;  %v736_v29 = vsel %vm1626_vm13, %v720_v22, 0.0  ;;  %vm1011_vm14 = vcmask 523264  }
 0x6eb   :  { %v724_v26 = vmul.f32 %v1258_v10, %v723_v19  ;;  %637 = vmatpush.msra.mxu3 %v1209_v21  ;;  %1155 = vmatmul.msk.f32.vlgmr.msrb.gmra.mxu0 %vm253_vm11, %v736_v29  ;;  %v605_v53 = vor.u32 1.1754944e-38, %v604_v47  ;;  %vm603_vm7 = vcmp.eq.f32.partialorder %v602_v52, 8.507059e+37 }
 0x6ec   :  { %v582_v32 = vadd.f32 %v1256_v57, %v581_v24 }
 0x6ed   :  { %v725_v34 = vadd.f32 %v1258_v10, %v724_v26 }
 0x6ee   :  { %v1260_v35 = vpop.eup %1259  ;;  %v586_v36 = vsel %vm585_vm15, %v1256_v57, %v582_v32 }
 0x6ef   :  { %v594_v37 = vmul.f32 %v1260_v35, %v577_v3  ;;  %v591_v38 = vsel %vm588_vm1, %v590_v33, %v586_v36  ;;  %v729_v6 = vsel %vm728_vm2, %v1258_v10, %v725_v34  ;;  %vm599_vm4 = vweird.f32 %v1260_v35  ;;  %v949_v33 = vld [vmem:[%s1879_s12 + $0x18] sm:$0xff]  ;;  %v948_v34 = vld [vmem:[%s1879_s12 + $0x10] sm:$0xff] }
 0x6f0   :  { %v592_v31 = vmul.f32 %v1650_v41, %v591_v38  ;;  %v734_v39 = vsel %vm731_vm3, %v733_v28, %v729_v6  ;;  %vm600_vm6 = vmor %vm598_vm5, %vm599_vm4  ;;  %978 = vmatpush.msrb.mxu3 %v949_v33 }
 0x6f1   :  { %v595_v43 = vsub.f32 1.0, %v594_v37  ;;  %v735_v44 = vmul.f32 %v1652_v42, %v734_v39 }
 0x6f2   :  { %v608_v49 = vsel %vm1626_vm13, %v592_v31, 0.0  ;;  %979 = vmatpush.msrb.mxu3 %v948_v34 }
 0x6f3   :  { %v596_v50 = vmul.f32 %v1260_v35, %v595_v43  ;;  %1149 = vmatmul.msk.f32.vlgmr.msra.gmra.mxu3 %vm253_vm11, %v608_v49  ;;  %v737_v51 = vsel %vm1626_vm13, %v735_v44, 0.0 }
 0x6f4   :  { %1156 = vmatmul.msk.f32.gmra.mxu0 %vm253_vm11, %v737_v51 }
 0x6f5   :  { %v597_v41 = vadd.f32 %v1260_v35, %v596_v50  ;;  %v1758_v50 = vld [vmem:[%s1877_s10] ss:$0 sm:$0xff] }
 0x6f7   :  { %v601_v54 = vsel %vm600_vm6, %v1260_v35, %v597_v41  ;;  %v947_v35 = vld [vmem:[%s1879_s12 + $0x8] sm:$0xff]  ;;  %v1763_v41 = vld [vmem:[%s1878_s11] ss:$0 sm:$0xff]  ;;  %vm1106_vm6 = vcmask 654336  }
 0x6f8   :  { %v606_v42 = vsel %vm603_vm7, %v605_v53, %v601_v54  ;;  %980 = vmatpush.msrb.mxu3 %v947_v35 }
 0x6f9   :  { %v607_v55 = vmul.f32 %v1658_v46, %v606_v42  ;;  %v508_v58 = vpop.permute.xlu0 %507 }
 0x6fa   :  { %v513_v59 = vsel %vm253_vm11, %v1621_v2, %v508_v58  ;;  %v1213_v2 = vld [vmem:[%s1876_s9] ss:$0 sm:$0xff] }
 0x6fb   :  { %v609_v5 = vsel %vm1626_vm13, %v607_v55, 0.0  ;;  %515 = vst.msk [vmem:[#allocation2] sm:$0xff] %vm87_vm0, %v513_v59 }
 0x6fc   :  { %1150 = vmatmul.msk.f32.gmra.mxu3 %vm253_vm11, %v609_v5  ;;  %v1006_v5 = vld [vmem:[%s1881_s14 + $0x38] sm:$0xff] }
 0x6fd   :  { %1032 = vmatpush.msrb.mxu2 %v1006_v5 }
 0x702   :  { %v785_v56 = vld [vmem:[#allocation2] sm:$0xff] }
 0x703   :  { %1157 = vmatmul.msk.f32.vlgmr.msrb.gmra.mxu1 %vm87_vm0, %v785_v56  ;;  %v1005_v56 = vld [vmem:[%s1881_s14 + $0x30] sm:$0xff] }
 0x704   :  { %1033 = vmatpush.msrb.mxu2 %v1005_v56  ;;  %v1058_v56 = vld [vmem:[%s1883_s16 + $0x8] sm:$0xff] }
 0x70b   :  { %1158 = vmatmul.msk.f32.gmra.mxu1 %vm87_vm0, %v786_v60 }
 0x768   :  { %v767_v61 = vpop.f32.mrf.mxu0 }
 0x769   :  { %775 = vrot.lane.b32.xlu1 %v767_v61, %s1302_s29  ;;  %v1004_v61 = vld [vmem:[%s1881_s14 + $0x28] sm:$0xff] }
 0x76a   :  { %1034 = vmatpush.msrb.mxu2 %v1004_v61 }
 0x771   :  { %v770_v46 = vpop.f32.mrf.mxu0 }
 0x772   :  { %777 = vrot.lane.b32.xlu0 %v770_v46, %s1302_s29 }
 0x776   :  { %v639_v9 = vpop.f32.mrf.mxu3 }
 0x780   :  { %v826_v7 = vpop.f32.mrf.mxu1 }
 0x781   :  { %v827_v62 = vadd.f32 %v1213_v2, %v826_v7 }
 0x783   :  { %v1707_v63 = vadd.f32 %v827_v62, %v1428_v14  ;;  %v642_v14 = vpop.f32.mrf.mxu3 }
 0x785   :  { %v844_v0 = vsel %vm87_vm0, %v1707_v63, 0.0 }
 0x786   :  { %845 = vadd.xlane.f32.xlu2 %v844_v0  ;;  %v1003_v0 = vld [vmem:[%s1881_s14 + $0x20] sm:$0xff] }
 0x787   :  { %1035 = vmatpush.msrb.mxu2 %v1003_v0 }
 0x788   :  { %v829_v1 = vpop.f32.mrf.mxu1 }
 0x789   :  { %v830_v4 = vadd.f32 %v1213_v2, %v829_v1 }
 0x78b   :  { %v1712_v48 = vadd.f32 %v830_v4, %v1434_v18 }
 0x78d   :  { %v847_v57 = vsel %vm87_vm0, %v1712_v48, 0.0 }
 0x793   :  { %848 = vadd.xlane.f32.xlu1 %v847_v57  ;;  %v1002_v57 = vld [vmem:[%s1881_s14 + $0x18] sm:$0xff] }
 0x794   :  { %1036 = vmatpush.msrb.mxu2 %v1002_v57 }
 0x7db   :  { %v776_v10 = vpop.permute.xlu1 %775 }
 0x7dc   :  { %v781_v11 = vsel %vm253_vm11, %v639_v9, %v776_v10 }
 0x7dd   :  { %783 = vst.msk [vmem:[#allocation2 + $0x10] sm:$0xff] %vm87_vm0, %v781_v11 }
 0x7e4   :  { %v778_v13 = vpop.permute.xlu0 %777  ;;  %v787_v12 = vld [vmem:[#allocation2 + $0x10] sm:$0xff] }
 0x7e5   :  { %v782_v15 = vsel %vm253_vm11, %v642_v14, %v778_v13  ;;  %1159 = vmatmul.msk.f32.gmra.mxu1 %vm87_vm0, %v787_v12 }
 0x7e6   :  { %784 = vst.msk [vmem:[#allocation2 + $0x18] sm:$0xff] %vm87_vm0, %v782_v15 }
 0x7ed   :  { %v788_v18 = vld [vmem:[#allocation2 + $0x18] sm:$0xff] }
 0x7ee   :  { %1160 = vmatmul.msk.f32.gmra.mxu1 %vm87_vm0, %v788_v18  ;;  %v1001_v18 = vld [vmem:[%s1881_s14 + $0x10] sm:$0xff] }
 0x7ef   :  { %1037 = vmatpush.msrb.mxu2 %v1001_v18 }
 0x7f9   :  { %v846_v3 = vpop.xlane.xlu2 %845 }
 0x7fa   :  { %v856_v8 = vmul.f32 %v846_v3, %v1440_v27 }
 0x7fc   :  { %v860_v45 = vsub.f32 %v1707_v63, %v856_v8  ;;  %v1000_v8 = vld [vmem:[%s1881_s14 + $0x8] sm:$0xff] }
 0x7fd   :  { %1038 = vmatpush.msrb.mxu2 %v1000_v8 }
 0x7fe   :  { %v864_v16 = vmul.f32 %v860_v45, %v860_v45 }
 0x800   :  { %v868_v19 = vsel %vm87_vm0, %v864_v16, 0.0 }
 0x801   :  { %869 = vadd.xlane.f32.xlu1 %v868_v19 }
 0x806   :  { %v849_v20 = vpop.xlane.xlu1 %848 }
 0x807   :  { %v857_v22 = vmul.f32 %v849_v20, %v1440_v27 }
 0x809   :  { %v1730_v25 = vsub.f32 %v1712_v48, %v857_v22  ;;  %v1814_v22 = vld [vmem:[%s1900_s22] ss:$0 sm:$0xff] }
 0x80b   :  { %v865_v32 = vmul.f32 %v1730_v25, %v1730_v25 }
 0x80d   :  { %v871_v28 = vsel %vm87_vm0, %v865_v32, 0.0 }
 0x862   :  { %v832_v21 = vpop.f32.mrf.mxu1 }
 0x863   :  { %v833_v23 = vadd.f32 %v1213_v2, %v832_v21 }
 0x865   :  { %v1727_v24 = vadd.f32 %v833_v23, %v1521_v40 }
 0x867   :  { %v850_v26 = vsel %vm87_vm0, %v1727_v24, 0.0 }
 0x868   :  { %851 = vadd.xlane.f32.xlu0 %v850_v26 }
 0x86b   :  { %v835_v29 = vpop.f32.mrf.mxu1 }
 0x86c   :  { %v836_v30 = vadd.f32 %v1213_v2, %v835_v29 }
 0x86e   :  { %v1740_v40 = vadd.f32 %v836_v30, %v1432_v17  ;;  %v946_v17 = vld [vmem:[%s1879_s12] sm:$0xff] }
 0x86f   :  { %981 = vmatpush.msrb.mxu3 %v946_v17 }
 0x870   :  { %v853_v36 = vsel %vm87_vm0, %v1740_v40, 0.0  ;;  %872 = vadd.xlane.f32.xlu0 %v871_v28 }
 0x871   :  { %854 = vadd.xlane.f32.xlu2 %v853_v36 }
 0x874   :  { %v870_v37 = vpop.xlane.xlu1 %869 }
 0x875   :  { %v880_v38 = vmul.f32 %v870_v37, %v1440_v27 }
 0x877   :  { %v884_v6 = vadd.f32 1e-12, %v880_v38 }
 0x879   :  { %1261 = vrsqrt.f32 %v884_v6  ;;  %vm894_vm13 = vweird.f32 %v884_v6 }
 0x87f   :  { %v1262_v31 = vpop.eup %1261 }
 0x880   :  { %v889_v39 = vmul.f32 %v1262_v31, %v884_v6  ;;  %vm895_vm11 = vweird.f32 %v1262_v31  ;;  %v1060_v6 = vld [vmem:[%s1883_s16 + $0x18] sm:$0xff] }
 0x881   :  { %vm896_vm8 = vmor %vm894_vm13, %vm895_vm11  ;;  %1089 = vmatpush.msra.mxu0 %v1060_v6 }
 0x882   :  { %v890_v43 = vmul.f32 %v1262_v31, %v889_v39 }
 0x884   :  { %v891_v44 = vmul.f32 0.5, %v890_v43 }
 0x886   :  { %v892_v47 = vsub.f32 1.5, %v891_v44 }
 0x888   :  { %v893_v49 = vmul.f32 %v1262_v31, %v892_v47 }
 0x88a   :  { %v897_v51 = vsel %vm896_vm8, %v1262_v31, %v893_v49 }
 0x88b   :  { %v928_v52 = vmul.f32 %v897_v51, %v860_v45  ;;  %v999_v45 = vld [vmem:[%s1881_s14] sm:$0xff] }
 0x88c   :  { %1039 = vmatpush.msrb.mxu2 %v999_v45 }
 0x88d   :  { %v935_v53 = vmul.f32 %v1758_v50, %v928_v52 }
 0x88f   :  { %v942_v54 = vadd.f32 %v1763_v41, %v935_v53 }
 0x891   :  { %1161 = vmatmul.msk.f32.vlgmr.msrb.gmra.mxu3 %vm87_vm0, %v942_v54 }
 0x8db   :  { %v852_v42 = vpop.xlane.xlu0 %851 }
 0x8dc   :  { %v858_v55 = vmul.f32 %v852_v42, %v1440_v27 }
 0x8de   :  { %v1770_v58 = vsub.f32 %v1727_v24, %v858_v55 }
 0x8e0   :  { %v866_v59 = vmul.f32 %v1770_v58, %v1770_v58 }
 0x8e2   :  { %v874_v60 = vsel %vm87_vm0, %v866_v59, 0.0 }
 0x8e3   :  { %v873_v46 = vpop.xlane.xlu0 %872  ;;  %875 = vadd.xlane.f32.xlu2 %v874_v60  ;;  %v1057_v60 = vld [vmem:[%s1883_s16] sm:$0xff] }
 0x8e4   :  { %v855_v2 = vpop.xlane.xlu2 %854  ;;  %v881_v7 = vmul.f32 %v873_v46, %v1440_v27  ;;  %v1217_v46 = vld [vmem:[%s1882_s15] ss:$0 sm:$0xff] }
 0x8e5   :  { %v859_v62 = vmul.f32 %v855_v2, %v1440_v27 }
 0x8e6   :  { %v885_v1 = vadd.f32 1e-12, %v881_v7 }
 0x8e7   :  { %v1790_v4 = vsub.f32 %v1740_v40, %v859_v62 }
 0x8e8   :  { %1263 = vrsqrt.f32 %v885_v1  ;;  %vm904_vm10 = vweird.f32 %v885_v1 }
 0x8e9   :  { %v867_v9 = vmul.f32 %v1790_v4, %v1790_v4 }
 0x8eb   :  { %v877_v10 = vsel %vm87_vm0, %v867_v9, 0.0 }
 0x8ec   :  { %878 = vadd.xlane.f32.xlu1 %v877_v10 }
 0x8ee   :  { %v1264_v11 = vpop.eup %1263 }
 0x8ef   :  { %v899_v14 = vmul.f32 %v1264_v11, %v885_v1  ;;  %vm905_vm9 = vweird.f32 %v1264_v11 }
 0x8f0   :  { %vm906_vm12 = vmor %vm904_vm10, %vm905_vm9 }
 0x8f1   :  { %v900_v13 = vmul.f32 %v1264_v11, %v899_v14 }
 0x8f3   :  { %v901_v15 = vmul.f32 0.5, %v900_v13 }
 0x8f5   :  { %v902_v12 = vsub.f32 1.5, %v901_v15 }
 0x8f7   :  { %v903_v3 = vmul.f32 %v1264_v11, %v902_v12 }
 0x8f9   :  { %v907_v16 = vsel %vm906_vm12, %v1264_v11, %v903_v3 }
 0x8fa   :  { %v929_v19 = vmul.f32 %v907_v16, %v1730_v25 }
 0x8fc   :  { %v936_v20 = vmul.f32 %v1758_v50, %v929_v19 }
 0x8fe   :  { %v943_v21 = vadd.f32 %v1763_v41, %v936_v20 }
 0x900   :  { %1162 = vmatmul.msk.f32.gmra.mxu3 %vm87_vm0, %v943_v21 }
 0x914   :  { %v983_v23 = vpop.f32.mrf.mxu3 }
 0x915   :  { %v984_v26 = vadd.f32 %v1814_v22, %v983_v23 }
 0x917   :  { %v995_v29 = vmax.f32 %v984_v26, 0.0 }
 0x919   :  { %1165 = vmatmul.msk.f32.vlgmr.msrb.gmra.mxu2 %vm1011_vm14, %v995_v29 }
 0x956   :  { %v876_v25 = vpop.xlane.xlu2 %875 }
 0x957   :  { %v882_v30 = vmul.f32 %v876_v25, %v1440_v27 }
 0x959   :  { %v886_v32 = vadd.f32 1e-12, %v882_v30 }
 0x95b   :  { %1265 = vrsqrt.f32 %v886_v32  ;;  %vm914_vm1 = vweird.f32 %v886_v32 }
 0x95f   :  { %v879_v33 = vpop.xlane.xlu1 %878 }
 0x960   :  { %v883_v34 = vmul.f32 %v879_v33, %v1440_v27 }
 0x961   :  { %v1266_v35 = vpop.eup %1265 }
 0x962   :  { %v887_v28 = vadd.f32 1e-12, %v883_v34  ;;  %v909_v36 = vmul.f32 %v1266_v35, %v886_v32  ;;  %vm915_vm15 = vweird.f32 %v1266_v35 }
 0x963   :  { %vm916_vm2 = vmor %vm914_vm1, %vm915_vm15 }
 0x964   :  { %1267 = vrsqrt.f32 %v887_v28  ;;  %v910_v17 = vmul.f32 %v1266_v35, %v909_v36  ;;  %vm924_vm4 = vweird.f32 %v887_v28 }
 0x966   :  { %v911_v37 = vmul.f32 0.5, %v910_v17 }
 0x968   :  { %v912_v38 = vsub.f32 1.5, %v911_v37 }
 0x96a   :  { %v1268_v31 = vpop.eup %1267  ;;  %v913_v39 = vmul.f32 %v1266_v35, %v912_v38 }
 0x96b   :  { %v919_v43 = vmul.f32 %v1268_v31, %v887_v28  ;;  %vm925_vm3 = vweird.f32 %v1268_v31 }
 0x96c   :  { %v917_v44 = vsel %vm916_vm2, %v1266_v35, %v913_v39  ;;  %vm926_vm5 = vmor %vm924_vm4, %vm925_vm3 }
 0x96d   :  { %v920_v27 = vmul.f32 %v1268_v31, %v919_v43  ;;  %v930_v47 = vmul.f32 %v917_v44, %v1770_v58  ;;  %v1059_v58 = vld [vmem:[%s1883_s16 + $0x10] sm:$0xff] }
 0x96e   :  { %1090 = vmatpush.msra.mxu0 %v1059_v58 }
 0x96f   :  { %v921_v49 = vmul.f32 0.5, %v920_v27  ;;  %v937_v51 = vmul.f32 %v1758_v50, %v930_v47 }
 0x970   :  { %1091 = vmatpush.msra.mxu0 %v1058_v56 }
 0x971   :  { %v922_v52 = vsub.f32 1.5, %v921_v49  ;;  %v944_v53 = vadd.f32 %v1763_v41, %v937_v51 }
 0x972   :  { %1092 = vmatpush.msra.mxu0 %v1057_v60 }
 0x973   :  { %v923_v54 = vmul.f32 %v1268_v31, %v922_v52  ;;  %1163 = vmatmul.msk.f32.gmra.mxu3 %vm87_vm0, %v944_v53 }
 0x975   :  { %v927_v42 = vsel %vm926_vm5, %v1268_v31, %v923_v54 }
 0x976   :  { %v931_v55 = vmul.f32 %v927_v42, %v1790_v4 }
 0x978   :  { %v938_v59 = vmul.f32 %v1758_v50, %v931_v55 }
 0x97a   :  { %v945_v5 = vadd.f32 %v1763_v41, %v938_v59 }
 0x97c   :  { %1164 = vmatmul.msk.f32.gmra.mxu3 %vm87_vm0, %v945_v5 }
 0x983   :  { %v986_v50 = vpop.f32.mrf.mxu3 }
 0x984   :  { %v987_v41 = vadd.f32 %v1814_v22, %v986_v50 }
 0x986   :  { %v996_v61 = vmax.f32 %v987_v41, 0.0 }
 0x988   :  { %1166 = vmatmul.msk.f32.gmra.mxu2 %vm1011_vm14, %v996_v61 }
 0x99c   :  { %v1041_v2 = vpop.f32.mrf.mxu2 }
 0x99d   :  { %v1042_v7 = vadd.f32 %v1217_v46, %v1041_v2 }
 0x99f   :  { %v1053_v62 = vadd.f32 %v1042_v7, %v1707_v63  ;;  %v1218_v63 = vld [vmem:[%s1884_s17] ss:$0 sm:$0xff]  ;;  %s1303_s17 = smov [#allocation3]  }
 0x9a0   :  { %s1115_s11 = sshll.u32 %s1303_s17, 4  ;;  %s1116_s11 = int_to_ptr.vmem [resolvable:$true] %s1115_s11 }
 0x9a1   :  { %1169 = vmatmul.msk.f32.vlgmr.msra.gmra.mxu0 %vm87_vm0, %v1053_v62 }
 0x9f6   :  { %v989_v0 = vpop.f32.mrf.mxu3 }
 0x9f7   :  { %v990_v1 = vadd.f32 %v1814_v22, %v989_v0 }
 0x9f9   :  { %v997_v4 = vmax.f32 %v990_v1, 0.0 }
 0x9fb   :  { %1167 = vmatmul.msk.f32.gmra.mxu2 %vm1011_vm14, %v997_v4 }
 0x9ff   :  { %v992_v57 = vpop.f32.mrf.mxu3 }
 0xa00   :  { %v993_v9 = vadd.f32 %v1814_v22, %v992_v57 }
 0xa02   :  { %v998_v10 = vmax.f32 %v993_v9, 0.0 }
 0xa04   :  { %1168 = vmatmul.msk.f32.gmra.mxu2 %vm1011_vm14, %v998_v10 }
 0xa0b   :  { %v1044_v11 = vpop.f32.mrf.mxu2 }
 0xa0c   :  { %v1045_v14 = vadd.f32 %v1217_v46, %v1044_v11 }
 0xa0e   :  { %v1054_v13 = vadd.f32 %v1045_v14, %v1712_v48 }
 0xa10   :  { %1170 = vmatmul.msk.f32.gmra.mxu0 %vm87_vm0, %v1054_v13 }
 0xa1e   :  { %v1094_v15 = vpop.f32.mrf.mxu0 }
 0xa1f   :  { %v1095_v12 = vadd.f32 %v1218_v63, %v1094_v15 }
 0xa21   :  { %1107 = vst.msk [vmem:[#allocation3] sm:$0xff] %vm1106_vm6, %v1095_v12 }
 0xa7e   :  { %v1047_v18 = vpop.f32.mrf.mxu2 }
 0xa7f   :  { %v1048_v3 = vadd.f32 %v1217_v46, %v1047_v18 }
 0xa81   :  { %v1055_v8 = vadd.f32 %v1048_v3, %v1727_v24 }
 0xa83   :  { %1171 = vmatmul.msk.f32.gmra.mxu0 %vm87_vm0, %v1055_v8 }
 0xa87   :  { %v1050_v45 = vpop.f32.mrf.mxu2 }
 0xa88   :  { %v1051_v16 = vadd.f32 %v1217_v46, %v1050_v45 }
 0xa8a   :  { %v1056_v48 = vadd.f32 %v1051_v16, %v1740_v40 }
 0xa8c   :  { %1172 = vmatmul.msk.f32.gmra.mxu0 %vm87_vm0, %v1056_v48 }
 0xa8d   :  { %v1097_v19 = vpop.f32.mrf.mxu0 }
 0xa8e   :  { %v1098_v20 = vadd.f32 %v1218_v63, %v1097_v19 }
 0xa90   :  { %1108 = vst.msk [vmem:[#allocation3 + $0x8] sm:$0xff] %vm1106_vm6, %v1098_v20 }
 0xb00   :  { %v1100_v21 = vpop.f32.mrf.mxu0 }
 0xb01   :  { %v1101_v22 = vadd.f32 %v1218_v63, %v1100_v21 }
 0xb03   :  { %1109 = vst.msk [vmem:[#allocation3 + $0x10] sm:$0xff] %vm1106_vm6, %v1101_v22 }
 0xb09   :  { %v1103_v24 = vpop.f32.mrf.mxu0 }
 0xb0a   :  { %v1104_v40 = vadd.f32 %v1218_v63, %v1103_v24 }
 0xb0c   :  { %1110 = vst.msk [vmem:[#allocation3 + $0x18] sm:$0xff] %vm1106_vm6, %v1104_v40 }
 0xb0d   :  { %1123 = dma.vmem_to_hbm [thread:$0]  %s1116_s11, 512, %s1118_s6, [#allocation4], %s1304_s27, %s1304_s27, %s1305_s28  }
 0xb0e   :  { %1293 = dma.done.wait [#allocation4], 512  }
 0xb0f   :  { %1294 = vsyncadd [#allocation4], 4294966784 }
 0xb10   :  { %1128 = vsyncpa [#allocation4], 1 }

// kernel: audio_decoder_forward.2
= control target key start
LH: loop header
LB: loop body
LE: loop exit
PB: predicated region body
PF: predicated region fallthrough
CT: control target
= control target key end

     0   :  { %s1555_s0 = inlined_call_operand.hbm [shape: f32[16,32], index: 0, kind: input, shape index: {}]   ;;  %s1556_s1 = inlined_call_operand.vmem [shape: f32[16,1], index: 1, kind: input, shape index: {}]   ;;  %s1557_s2 = inlined_call_operand.vmem [shape: f32[16,32], index: 2, kind: input, shape index: {}]   ;;  %s1558_s3 = inlined_call_operand.vmem [shape: f32[2,8], index: 3, kind: input, shape index: {}]   ;;  %s1559_s4 = inlined_call_operand.vmem [shape: f32[1,32], index: 4, kind: input, shape index: {}, may-alias: {4,10}]   ;;  %s1560_s5 = inlined_call_operand.vmem [shape: f32[1,32], index: 5, kind: input, shape index: {}, may-alias: {5,9,11,15,20}]   ;;  %s1561_s6 = inlined_call_operand.vmem [shape: f32[32,96], index: 6, kind: input, shape index: {}]   ;;  %s1562_s7 = inlined_call_operand.vmem [shape: f32[1,96], index: 7, kind: input, shape index: {}]   ;;  %s1563_s8 = inlined_call_operand.hbm [shape: f32[32,32], index: 8, kind: input, shape index: {}]   ;;  %s1564_s9 = inlined_call_operand.vmem [shape: f32[1,32], index: 9, kind: input, shape index: {}, may-alias: {5,9,11,15,20}]   ;;  %s1565_s10 = inlined_call_operand.vmem [shape: f32[1,32], index: 10, kind: input, shape index: {}, may-alias: {4,10}]   ;;  %s1566_s11 = inlined_call_operand.vmem [shape: f32[1,32], index: 11, kind: input, shape index: {}, may-alias: {5,9,11,15,20}]   ;;  %s1567_s12 = inlined_call_operand.hbm [shape: f32[32,64], index: 12, kind: input, shape index: {}]   ;;  %s1568_s13 = inlined_call_operand.vmem [shape: f32[1,64], index: 13, kind: input, shape index: {}]   ;;  %s1569_s14 = inlined_call_operand.vmem [shape: f32[64,32], index: 14, kind: input, shape index: {}]   ;;  %s1570_s15 = inlined_call_operand.vmem [shape: f32[1,32], index: 15, kind: input, shape index: {}, may-alias: {5,9,11,15,20}]   ;;  %s1571_s16 = inlined_call_operand.vmem [shape: f32[32,32], index: 16, kind: input, shape index: {}]   ;;  %s1572_s17 = inlined_call_operand.vmem [shape: f32[32,32], index: 17, kind: input, shape index: {}]   ;;  %s1573_s18 = inlined_call_operand.vmem [shape: f32[32,32], index: 18, kind: input, shape index: {}]   ;;  %s1574_s19 = inlined_call_operand.vmem [shape: f32[32,32], index: 19, kind: input, shape index: {}]   ;;  %s1575_s20 = inlined_call_operand.vmem [shape: f32[1,32], index: 20, kind: input, shape index: {}, may-alias: {5,9,11,15,20}]   ;;  %s1576_s21 = inlined_call_operand.vmem [shape: f32[16,16], index: 21, kind: input, shape index: {}]   ;;  %s1577_s22 = inlined_call_operand.vmem [shape: f32[16,16], index: 22, kind: input, shape index: {}]   ;;  %s1578_s23 = inlined_call_operand.vmem [shape: f32[16,64], index: 23, kind: output, shape index: {}]  }
   0x1   :  { %1583 = sst [smem:[#allocation10_spill]] %s1555_s0 }
   0x2   :  { %1584 = sst [smem:[#allocation11_spill]] %s1556_s1 }
   0x3   :  { %1585 = sst [smem:[#allocation12_spill]] %s1557_s2 }
   0x4   :  { %1586 = sst [smem:[#allocation13_spill]] %s1558_s3 }
   0x5   :  { %1587 = sst [smem:[#allocation14_spill]] %s1559_s4 }
   0x6   :  { %1588 = sst [smem:[#allocation15_spill]] %s1560_s5 }
   0x7   :  { %1589 = sst [smem:[#allocation16_spill]] %s1561_s6 }
   0x8   :  { %1590 = sst [smem:[#allocation17_spill]] %s1562_s7 }
   0x9   :  { %1591 = sst [smem:[#allocation18_spill]] %s1578_s23 }
   0xa   :  { %28 = vsyncpa [#allocation4], 0 }
   0xb   :  { %29 = vsyncpa [#allocation6], 0  ;;  %s61_s24 = sshll.u32 %s1563_s8, 4  ;;  %s1128_s25 = smov [#allocation5]   ;;  %s62_s24 = int_to_ptr.hbm [resolvable:$true] %s61_s24 }
   0xc   :  { %s63_s5 = sshll.u32 %s1128_s25, 4  ;;  %s1592_s2 = sld [smem:[#allocation10_spill]]  ;;  %s64_s5 = int_to_ptr.vmem [resolvable:$true] %s63_s5 }
   0xd   :  { %s1129_s27 = smov 128   ;;  %s1130_s7 = smov 8  }
   0xe   :  { %69 = dma.hbm_to_vmem [thread:$0]  %s62_s24, 512, %s64_s5, [#allocation6], %s1129_s27, %s1129_s27, %s1130_s7  }
   0xf   :  { %s1131_s28 = smov [#allocation3]   ;;  %s80_s23 = sshll.u32 %s1567_s12, 4  ;;  %s81_s23 = int_to_ptr.hbm [resolvable:$true] %s80_s23 }
  0x10   :  { %s36_s29 = sshll.u32 %s1131_s28, 4  ;;  %s1132_s8 = smov [#allocation7]   ;;  %s37_s29 = int_to_ptr.vmem [resolvable:$true] %s36_s29 }
  0x11   :  { %s82_s4 = sshll.u32 %s1132_s8, 4  ;;  %s83_s4 = int_to_ptr.vmem [resolvable:$true] %s82_s4 }
  0x12   :  { %s34_s6 = sshll.u32 %s1592_s2, 4  ;;  %s35_s6 = int_to_ptr.hbm [resolvable:$true] %s34_s6 }
  0x13   :  { %42 = dma.hbm_to_vmem [thread:$0]  %s35_s6, 256, %s37_s29, [#allocation4], %s1129_s27, %s1129_s27, %s1130_s7  }
  0x14   :  { %88 = dma.hbm_to_vmem [thread:$0]  %s81_s23, 512, %s83_s4, [#allocation6], %s1129_s27, %s1129_s27, %s1130_s7  }
  0x15   :  { %1124 = dma.done.wait [#allocation4], 256  }
  0x16   :  { %1125 = vsyncadd [#allocation4], 4294967040 }
  0x17   :  { %1126 = dma.done.wait [#allocation6], 1024  }
  0x18   :  { %1127 = vsyncadd [#allocation6], 4294966272  ;;  %v1133_v0 = vmov 0   ;;  %s1593_s25 = sld [smem:[#allocation11_spill]]  ;;  %v121_v2 = vld [vmem:[#allocation3] sm:$0xff]  ;;  %vm146_vm0 = vcmask 261120  }
  0x19   :  { %1015 = vset.pattern.permute.xlu0 %v1133_v0  ;;  %1016 = vset.pattern.permute.xlu1 %v1133_v0  ;;  %s1594_s23 = sld [smem:[#allocation12_spill]]  ;;  %v1134_v9 = vmov 32.0   ;;  %v122_v37 = vld [vmem:[#allocation3 + $0x8] sm:$0xff]  ;;  %s1136_s7 = smov 80   ;;  %vm249_vm5 = vcmask 130048   ;;  %vm279_vm11 = vcmask 64512  }
  0x1a   :  { %1026 = vrcp.f32 %v1134_v9  ;;  %s1595_s27 = sld [smem:[#allocation16_spill]]  ;;  %s1137_s28 = smov 96  }
  0x1b   :  { %s1596_s24 = sld [smem:[#allocation14_spill]]  ;;  %s1138_s29 = smov 112  }
  0x1c   :  { %s1597_s5 = sld [smem:[#allocation15_spill]]  ;;  %s1139_s4 = smov 48  }
  0x1d   :  { %s1599_s8 = sld [smem:[#allocation13_spill]]  ;;  %s1140_s30 = smov 16  }
  0x1e   :  { %v123_v1 = vld [vmem:[%s1593_s25] sm:$0xff]  ;;  %v124_v21 = vld [vmem:[%s1593_s25 + $0x8] sm:$0xff]  ;;  %s1604_s0 = sld [smem:[#allocation18_spill]] }
  0x1f   :  { %127 = vperm.xlu0 %1015, %v123_v1   ;;  %v139_v5 = vld [vmem:[%s1594_s23] sm:$0xff]  ;;  %v140_v43 = vld [vmem:[%s1594_s23 + $0x8] sm:$0xff]  ;;  %s1135_s23 = smov 64  }
  0x20   :  { %v1027_v10 = vpop.eup %1026  ;;  %v211_v22 = vld [vmem:[%s1595_s27 + $0x18] sm:$0xff]  ;;  %v210_v23 = vld [vmem:[%s1595_s27 + $0x10] sm:$0xff]  ;;  %v209_v24 = vld [vmem:[%s1595_s27 + $0x8] sm:$0xff] }
  0x21   :  { %v154_v11 = vmul.f32 32.0, %v1027_v10  ;;  %vm158_vm1 = vweird.f32 %v1027_v10  ;;  %234 = vmatpush.msra.mxu0 %v211_v22  ;;  %v208_v25 = vld [vmem:[%s1595_s27] sm:$0xff]  ;;  %s1598_s27 = sld [smem:[#allocation17_spill]] }
  0x22   :  { %v1017_v35 = vld [vmem:[%s1596_s24] ss:$0 sm:$0xff] }
  0x23   :  { %v155_v12 = vsub.f32 1.0, %v154_v11  ;;  %235 = vmatpush.msra.mxu0 %v210_v23  ;;  %v1018_v39 = vld [vmem:[%s1597_s5] ss:$0 sm:$0xff] }
  0x24   :  { %v143_v11 = vld [vmem:[%s1599_s8] sm:$0x3] }
  0x25   :  { %v156_v13 = vmul.f32 %v1027_v10, %v155_v12  ;;  %236 = vmatpush.msra.mxu0 %v209_v24  ;;  %vm245_vm9 = vcmp.gt.f32.partialorder %v143_v11, 0.5 }
  0x26   :  { %v1338_v12 = vsel %vm245_vm9, 1, %v1133_v0 }
  0x27   :  { %v157_v14 = vadd.f32 %v1027_v10, %v156_v13  ;;  %237 = vmatpush.msra.mxu0 %v208_v25  ;;  %v1019_v51 = vld [vmem:[%s1598_s27] ss:$0 sm:$0xff]  ;;  %v276_v13 = vperm.slane %v1338_v12, 0 }
  0x29   :  { %v1283_v15 = vsel %vm158_vm1, %v1027_v10, %v157_v14  ;;  %vm1341_vm10 = vcmp.eq.s32.totalorder %v276_v13, 1 }
  0x91   :  { %v128_v3 = vpop.permute.xlu0 %127 }
  0x92   :  { %v135_v4 = vmul.f32 %v128_v3, %v121_v2 }
  0x94   :  { %v137_v6 = vmul.f32 5.656854, %v135_v4 }
  0x96   :  { %v1279_v7 = vadd.f32 %v139_v5, %v137_v6 }
  0x98   :  { %v147_v8 = vsel %vm146_vm0, %v1279_v7, 0.0 }
  0x99   :  { %148 = vadd.xlane.f32.xlu0 %v147_v8 }
 0x10c   :  { %v149_v16 = vpop.xlane.xlu0 %148 }
 0x10d   :  { %v160_v17 = vmul.f32 %v1283_v15, %v149_v16 }
 0x10f   :  { %v162_v18 = vsub.f32 %v1279_v7, %v160_v17 }
 0x111   :  { %v164_v19 = vmul.f32 %v162_v18, %v162_v18 }
 0x113   :  { %v166_v20 = vsel %vm146_vm0, %v164_v19, 0.0 }
 0x114   :  { %167 = vadd.xlane.f32.xlu1 %v166_v20 }
 0x12d   :  { %132 = vperm.xlu1 %1016, %v124_v21  }
 0x187   :  { %v168_v26 = vpop.xlane.xlu1 %167 }
 0x188   :  { %v172_v27 = vmul.f32 %v168_v26, %v1283_v15 }
 0x18a   :  { %v174_v28 = vadd.f32 1e-12, %v172_v27 }
 0x18c   :  { %1028 = vrsqrt.f32 %v174_v28  ;;  %vm182_vm3 = vweird.f32 %v174_v28 }
 0x192   :  { %v1029_v29 = vpop.eup %1028 }
 0x193   :  { %v177_v30 = vmul.f32 %v1029_v29, %v174_v28  ;;  %vm183_vm2 = vweird.f32 %v1029_v29 }
 0x194   :  { %vm184_vm4 = vmor %vm182_vm3, %vm183_vm2 }
 0x195   :  { %v178_v31 = vmul.f32 %v1029_v29, %v177_v30 }
 0x197   :  { %v179_v32 = vmul.f32 0.5, %v178_v31 }
 0x199   :  { %v180_v33 = vsub.f32 1.5, %v179_v32 }
 0x19b   :  { %v181_v34 = vmul.f32 %v1029_v29, %v180_v33 }
 0x19d   :  { %v185_v36 = vsel %vm184_vm4, %v1029_v29, %v181_v34 }
 0x19e   :  { %v196_v38 = vmul.f32 %v185_v36, %v162_v18 }
 0x19f   :  { %v133_v40 = vpop.permute.xlu1 %132 }
 0x1a0   :  { %v136_v41 = vmul.f32 %v133_v40, %v122_v37  ;;  %v201_v42 = vmul.f32 %v1017_v35, %v196_v38 }
 0x1a2   :  { %v138_v44 = vmul.f32 5.656854, %v136_v41  ;;  %v206_v45 = vadd.f32 %v1018_v39, %v201_v42 }
 0x1a4   :  { %v1313_v46 = vadd.f32 %v140_v43, %v138_v44  ;;  %969 = vmatmul.msk.f32.vlgmr.msra.gmra.mxu0 %vm146_vm0, %v206_v45 }
 0x1a6   :  { %v150_v47 = vsel %vm146_vm0, %v1313_v46, 0.0 }
 0x1a7   :  { %151 = vadd.xlane.f32.xlu2 %v150_v47 }
 0x21a   :  { %v152_v48 = vpop.xlane.xlu2 %151 }
 0x21b   :  { %v161_v49 = vmul.f32 %v1283_v15, %v152_v48 }
 0x21d   :  { %v163_v50 = vsub.f32 %v1313_v46, %v161_v49 }
 0x21f   :  { %v165_v52 = vmul.f32 %v163_v50, %v163_v50 }
 0x221   :  { %v239_v53 = vpop.f32.mrf.mxu0  ;;  %v169_v54 = vsel %vm146_vm0, %v165_v52, 0.0 }
 0x222   :  { %v240_v55 = vadd.f32 %v1019_v51, %v239_v53  ;;  %170 = vadd.xlane.f32.xlu2 %v169_v54 }
 0x224   :  { %305 = vrot.lane.b32.xlu0 %v240_v55, %s1135_s23  ;;  %333 = vrot.lane.b32.xlu1 %v240_v55, %s1136_s7 }
 0x23a   :  { %247 = vrot.lane.b32.xlu2 %v240_v55, %s1137_s28 }
 0x242   :  { %331 = vrot.lane.b32.xlu2 %v240_v55, %s1138_s29 }
 0x295   :  { %v171_v56 = vpop.xlane.xlu2 %170 }
 0x296   :  { %v173_v57 = vmul.f32 %v171_v56, %v1283_v15  ;;  %v306_v58 = vpop.permute.xlu0 %305  ;;  %v334_v59 = vpop.permute.xlu1 %333 }
 0x297   :  { %326 = vmatpush.msra.mxu2 %v306_v58  ;;  %974 = vmatpush.xpose.msk.msrb.mxu0 %vm249_vm5, %v334_v59 }
 0x298   :  { %v175_v60 = vadd.f32 1e-12, %v173_v57 }
 0x29a   :  { %1030 = vrsqrt.f32 %v175_v60  ;;  %vm192_vm7 = vweird.f32 %v175_v60 }
 0x29d   :  { %v248_v61 = vpop.permute.xlu2 %247 }
 0x29e   :  { %971 = vmatpush.xpose.msk.msra.mxu1 %vm249_vm5, %v248_v61 }
 0x2a0   :  { %v1031_v62 = vpop.eup %1030 }
 0x2a1   :  { %v187_v63 = vmul.f32 %v1031_v62, %v175_v60  ;;  %972 = vmatmul.msk.f32.vlgmr.msra.gmra.mxu1 %vm249_vm5, %v240_v55  ;;  %vm193_vm6 = vweird.f32 %v1031_v62 }
 0x2a2   :  { %vm194_vm8 = vmor %vm192_vm7, %vm193_vm6 }
 0x2a3   :  { %v188_v1 = vmul.f32 %v1031_v62, %v187_v63 }
 0x2a5   :  { %v189_v2 = vmul.f32 0.5, %v188_v1  ;;  %v332_v10 = vpop.permute.xlu2 %331 }
 0x2a7   :  { %v190_v3 = vsub.f32 1.5, %v189_v2 }
 0x2a9   :  { %v191_v4 = vmul.f32 %v1031_v62, %v190_v3 }
 0x2ab   :  { %v195_v5 = vsel %vm194_vm8, %v1031_v62, %v191_v4  ;;  %v446_v4 = vperm.slane %v1338_v12, 1 }
 0x2ac   :  { %v197_v6 = vmul.f32 %v195_v5, %v163_v50 }
 0x2ad   :  { %vm1376_vm6 = vcmp.eq.s32.totalorder %v446_v4, 1 }
 0x2ae   :  { %v202_v8 = vmul.f32 %v1017_v35, %v197_v6 }
 0x2b0   :  { %v207_v9 = vadd.f32 %v1018_v39, %v202_v8 }
 0x2b2   :  { %970 = vmatmul.msk.f32.gmra.mxu0 %vm146_vm0, %v207_v9 }
 0x2ba   :  { %975 = vmatmul.msk.f32.vlgmr.msrb.gmra.mxu0 %vm249_vm5, %v332_v10 }
 0x31e   :  { %v271_v14 = vpop.f32.mrf.mxu1 }
 0x31f   :  { %v274_v17 = vmul.f32 0.25, %v271_v14 }
 0x321   :  { %v278_v18 = vsel %vm1341_vm10, %v274_v17, -3.4028235e+38 }
 0x322   :  { %v280_v19 = vsel %vm279_vm11, %v278_v18, -inf }
 0x323   :  { %281 = vmax.xlane.f32.xlu1 %v280_v19 }
 0x32f   :  { %v242_v20 = vpop.f32.mrf.mxu0 }
 0x330   :  { %v1352_v24 = vadd.f32 %v1019_v51, %v242_v20 }
 0x337   :  { %v356_v21 = vpop.f32.mrf.mxu0 }
 0x338   :  { %v359_v22 = vmul.f32 0.25, %v356_v21 }
 0x33a   :  { %v360_v0 = vsel %vm1341_vm10, %v359_v22, -3.4028235e+38 }
 0x33b   :  { %v361_v23 = vsel %vm279_vm11, %v360_v0, -inf }
 0x33c   :  { %386 = vrot.lane.b32.xlu1 %v240_v55, %s1139_s4  ;;  %362 = vmax.xlane.f32.xlu2 %v361_v23 }
 0x354   :  { %500 = vrot.lane.b32.xlu2 %v1352_v24, %s1138_s29 }
 0x396   :  { %v282_v25 = vpop.xlane.xlu1 %281 }
 0x397   :  { %v283_v26 = vsub.f32 %v278_v18, %v282_v25 }
 0x399   :  { %v284_v27 = vmul.f32 1.442695, %v283_v26 }
 0x39b   :  { %1032 = vpow2.f32 %v284_v27 }
 0x3a1   :  { %v1033_v28 = vpop.eup %1032 }
 0x3a2   :  { %v286_v29 = vsel %vm279_vm11, %v1033_v28, 0.0 }
 0x3a3   :  { %287 = vadd.xlane.f32.xlu0 %v286_v29 }
 0x3ae   :  { %v387_v30 = vpop.permute.xlu1 %386 }
 0x3af   :  { %v363_v31 = vpop.xlane.xlu2 %362  ;;  %407 = vmatpush.msrb.mxu2 %v387_v30 }
 0x3b0   :  { %v364_v32 = vsub.f32 %v360_v0, %v363_v31 }
 0x3b2   :  { %v365_v33 = vmul.f32 1.442695, %v364_v32 }
 0x3b4   :  { %1034 = vpow2.f32 %v365_v33 }
 0x3b7   :  { %v501_v2 = vpop.permute.xlu2 %500 }
 0x3ba   :  { %v1035_v34 = vpop.eup %1034 }
 0x3bb   :  { %v367_v35 = vsel %vm279_vm11, %v1035_v34, 0.0 }
 0x3bc   :  { %368 = vadd.xlane.f32.xlu0 %v367_v35 }
 0x3d0   :  { %502 = vrot.lane.b32.xlu0 %v1352_v24, %s1136_s7 }
 0x3d8   :  { %419 = vrot.lane.b32.xlu0 %v1352_v24, %s1137_s28 }
 0x416   :  { %v288_v36 = vpop.xlane.xlu0 %287 }
 0x417   :  { %1036 = vrcp.f32 %v288_v36  ;;  %v300_v40 = vand.u32 2147483648, %v288_v36  ;;  %v298_v42 = vand.u32 2147483647, %v288_v36  ;;  %vm294_vm13 = vweird.f32 %v288_v36 }
 0x419   :  { %v301_v44 = vor.u32 1.1754944e-38, %v300_v40  ;;  %vm299_vm15 = vcmp.eq.f32.partialorder %v298_v42, 8.507059e+37  ;;  %v591_v40 = vld [vmem:[#allocation5 + $0x10] sm:$0xff] }
 0x41d   :  { %v1037_v37 = vpop.eup %1036 }
 0x41e   :  { %v290_v38 = vmul.f32 %v1037_v37, %v288_v36  ;;  %vm295_vm12 = vweird.f32 %v1037_v37  ;;  %v592_v36 = vld [vmem:[#allocation5 + $0x18] sm:$0xff] }
 0x41f   :  { %vm296_vm14 = vmor %vm294_vm13, %vm295_vm12 }
 0x420   :  { %v291_v39 = vsub.f32 1.0, %v290_v38 }
 0x422   :  { %v292_v41 = vmul.f32 %v1037_v37, %v291_v39 }
 0x424   :  { %v293_v43 = vadd.f32 %v1037_v37, %v292_v41 }
 0x426   :  { %v297_v45 = vsel %vm296_vm14, %v1037_v37, %v293_v43 }
 0x427   :  { %v302_v47 = vsel %vm299_vm15, %v301_v44, %v297_v45  ;;  %v590_v44 = vld [vmem:[#allocation5 + $0x8] sm:$0xff] }
 0x428   :  { %v303_v48 = vmul.f32 %v1033_v28, %v302_v47 }
 0x42a   :  { %v304_v49 = vsel %vm1341_vm10, %v303_v48, 0.0 }
 0x42b   :  { %973 = vmatmul.msk.f32.vlgmr.msra.gmra.mxu2 %vm279_vm11, %v304_v49 }
 0x42f   :  { %v369_v50 = vpop.xlane.xlu0 %368 }
 0x430   :  { %1038 = vrcp.f32 %v369_v50  ;;  %v381_v54 = vand.u32 2147483648, %v369_v50  ;;  %v379_v56 = vand.u32 2147483647, %v369_v50  ;;  %vm375_vm2 = vweird.f32 %v369_v50 }
 0x432   :  { %v382_v58 = vor.u32 1.1754944e-38, %v381_v54  ;;  %vm380_vm4 = vcmp.eq.f32.partialorder %v379_v56, 8.507059e+37 }
 0x436   :  { %v1039_v51 = vpop.eup %1038 }
 0x437   :  { %v371_v52 = vmul.f32 %v1039_v51, %v369_v50  ;;  %vm376_vm1 = vweird.f32 %v1039_v51  ;;  %v589_v50 = vld [vmem:[#allocation5] sm:$0xff] }
 0x438   :  { %vm377_vm3 = vmor %vm375_vm2, %vm376_vm1 }
 0x439   :  { %v372_v53 = vsub.f32 1.0, %v371_v52 }
 0x43b   :  { %v373_v55 = vmul.f32 %v1039_v51, %v372_v53 }
 0x43d   :  { %v374_v57 = vadd.f32 %v1039_v51, %v373_v55 }
 0x43f   :  { %v378_v59 = vsel %vm377_vm3, %v1039_v51, %v374_v57  ;;  %vm735_vm3 = vcmask 523264  }
 0x440   :  { %v383_v60 = vsel %vm380_vm4, %v382_v58, %v378_v59 }
 0x441   :  { %v384_v61 = vmul.f32 %v1035_v34, %v383_v60 }
 0x442   :  { %v503_v62 = vpop.permute.xlu0 %502 }
 0x443   :  { %980 = vmatpush.xpose.msk.msra.mxu2 %vm249_vm5, %v503_v62  ;;  %v385_v63 = vsel %vm1341_vm10, %v384_v61, 0.0 }
 0x444   :  { %976 = vmatmul.msk.f32.vlgmr.msrb.gmra.mxu2 %vm279_vm11, %v385_v63 }
 0x44a   :  { %v420_v1 = vpop.permute.xlu0 %419 }
 0x44b   :  { %977 = vmatpush.xpose.msk.msrb.mxu1 %vm249_vm5, %v420_v1  ;;  %v1020_v1 = vld [vmem:[%s1564_s9] ss:$0 sm:$0xff] }
 0x44c   :  { %981 = vmatmul.msk.f32.vlgmr.msra.gmra.mxu2 %vm249_vm5, %v501_v2 }
 0x44e   :  { %978 = vmatmul.msk.f32.vlgmr.msrb.gmra.mxu1 %vm249_vm5, %v1352_v24 }
 0x4ae   :  { %v1373_v3 = vpop.f32.mrf.mxu2 }
 0x4c7   :  { %v409_v5 = vpop.f32.mrf.mxu2 }
 0x4cb   :  { %v442_v6 = vpop.f32.mrf.mxu1 }
 0x4cc   :  { %v445_v9 = vmul.f32 0.25, %v442_v6 }
 0x4ce   :  { %v448_v10 = vsel %vm1376_vm6, %v445_v9, -3.4028235e+38 }
 0x4cf   :  { %v525_v11 = vpop.f32.mrf.mxu2  ;;  %v449_v13 = vsel %vm279_vm11, %v448_v10, -inf }
 0x4d0   :  { %v528_v14 = vmul.f32 0.25, %v525_v11  ;;  %450 = vmax.xlane.f32.xlu1 %v449_v13 }
 0x4d2   :  { %v529_v16 = vsel %vm1376_vm6, %v528_v14, -3.4028235e+38 }
 0x4d3   :  { %v530_v12 = vsel %vm279_vm11, %v529_v16, -inf }
 0x4d4   :  { %531 = vmax.xlane.f32.xlu0 %v530_v12 }
 0x4e8   :  { %555 = vrot.lane.b32.xlu0 %v1352_v24, %s1139_s4 }
 0x543   :  { %v451_v17 = vpop.xlane.xlu1 %450 }
 0x544   :  { %v452_v18 = vsub.f32 %v448_v10, %v451_v17 }
 0x546   :  { %v453_v19 = vmul.f32 1.442695, %v452_v18 }
 0x547   :  { %v532_v20 = vpop.xlane.xlu0 %531 }
 0x548   :  { %1040 = vpow2.f32 %v453_v19  ;;  %v533_v21 = vsub.f32 %v529_v16, %v532_v20  ;;  %v687_v19 = vld [vmem:[#allocation7 + $0x18] sm:$0xff]  ;;  %v686_v20 = vld [vmem:[#allocation7 + $0x10] sm:$0xff] }
 0x549   :  { %710 = vmatpush.msra.mxu0 %v687_v19  ;;  %v769_v19 = vld [vmem:[%s1572_s17 + $0x10] sm:$0xff] }
 0x54a   :  { %v534_v22 = vmul.f32 1.442695, %v533_v21  ;;  %v685_v21 = vld [vmem:[#allocation7 + $0x8] sm:$0xff] }
 0x54b   :  { %711 = vmatpush.msra.mxu0 %v686_v20  ;;  %v768_v20 = vld [vmem:[%s1572_s17 + $0x8] sm:$0xff] }
 0x54c   :  { %1042 = vpow2.f32 %v534_v22  ;;  %v684_v22 = vld [vmem:[#allocation7] sm:$0xff] }
 0x54d   :  { %712 = vmatpush.msra.mxu0 %v685_v21 }
 0x54e   :  { %v1041_v0 = vpop.eup %1040 }
 0x54f   :  { %v455_v23 = vsel %vm279_vm11, %v1041_v0, 0.0  ;;  %713 = vmatpush.msra.mxu0 %v684_v22 }
 0x550   :  { %456 = vadd.xlane.f32.xlu1 %v455_v23 }
 0x552   :  { %v1043_v25 = vpop.eup %1042 }
 0x553   :  { %v536_v26 = vsel %vm279_vm11, %v1043_v25, 0.0 }
 0x554   :  { %537 = vadd.xlane.f32.xlu2 %v536_v26 }
 0x55a   :  { %v556_v27 = vpop.permute.xlu0 %555 }
 0x55b   :  { %576 = vmatpush.msra.mxu1 %v556_v27 }
 0x569   :  { %413 = vrot.lane.b32.xlu1 %v409_v5, %s1140_s30 }
 0x56c   :  { %474 = vrot.lane.b32.xlu2 %v1352_v24, %s1135_s23 }
 0x5c3   :  { %v457_v28 = vpop.xlane.xlu1 %456 }
 0x5c4   :  { %1044 = vrcp.f32 %v457_v28  ;;  %v469_v34 = vand.u32 2147483648, %v457_v28  ;;  %v467_v35 = vand.u32 2147483647, %v457_v28  ;;  %vm463_vm8 = vweird.f32 %v457_v28 }
 0x5c6   :  { %v470_v42 = vor.u32 1.1754944e-38, %v469_v34  ;;  %vm468_vm10 = vcmp.eq.f32.partialorder %v467_v35, 8.507059e+37  ;;  %v1022_v34 = vld [vmem:[%s1566_s11] ss:$0 sm:$0xff] }
 0x5c7   :  { %v538_v29 = vpop.xlane.xlu2 %537 }
 0x5c8   :  { %1046 = vrcp.f32 %v538_v29  ;;  %v550_v43 = vand.u32 2147483648, %v538_v29  ;;  %v548_v47 = vand.u32 2147483647, %v538_v29  ;;  %vm544_vm13 = vweird.f32 %v538_v29 }
 0x5ca   :  { %v1045_v30 = vpop.eup %1044  ;;  %v551_v53 = vor.u32 1.1754944e-38, %v550_v43  ;;  %vm549_vm15 = vcmp.eq.f32.partialorder %v548_v47, 8.507059e+37  ;;  %v725_v47 = vld [vmem:[%s1569_s14 + $0x10] sm:$0xff] }
 0x5cb   :  { %v459_v31 = vmul.f32 %v1045_v30, %v457_v28  ;;  %vm464_vm7 = vweird.f32 %v1045_v30 }
 0x5cc   :  { %vm465_vm9 = vmor %vm463_vm8, %vm464_vm7 }
 0x5cd   :  { %v460_v32 = vsub.f32 1.0, %v459_v31  ;;  %v1021_v31 = vld [vmem:[%s1565_s10] ss:$0 sm:$0xff] }
 0x5ce   :  { %v1047_v33 = vpop.eup %1046 }
 0x5cf   :  { %v461_v37 = vmul.f32 %v1045_v30, %v460_v32  ;;  %v540_v38 = vmul.f32 %v1047_v33, %v538_v29  ;;  %v475_v39 = vpop.permute.xlu2 %474  ;;  %vm545_vm12 = vweird.f32 %v1047_v33 }
 0x5d0   :  { %495 = vmatpush.msra.mxu3 %v475_v39  ;;  %vm546_vm14 = vmor %vm544_vm13, %vm545_vm12  ;;  %v728_v39 = vld [vmem:[%s1569_s14 + $0x28] sm:$0xff] }
 0x5d1   :  { %v541_v41 = vsub.f32 1.0, %v540_v38  ;;  %v462_v24 = vadd.f32 %v1045_v30, %v461_v37  ;;  %v730_v37 = vld [vmem:[%s1569_s14 + $0x38] sm:$0xff]  ;;  %v729_v38 = vld [vmem:[%s1569_s14 + $0x30] sm:$0xff] }
 0x5d2   :  { %615 = vmatpush.msrb.mxu3 %v592_v36  ;;  %750 = vmatpush.msrb.mxu2 %v730_v37  ;;  %v1025_v37 = vld [vmem:[%s1575_s20] ss:$0 sm:$0xff] }
 0x5d3   :  { %v542_v45 = vmul.f32 %v1047_v33, %v541_v41  ;;  %v466_v48 = vsel %vm465_vm9, %v1045_v30, %v462_v24  ;;  %v726_v41 = vld [vmem:[%s1569_s14 + $0x18] sm:$0xff] }
 0x5d4   :  { %616 = vmatpush.msrb.mxu3 %v591_v40  ;;  %v471_v49 = vsel %vm468_vm10, %v470_v42, %v466_v48  ;;  %751 = vmatpush.msrb.mxu2 %v729_v38  ;;  %v727_v40 = vld [vmem:[%s1569_s14 + $0x20] sm:$0xff]  ;;  %v724_v48 = vld [vmem:[%s1569_s14 + $0x8] sm:$0xff] }
 0x5d5   :  { %v543_v51 = vadd.f32 %v1047_v33, %v542_v45  ;;  %v472_v52 = vmul.f32 %v1041_v0, %v471_v49  ;;  %v723_v49 = vld [vmem:[%s1569_s14] sm:$0xff] }
 0x5d6   :  { %617 = vmatpush.msrb.mxu3 %v590_v44  ;;  %752 = vmatpush.msrb.mxu2 %v728_v39 }
 0x5d7   :  { %v473_v54 = vsel %vm1376_vm6, %v472_v52, 0.0  ;;  %v547_v55 = vsel %vm546_vm14, %v1047_v33, %v543_v51 }
 0x5d8   :  { %618 = vmatpush.msrb.mxu3 %v589_v50  ;;  %v552_v56 = vsel %vm549_vm15, %v551_v53, %v547_v55  ;;  %753 = vmatpush.msrb.mxu2 %v727_v40  ;;  %v1023_v50 = vld [vmem:[%s1568_s13] ss:$0 sm:$0xff]  ;;  %v840_v55 = vld [vmem:[%s1571_s16 + $0x18] sm:$0xff] }
 0x5d9   :  { %979 = vmatmul.msk.f32.vlgmr.msra.gmra.mxu3 %vm279_vm11, %v473_v54  ;;  %v553_v57 = vmul.f32 %v1043_v25, %v552_v56  ;;  %v776_v54 = vld [vmem:[%s1574_s19 + $0x18] sm:$0xff]  ;;  %853 = vmatpush.msrb.mxu0 %v840_v55 }
 0x5da   :  { %754 = vmatpush.msrb.mxu2 %v726_v41  ;;  %795 = vmatpush.msrb.mxu1 %v776_v54 }
 0x5db   :  { %v414_v58 = vpop.permute.xlu1 %413  ;;  %v554_v59 = vsel %vm1376_vm6, %v553_v57, 0.0 }
 0x5dc   :  { %v416_v60 = vsel %vm249_vm5, %v1373_v3, %v414_v58  ;;  %982 = vmatmul.msk.f32.vlgmr.msra.gmra.mxu1 %vm279_vm11, %v554_v59  ;;  %755 = vmatpush.msrb.mxu2 %v725_v47 }
 0x5dd   :  { %417 = vst.msk [vmem:[#allocation2] sm:$0xff] %vm146_vm0, %v416_v60 }
 0x5de   :  { %756 = vmatpush.msrb.mxu2 %v724_v48 }
 0x5e0   :  { %757 = vmatpush.msrb.mxu2 %v723_v49 }
 0x5e4   :  { %v587_v61 = vld [vmem:[#allocation2] sm:$0xff] }
 0x5e5   :  { %983 = vmatmul.msk.f32.vlgmr.msrb.gmra.mxu3 %vm146_vm0, %v587_v61 }
 0x659   :  { %v578_v62 = vpop.f32.mrf.mxu1 }
 0x65a   :  { %582 = vrot.lane.b32.xlu0 %v578_v62, %s1140_s30 }
 0x65c   :  { %v497_v63 = vpop.f32.mrf.mxu3 }
 0x668   :  { %v620_v2 = vpop.f32.mrf.mxu3 }
 0x669   :  { %v621_v4 = vadd.f32 %v1020_v1, %v620_v2 }
 0x66b   :  { %v1408_v5 = vadd.f32 %v621_v4, %v1279_v7 }
 0x66d   :  { %v630_v3 = vsel %vm146_vm0, %v1408_v5, 0.0 }
 0x684   :  { %631 = vadd.xlane.f32.xlu0 %v630_v3 }
 0x6cc   :  { %v583_v6 = vpop.permute.xlu0 %582 }
 0x6cd   :  { %v585_v8 = vsel %vm249_vm5, %v497_v63, %v583_v6 }
 0x6ce   :  { %586 = vst.msk [vmem:[#allocation2 + $0x8] sm:$0xff] %vm146_vm0, %v585_v8  ;;  %v839_v8 = vld [vmem:[%s1571_s16 + $0x10] sm:$0xff] }
 0x6cf   :  { %854 = vmatpush.msrb.mxu0 %v839_v8 }
 0x6d5   :  { %v588_v9 = vld [vmem:[#allocation2 + $0x8] sm:$0xff] }
 0x6d6   :  { %984 = vmatmul.msk.f32.gmra.mxu3 %vm146_vm0, %v588_v9  ;;  %v774_v9 = vld [vmem:[%s1574_s19 + $0x8] sm:$0xff] }
 0x6f7   :  { %v632_v10 = vpop.xlane.xlu0 %631 }
 0x6f8   :  { %v636_v11 = vmul.f32 %v632_v10, %v1283_v15  ;;  %v838_v10 = vld [vmem:[%s1571_s16 + $0x8] sm:$0xff] }
 0x6f9   :  { %855 = vmatpush.msrb.mxu0 %v838_v10 }
 0x6fa   :  { %v638_v13 = vsub.f32 %v1408_v5, %v636_v11  ;;  %v773_v11 = vld [vmem:[%s1574_s19] sm:$0xff] }
 0x6fc   :  { %v640_v14 = vmul.f32 %v638_v13, %v638_v13 }
 0x6fe   :  { %v642_v7 = vsel %vm146_vm0, %v640_v14, 0.0  ;;  %v1024_v14 = vld [vmem:[%s1570_s15] ss:$0 sm:$0xff] }
 0x6ff   :  { %643 = vadd.xlane.f32.xlu1 %v642_v7 }
 0x759   :  { %v623_v16 = vpop.f32.mrf.mxu3 }
 0x75a   :  { %v624_v12 = vadd.f32 %v1020_v1, %v623_v16 }
 0x75c   :  { %v1419_v17 = vadd.f32 %v624_v12, %v1313_v46 }
 0x75e   :  { %v633_v18 = vsel %vm146_vm0, %v1419_v17, 0.0 }
 0x75f   :  { %634 = vadd.xlane.f32.xlu2 %v633_v18  ;;  %v770_v18 = vld [vmem:[%s1572_s17 + $0x18] sm:$0xff] }
 0x760   :  { %903 = vmatpush.msra.mxu2 %v770_v18 }
 0x762   :  { %904 = vmatpush.msra.mxu2 %v769_v19 }
 0x764   :  { %905 = vmatpush.msra.mxu2 %v768_v20 }
 0x772   :  { %v644_v0 = vpop.xlane.xlu1 %643 }
 0x773   :  { %v648_v23 = vmul.f32 %v644_v0, %v1283_v15 }
 0x775   :  { %v650_v25 = vadd.f32 1e-12, %v648_v23  ;;  %v867_v23 = vld [vmem:[%s1573_s18 + $0x18] sm:$0xff] }
 0x777   :  { %1048 = vrsqrt.f32 %v650_v25  ;;  %vm658_vm1 = vweird.f32 %v650_v25 }
 0x77d   :  { %v1049_v26 = vpop.eup %1048 }
 0x77e   :  { %v653_v46 = vmul.f32 %v1049_v26, %v650_v25  ;;  %vm659_vm11 = vweird.f32 %v1049_v26  ;;  %v866_v25 = vld [vmem:[%s1573_s18 + $0x10] sm:$0xff] }
 0x77f   :  { %vm660_vm2 = vmor %vm658_vm1, %vm659_vm11 }
 0x780   :  { %v654_v27 = vmul.f32 %v1049_v26, %v653_v46  ;;  %v864_v46 = vld [vmem:[%s1573_s18] sm:$0xff] }
 0x782   :  { %v655_v28 = vmul.f32 0.5, %v654_v27 }
 0x784   :  { %v656_v29 = vsub.f32 1.5, %v655_v28 }
 0x786   :  { %v657_v30 = vmul.f32 %v1049_v26, %v656_v29 }
 0x788   :  { %v661_v32 = vsel %vm660_vm2, %v1049_v26, %v657_v30  ;;  %v865_v26 = vld [vmem:[%s1573_s18 + $0x8] sm:$0xff] }
 0x789   :  { %v672_v33 = vmul.f32 %v661_v32, %v638_v13  ;;  %v837_v13 = vld [vmem:[%s1571_s16] sm:$0xff] }
 0x78a   :  { %856 = vmatpush.msrb.mxu0 %v837_v13 }
 0x78b   :  { %v677_v35 = vmul.f32 %v1021_v31, %v672_v33  ;;  %v771_v33 = vld [vmem:[%s1576_s21] sm:$0xff] }
 0x78d   :  { %v682_v36 = vadd.f32 %v1022_v34, %v677_v35  ;;  %v835_v35 = vld [vmem:[%s1577_s22] sm:$0xff] }
 0x78f   :  { %985 = vmatmul.msk.f32.vlgmr.msra.gmra.mxu0 %vm146_vm0, %v682_v36  ;;  %v836_v36 = vld [vmem:[%s1577_s22 + $0x8] sm:$0xff] }
 0x7d2   :  { %v635_v24 = vpop.xlane.xlu2 %634 }
 0x7d3   :  { %v637_v42 = vmul.f32 %v635_v24, %v1283_v15 }
 0x7d5   :  { %v639_v43 = vsub.f32 %v1419_v17, %v637_v42 }
 0x7d7   :  { %v641_v44 = vmul.f32 %v639_v43, %v639_v43 }
 0x7d9   :  { %v645_v45 = vsel %vm146_vm0, %v641_v44, 0.0 }
 0x7da   :  { %646 = vadd.xlane.f32.xlu0 %v645_v45 }
 0x80c   :  { %v715_v51 = vpop.f32.mrf.mxu0 }
 0x80d   :  { %v716_v52 = vadd.f32 %v1023_v50, %v715_v51 }
 0x80f   :  { %v721_v53 = vmax.f32 %v716_v52, 0.0 }
 0x811   :  { %987 = vmatmul.msk.f32.vlgmr.msrb.gmra.mxu2 %vm735_vm3, %v721_v53 }
 0x84d   :  { %v647_v56 = vpop.xlane.xlu0 %646 }
 0x84e   :  { %v649_v57 = vmul.f32 %v647_v56, %v1283_v15  ;;  %v775_v15 = vld [vmem:[%s1574_s19 + $0x10] sm:$0xff] }
 0x84f   :  { %796 = vmatpush.msrb.mxu1 %v775_v15 }
 0x850   :  { %v651_v58 = vadd.f32 1e-12, %v649_v57 }
 0x851   :  { %797 = vmatpush.msrb.mxu1 %v774_v9 }
 0x852   :  { %1050 = vrsqrt.f32 %v651_v58  ;;  %vm668_vm6 = vweird.f32 %v651_v58 }
 0x853   :  { %798 = vmatpush.msrb.mxu1 %v773_v11 }
 0x855   :  { %880 = vmatpush.msra.mxu1 %v867_v23 }
 0x857   :  { %881 = vmatpush.msra.mxu1 %v866_v25 }
 0x858   :  { %v1051_v59 = vpop.eup %1050 }
 0x859   :  { %v663_v60 = vmul.f32 %v1051_v59, %v651_v58  ;;  %vm669_vm4 = vweird.f32 %v1051_v59  ;;  %882 = vmatpush.msra.mxu1 %v865_v26 }
 0x85a   :  { %vm670_vm7 = vmor %vm668_vm6, %vm669_vm4 }
 0x85b   :  { %v664_v61 = vmul.f32 %v1051_v59, %v663_v60  ;;  %883 = vmatpush.msra.mxu1 %v864_v46 }
 0x85d   :  { %v665_v62 = vmul.f32 0.5, %v664_v61 }
 0x85f   :  { %v666_v63 = vsub.f32 1.5, %v665_v62 }
 0x861   :  { %v667_v1 = vmul.f32 %v1051_v59, %v666_v63 }
 0x863   :  { %v671_v2 = vsel %vm670_vm7, %v1051_v59, %v667_v1 }
 0x864   :  { %v673_v4 = vmul.f32 %v671_v2, %v639_v43 }
 0x866   :  { %v678_v3 = vmul.f32 %v1021_v31, %v673_v4 }
 0x868   :  { %v683_v6 = vadd.f32 %v1022_v34, %v678_v3  ;;  %v772_v34 = vld [vmem:[%s1576_s21 + $0x8] sm:$0xff]  ;;  %s1141_s21 = smov 32  }
 0x86a   :  { %986 = vmatmul.msk.f32.gmra.mxu0 %vm146_vm0, %v683_v6 }
 0x894   :  { %v759_v7 = vpop.f32.mrf.mxu2 }
 0x895   :  { %v760_v16 = vadd.f32 %v1024_v14, %v759_v7 }
 0x897   :  { %v765_v12 = vadd.f32 %v760_v16, %v1408_v5  ;;  %v767_v5 = vld [vmem:[%s1572_s17] sm:$0xff] }
 0x898   :  { %906 = vmatpush.msra.mxu2 %v767_v5 }
 0x899   :  { %989 = vmatmul.msk.f32.vlgmr.msrb.gmra.mxu1 %vm146_vm0, %v765_v12  ;;  %993 = vmatmul.msk.f32.vlgmr.msrb.gmra.mxu0 %vm146_vm0, %v765_v12 }
 0x8e7   :  { %v718_v21 = vpop.f32.mrf.mxu0 }
 0x8e8   :  { %v719_v22 = vadd.f32 %v1023_v50, %v718_v21 }
 0x8ea   :  { %v722_v0 = vmax.f32 %v719_v22, 0.0 }
 0x8ec   :  { %988 = vmatmul.msk.f32.gmra.mxu2 %vm735_vm3, %v722_v0 }
 0x8f4   :  { %997 = vmatmul.msk.f32.vlgmr.msra.gmra.mxu2 %vm146_vm0, %v765_v12 }
 0x916   :  { %v800_v30 = vpop.f32.mrf.mxu1  ;;  %v858_v31 = vpop.f32.mrf.mxu0 }
 0x96f   :  { %v762_v27 = vpop.f32.mrf.mxu2 }
 0x970   :  { %v763_v28 = vadd.f32 %v1024_v14, %v762_v27 }
 0x972   :  { %v766_v29 = vadd.f32 %v763_v28, %v1419_v17 }
 0x974   :  { %990 = vmatmul.msk.f32.gmra.mxu1 %vm146_vm0, %v766_v29  ;;  %994 = vmatmul.msk.f32.gmra.mxu0 %vm146_vm0, %v766_v29 }
 0x975   :  { %998 = vmatmul.msk.f32.gmra.mxu2 %vm146_vm0, %v766_v29 }
 0x977   :  { %v908_v38 = vpop.f32.mrf.mxu2 }
 0x97c   :  { %995 = vmatmul.msk.f32.vlgmr.msra.gmra.mxu1 %vm146_vm0, %v765_v12 }
 0x984   :  { %996 = vmatmul.msk.f32.gmra.mxu1 %vm146_vm0, %v766_v29 }
 0x9f1   :  { %v803_v32 = vpop.f32.mrf.mxu1  ;;  %v861_v17 = vpop.f32.mrf.mxu0 }
 0x9f2   :  { %826 = vmatpush.msra.mxu3 %v803_v32 }
 0x9f4   :  { %827 = vmatpush.msra.mxu3 %v800_v30 }
 0x9f5   :  { %991 = vmatmul.msk.f32.vlgmr.msra.gmra.mxu3 %vm249_vm5, %v771_v33 }
 0x9f6   :  { %940 = vmatpush.msrb.mxu3 %v861_v17 }
 0x9f8   :  { %941 = vmatpush.msrb.mxu3 %v858_v31  ;;  %v911_v24 = vpop.f32.mrf.mxu2 }
 0x9f9   :  { %v885_v45 = vpop.f32.mrf.mxu1 }
 0x9fd   :  { %992 = vmatmul.msk.f32.gmra.mxu3 %vm249_vm5, %v772_v34 }
 0xa01   :  { %v888_v50 = vpop.f32.mrf.mxu1 }
 0xa05   :  { %999 = vmatmul.msk.f32.vlgmr.msrb.gmra.mxu3 %vm249_vm5, %v835_v35 }
 0xa0d   :  { %1000 = vmatmul.msk.f32.gmra.mxu3 %vm249_vm5, %v836_v36 }
 0xa78   :  { %v829_v39 = vpop.f32.mrf.mxu3 }
 0xa79   :  { %v909_v40 = vadd.f32 %v908_v38, %v829_v39 }
 0xa7b   :  { %v918_v41 = vadd.f32 %v1025_v37, %v909_v40 }
 0xa80   :  { %v832_v42 = vpop.f32.mrf.mxu3 }
 0xa81   :  { %v912_v43 = vadd.f32 %v911_v24, %v832_v42 }
 0xa83   :  { %v919_v44 = vadd.f32 %v1025_v37, %v912_v43 }
 0xa88   :  { %v943_v47 = vpop.f32.mrf.mxu3 }
 0xa89   :  { %v944_v48 = vadd.f32 %v943_v47, %v885_v45 }
 0xa8b   :  { %v949_v49 = vadd.f32 %v1025_v37, %v944_v48 }
 0xa8d   :  { %953 = vrot.lane.b32.xlu2 %v949_v49, %s1141_s21 }
 0xa90   :  { %v946_v51 = vpop.f32.mrf.mxu3 }
 0xa91   :  { %v947_v52 = vadd.f32 %v946_v51, %v888_v50 }
 0xa93   :  { %v950_v53 = vadd.f32 %v1025_v37, %v947_v52 }
 0xa95   :  { %955 = vrot.lane.b32.xlu0 %v950_v53, %s1141_s21 }
 0xae7   :  { %v954_v54 = vpop.permute.xlu2 %953 }
 0xae8   :  { %v959_v55 = vsel %vm146_vm0, %v918_v41, %v954_v54 }
 0xae9   :  { %961 = vst.msk [vmem:[%s1604_s0] sm:$0xff] %vm735_vm3, %v959_v55 }
 0xb07   :  { %v956_v56 = vpop.permute.xlu0 %955 }
 0xb08   :  { %v960_v57 = vsel %vm146_vm0, %v919_v44, %v956_v56 }
 0xb09   :  { %962 = vst.msk [vmem:[%s1604_s0 + $0x8] sm:$0xff] %vm735_vm3, %v960_v57 }
 0xb0a   :  { %967 = vsyncpa [#allocation4], 1 }
 0xb0b   :  { %968 = vsyncpa [#allocation6], 1 }

</bundles_post_ra>
